<compile_context>
chip_gen: v7x
topology: tpu7x:2x2x1
jax: 0.10.0
libtpu: 0.0.40
codegen_flags: <defaults>
</compile_context>

<pallas_src>
import jax
import jax.numpy as jnp
from jax.experimental import pallas as pl
from jax.experimental.pallas import tpu as pltpu

FEATURE_BINS = 512
D_K = D_V = 64
N_HEADS = 8
LN_EPS = 1e-5  # PyTorch nn.LayerNorm default


def _layer_norm(x, gamma, beta):
    mean = jnp.mean(x, axis=-1, keepdims=True)
    var = jnp.mean((x - mean) ** 2, axis=-1, keepdims=True)
    return (x - mean) * jax.lax.rsqrt(var + LN_EPS) * gamma + beta


def mha_kernel(q_ref, k_ref, v_ref,
               wq_ref, bq_ref, wk_ref, bk_ref, wv_ref, bv_ref,
               wo_ref, bo_ref, ln_g_ref, ln_b_ref,
               out_ref, attn_ref, ctx_scratch):
    TB, S, F = q_ref.shape
    M = TB * S
    bf16 = jnp.bfloat16

    # (TB, S, F) -> (TB*S, F): leading-dim merge only (no relayout).
    Q = q_ref[...].reshape(M, F)
    K = k_ref[...].reshape(M, F)
    V = v_ref[...].reshape(M, F)

    # QKV projections on the full batch-tile slab (bf16 MXU, f32 accumulate).
    q_s = jnp.dot(Q.astype(bf16), wq_ref[...],
                  preferred_element_type=jnp.float32) + bq_ref[...]
    k_s = jnp.dot(K.astype(bf16), wk_ref[...],
                  preferred_element_type=jnp.float32) + bk_ref[...]
    v_s = jnp.dot(V.astype(bf16), wv_ref[...],
                  preferred_element_type=jnp.float32) + bv_ref[...]

    # Per-head scaled-dot-product attention (NOTE: the reference module does
    # NOT divide by sqrt(d_k), so neither do we).  Heads are unrolled
    # statically but the batch tile is handled by one einsum per head.
    attn_parts = []
    for h in range(N_HEADS):
        qh = q_s[:, h * D_K:(h + 1) * D_K].astype(bf16).reshape(TB, S, D_K)
        kh = k_s[:, h * D_K:(h + 1) * D_K].astype(bf16).reshape(TB, S, D_K)
        vh = v_s[:, h * D_V:(h + 1) * D_V].astype(bf16).reshape(TB, S, D_V)

        scores = jnp.einsum('bqd,bkd->bqk', qh, kh,
                            preferred_element_type=jnp.float32)      # (TB,S,S)
        scores = scores - jnp.max(scores, axis=-1, keepdims=True)
        e = jnp.exp(scores)
        attn_h = e * pl.reciprocal(jnp.sum(e, axis=-1, keepdims=True),
                                   approx=True)
        attn_parts.append(attn_h)

        ctx_h = jnp.einsum('bqk,bkd->bqd', attn_h.astype(bf16), vh,
                           preferred_element_type=jnp.float32)       # (TB,S,dv)
        ctx_scratch[:, h * D_V:(h + 1) * D_V] = ctx_h.reshape(M, D_V).astype(bf16)

    # Single lane-denser attention-weights store: (TB, S, H*S).
    attn_ref[...] = jnp.concatenate(attn_parts, axis=-1)

    # Output projection + residual + LayerNorm (all on the (M, F) slab).
    context = ctx_scratch[...]                                       # bf16 (M, HD)
    mha = jnp.dot(context, wo_ref[...],
                  preferred_element_type=jnp.float32) + bo_ref[...]
    x = _layer_norm(mha + Q, ln_g_ref[...], ln_b_ref[...])
    out_ref[...] = x.reshape(TB, S, F)


def multi_head_attention(Q, K, V, params):
    B, S, F = Q.shape
    HD = N_HEADS * D_K
    wq, bq, wk, bk, wv, bv, wo, bo, g, beta = params

    # bf16 weight matrices (halved weight DMA; bf16 MXU).  Biases/LN stay f32.
    bf16 = jnp.bfloat16
    wq_b, wk_b, wv_b, wo_b = (w.astype(bf16) for w in (wq, wk, wv, wo))

    # Collapse the batch into the matmul M dimension (tile of up to 8 batches).
    TB = B if B <= 8 else 8
    assert B % TB == 0, "batch must be divisible by the batch tile"
    grid = (B // TB,)

    def full_spec(shape):
        n = len(shape)
        return pl.BlockSpec(shape, lambda b, _n=n: (0,) * _n)

    batched3 = lambda: pl.BlockSpec((TB, S, F), lambda b: (b, 0, 0))

    in_specs = [
        batched3(), batched3(), batched3(),          # Q, K, V
        full_spec((F, HD)), full_spec((1, HD)),      # W_Q, b_Q
        full_spec((F, HD)), full_spec((1, HD)),      # W_K, b_K
        full_spec((F, HD)), full_spec((1, HD)),      # W_V, b_V
        full_spec((HD, F)), full_spec((1, F)),       # W_O, b_O
        full_spec((1, F)), full_spec((1, F)),        # LN gamma, beta
    ]
    out_specs = [
        pl.BlockSpec((TB, S, F), lambda b: (b, 0, 0)),
        pl.BlockSpec((TB, S, N_HEADS * S), lambda b: (b, 0, 0)),
    ]
    out_shape = [
        jax.ShapeDtypeStruct((B, S, F), jnp.float32),
        jax.ShapeDtypeStruct((B, S, N_HEADS * S), jnp.float32),
    ]

    out, attn_raw = pl.pallas_call(
        mha_kernel,
        out_shape=out_shape,
        grid_spec=pltpu.PrefetchScalarGridSpec(
            num_scalar_prefetch=0,
            grid=grid,
            in_specs=in_specs,
            out_specs=out_specs,
            scratch_shapes=[pltpu.VMEM((TB * S, HD), jnp.bfloat16)],
        ),
        compiler_params=pltpu.CompilerParams(
            dimension_semantics=("parallel",),
            vmem_limit_bytes=32 * 1024 * 1024,
        ),
    )(Q, K, V, wq_b, bq, wk_b, bk, wv_b, bv, wo_b, bo, g, beta)

    # (B, S, H*S) -> (B, H, S, S) to match the PyTorch module's attn layout.
    attn = attn_raw.reshape(B, S, N_HEADS, S).transpose(0, 2, 1, 3)
    return out, attn


def reference(Q, K, V, params):
    """Pure-JAX (f32) re-implementation of the PyTorch forward."""
    wq, bq, wk, bk, wv, bv, wo, bo, g, beta = params
    B, S, F = Q.shape
    q_s = (Q @ wq + bq).reshape(B, S, N_HEADS, D_K).transpose(0, 2, 1, 3)
    k_s = (K @ wk + bk).reshape(B, S, N_HEADS, D_K).transpose(0, 2, 1, 3)
    v_s = (V @ wv + bv).reshape(B, S, N_HEADS, D_V).transpose(0, 2, 1, 3)
    scores = jnp.einsum('bhqd,bhkd->bhqk', q_s, k_s)
    attn = jax.nn.softmax(scores, axis=-1)
    ctx = jnp.einsum('bhqk,bhkd->bhqd', attn, v_s)
    ctx = ctx.transpose(0, 2, 1, 3).reshape(B, S, N_HEADS * D_V)
    out = _layer_norm(ctx @ wo + bo + Q, g, beta)
    return out, attn


def make_params(key):
    HD = N_HEADS * D_K
    ks = jax.random.split(key, 10)
    f32 = jnp.float32
    wq = jax.random.normal(ks[0], (FEATURE_BINS, HD), f32) * 0.05
    bq = jax.random.normal(ks[1], (1, HD), f32) * 0.05
    wk = jax.random.normal(ks[2], (FEATURE_BINS, HD), f32) * 0.05
    bk = jax.random.normal(ks[3], (1, HD), f32) * 0.05
    wv = jax.random.normal(ks[4], (FEATURE_BINS, HD), f32) * 0.05
    bv = jax.random.normal(ks[5], (1, HD), f32) * 0.05
    wo = jax.random.normal(ks[6], (HD, FEATURE_BINS), f32) * 0.05
    bo = jax.random.normal(ks[7], (1, FEATURE_BINS), f32) * 0.05
    g = 1.0 + 0.1 * jax.random.normal(ks[8], (1, FEATURE_BINS), f32)
    beta = 0.1 * jax.random.normal(ks[9], (1, FEATURE_BINS), f32)
    return (wq, bq, wk, bk, wv, bv, wo, bo, g, beta)


if __name__ == "__main__":
    key = jax.random.PRNGKey(0)
    kq, kk, kv, kp = jax.random.split(key, 4)
    B, S = 2, 8
    Q = jax.random.normal(kq, (B, S, FEATURE_BINS), jnp.float32) * 0.1
    K = jax.random.normal(kk, (B, S, FEATURE_BINS), jnp.float32) * 0.1
    V = jax.random.normal(kv, (B, S, FEATURE_BINS), jnp.float32) * 0.1
    params = make_params(kp)

    out, attn = multi_head_attention(Q, K, V, params)
    out = jax.block_until_ready(out)
    attn = jax.block_until_ready(attn)

    ref_out, ref_attn = reference(Q, K, V, params)
    assert out.shape == (B, S, FEATURE_BINS)
    assert attn.shape == (B, N_HEADS, S, S)
    # bf16 matmuls + approx reciprocal => relaxed tolerances vs the f32 ref.
    assert jnp.allclose(out, ref_out, atol=3e-2, rtol=3e-2), "output mismatch"
    assert jnp.allclose(attn, ref_attn, atol=1e-2, rtol=1e-2), "attn mismatch"
    print("KERNEL_OK")
</pallas_src>

<mosaic_0001>
module attributes {stable_mosaic.version = 11 : i64} {
  func.func @mha_kernel(%arg0: i32, %arg1: memref<2x8x512xf32, #tpu.memory_space<vmem>>, %arg2: memref<2x8x512xf32, #tpu.memory_space<vmem>>, %arg3: memref<2x8x512xf32, #tpu.memory_space<vmem>>, %arg4: memref<512x512xbf16, #tpu.memory_space<vmem>>, %arg5: memref<1x512xf32, #tpu.memory_space<vmem>>, %arg6: memref<512x512xbf16, #tpu.memory_space<vmem>>, %arg7: memref<1x512xf32, #tpu.memory_space<vmem>>, %arg8: memref<512x512xbf16, #tpu.memory_space<vmem>>, %arg9: memref<1x512xf32, #tpu.memory_space<vmem>>, %arg10: memref<512x512xbf16, #tpu.memory_space<vmem>>, %arg11: memref<1x512xf32, #tpu.memory_space<vmem>>, %arg12: memref<1x512xf32, #tpu.memory_space<vmem>>, %arg13: memref<1x512xf32, #tpu.memory_space<vmem>>, %arg14: memref<2x8x512xf32, #tpu.memory_space<vmem>>, %arg15: memref<2x8x64xf32, #tpu.memory_space<vmem>>, %arg16: memref<16x512xbf16, #tpu.memory_space<vmem>>) attributes {dimension_semantics = [#tpu.dimension_semantics<parallel>], iteration_bounds = array<i64: 1>, scalar_prefetch = 0 : i64, scratch_operands = 1 : i64, tpu.core_type = #tpu.core_type<tc>, window_params = [{transform_indices = @transform_0, window_bounds = array<i64: 2, 8, 512>}, {transform_indices = @transform_1, window_bounds = array<i64: 2, 8, 512>}, {transform_indices = @transform_2, window_bounds = array<i64: 2, 8, 512>}, {pipeline_mode = #tpu.pipeline_mode<synchronous>, transform_indices = @transform_3, window_bounds = array<i64: 512, 512>}, {pipeline_mode = #tpu.pipeline_mode<synchronous>, transform_indices = @transform_4, window_bounds = array<i64: 1, 512>}, {pipeline_mode = #tpu.pipeline_mode<synchronous>, transform_indices = @transform_5, window_bounds = array<i64: 512, 512>}, {pipeline_mode = #tpu.pipeline_mode<synchronous>, transform_indices = @transform_6, window_bounds = array<i64: 1, 512>}, {pipeline_mode = #tpu.pipeline_mode<synchronous>, transform_indices = @transform_7, window_bounds = array<i64: 512, 512>}, {pipeline_mode = #tpu.pipeline_mode<synchronous>, transform_indices = @transform_8, window_bounds = array<i64: 1, 512>}, {pipeline_mode = #tpu.pipeline_mode<synchronous>, transform_indices = @transform_9, window_bounds = array<i64: 512, 512>}, {pipeline_mode = #tpu.pipeline_mode<synchronous>, transform_indices = @transform_10, window_bounds = array<i64: 1, 512>}, {pipeline_mode = #tpu.pipeline_mode<synchronous>, transform_indices = @transform_11, window_bounds = array<i64: 1, 512>}, {pipeline_mode = #tpu.pipeline_mode<synchronous>, transform_indices = @transform_12, window_bounds = array<i64: 1, 512>}, {transform_indices = @transform_13, window_bounds = array<i64: 2, 8, 512>}, {transform_indices = @transform_14, window_bounds = array<i64: 2, 8, 64>}]} {
    %c0 = arith.constant 0 : index
    %c0_0 = arith.constant 0 : index
    %c0_1 = arith.constant 0 : index
    %0 = vector.load %arg1[%c0, %c0_0, %c0_1] : memref<2x8x512xf32, #tpu.memory_space<vmem>>, vector<2x8x512xf32>
    %1 = vector.shape_cast %0 : vector<2x8x512xf32> to vector<16x512xf32>
    %c0_2 = arith.constant 0 : index
    %c0_3 = arith.constant 0 : index
    %c0_4 = arith.constant 0 : index
    %2 = vector.load %arg2[%c0_2, %c0_3, %c0_4] : memref<2x8x512xf32, #tpu.memory_space<vmem>>, vector<2x8x512xf32>
    %3 = vector.shape_cast %2 : vector<2x8x512xf32> to vector<16x512xf32>
    %c0_5 = arith.constant 0 : index
    %c0_6 = arith.constant 0 : index
    %c0_7 = arith.constant 0 : index
    %4 = vector.load %arg3[%c0_5, %c0_6, %c0_7] : memref<2x8x512xf32, #tpu.memory_space<vmem>>, vector<2x8x512xf32>
    %5 = vector.shape_cast %4 : vector<2x8x512xf32> to vector<16x512xf32>
    %6 = arith.truncf %1 : vector<16x512xf32> to vector<16x512xbf16>
    %c0_8 = arith.constant 0 : index
    %c0_9 = arith.constant 0 : index
    %7 = vector.load %arg4[%c0_8, %c0_9] : memref<512x512xbf16, #tpu.memory_space<vmem>>, vector<512x512xbf16>
    %cst = arith.constant dense<0.000000e+00> : vector<16x512xf32>
    %8 = tpu.matmul %6, %7, %cst {dimension_numbers = #tpu.dot_dimension_numbers<[1], [0], [0], [1], [0, 0, 1, 1], [], []>} : vector<16x512xbf16>, vector<512x512xbf16>, vector<16x512xf32> -> vector<16x512xf32>
    %c0_10 = arith.constant 0 : index
    %c0_11 = arith.constant 0 : index
    %9 = vector.load %arg5[%c0_10, %c0_11] : memref<1x512xf32, #tpu.memory_space<vmem>>, vector<1x512xf32>
    %10 = vector.broadcast %9 : vector<1x512xf32> to vector<16x512xf32>
    %11 = arith.addf %8, %10 : vector<16x512xf32>
    %12 = arith.truncf %3 : vector<16x512xf32> to vector<16x512xbf16>
    %c0_12 = arith.constant 0 : index
    %c0_13 = arith.constant 0 : index
    %13 = vector.load %arg6[%c0_12, %c0_13] : memref<512x512xbf16, #tpu.memory_space<vmem>>, vector<512x512xbf16>
    %cst_14 = arith.constant dense<0.000000e+00> : vector<16x512xf32>
    %14 = tpu.matmul %12, %13, %cst_14 {dimension_numbers = #tpu.dot_dimension_numbers<[1], [0], [0], [1], [0, 0, 1, 1], [], []>} : vector<16x512xbf16>, vector<512x512xbf16>, vector<16x512xf32> -> vector<16x512xf32>
    %c0_15 = arith.constant 0 : index
    %c0_16 = arith.constant 0 : index
    %15 = vector.load %arg7[%c0_15, %c0_16] : memref<1x512xf32, #tpu.memory_space<vmem>>, vector<1x512xf32>
    %16 = vector.broadcast %15 : vector<1x512xf32> to vector<16x512xf32>
    %17 = arith.addf %14, %16 : vector<16x512xf32>
    %18 = arith.truncf %5 : vector<16x512xf32> to vector<16x512xbf16>
    %c0_17 = arith.constant 0 : index
    %c0_18 = arith.constant 0 : index
    %19 = vector.load %arg8[%c0_17, %c0_18] : memref<512x512xbf16, #tpu.memory_space<vmem>>, vector<512x512xbf16>
    %cst_19 = arith.constant dense<0.000000e+00> : vector<16x512xf32>
    %20 = tpu.matmul %18, %19, %cst_19 {dimension_numbers = #tpu.dot_dimension_numbers<[1], [0], [0], [1], [0, 0, 1, 1], [], []>} : vector<16x512xbf16>, vector<512x512xbf16>, vector<16x512xf32> -> vector<16x512xf32>
    %c0_20 = arith.constant 0 : index
    %c0_21 = arith.constant 0 : index
    %21 = vector.load %arg9[%c0_20, %c0_21] : memref<1x512xf32, #tpu.memory_space<vmem>>, vector<1x512xf32>
    %22 = vector.broadcast %21 : vector<1x512xf32> to vector<16x512xf32>
    %23 = arith.addf %20, %22 : vector<16x512xf32>
    %24 = vector.extract_strided_slice %11 {offsets = [0, 0], sizes = [16, 64], strides = [1, 1]} : vector<16x512xf32> to vector<16x64xf32>
    %25 = arith.truncf %24 : vector<16x64xf32> to vector<16x64xbf16>
    %26 = vector.shape_cast %25 : vector<16x64xbf16> to vector<2x8x64xbf16>
    %27 = vector.extract_strided_slice %17 {offsets = [0, 0], sizes = [16, 64], strides = [1, 1]} : vector<16x512xf32> to vector<16x64xf32>
    %28 = arith.truncf %27 : vector<16x64xf32> to vector<16x64xbf16>
    %29 = vector.shape_cast %28 : vector<16x64xbf16> to vector<2x8x64xbf16>
    %30 = vector.extract_strided_slice %23 {offsets = [0, 0], sizes = [16, 64], strides = [1, 1]} : vector<16x512xf32> to vector<16x64xf32>
    %31 = arith.truncf %30 : vector<16x64xf32> to vector<16x64xbf16>
    %32 = vector.shape_cast %31 : vector<16x64xbf16> to vector<2x8x64xbf16>
    "tpu.trace_start"() <{level = 10 : i32, message = "bqd,bkd->bqk"}> : () -> ()
    %cst_22 = arith.constant dense<0.000000e+00> : vector<2x8x8xf32>
    %33 = tpu.matmul %26, %29, %cst_22 {dimension_numbers = #tpu.dot_dimension_numbers<[2], [2], [1], [1], [0, 0, 0, 1, 1, 1], [0], [0]>} : vector<2x8x64xbf16>, vector<2x8x64xbf16>, vector<2x8x8xf32> -> vector<2x8x8xf32>
    "tpu.trace_stop"() : () -> ()
    %cst_23 = arith.constant dense<0xFF800000> : vector<2x8xf32>
    %34 = vector.multi_reduction <maximumf>, %33, %cst_23 [2] : vector<2x8x8xf32> to vector<2x8xf32>
    %35 = vector.shape_cast %34 : vector<2x8xf32> to vector<2x8x1xf32>
    %36 = vector.broadcast %35 : vector<2x8x1xf32> to vector<2x8x8xf32>
    %37 = arith.subf %33, %36 : vector<2x8x8xf32>
    %38 = math.exp %37 : vector<2x8x8xf32>
    %cst_24 = arith.constant dense<0.000000e+00> : vector<2x8xf32>
    %39 = vector.multi_reduction <add>, %38, %cst_24 [2] : vector<2x8x8xf32> to vector<2x8xf32>
    %40 = vector.shape_cast %39 : vector<2x8xf32> to vector<2x8x1xf32>
    %41 = tpu.reciprocal %40 {approx = true} : vector<2x8x1xf32> -> vector<2x8x1xf32>
    %42 = vector.broadcast %41 : vector<2x8x1xf32> to vector<2x8x8xf32>
    %43 = arith.mulf %38, %42 : vector<2x8x8xf32>
    %44 = arith.truncf %43 : vector<2x8x8xf32> to vector<2x8x8xbf16>
    "tpu.trace_start"() <{level = 10 : i32, message = "bqk,bkd->bqd"}> : () -> ()
    %cst_25 = arith.constant dense<0.000000e+00> : vector<2x8x64xf32>
    %45 = tpu.matmul %44, %32, %cst_25 {dimension_numbers = #tpu.dot_dimension_numbers<[2], [1], [1], [2], [0, 0, 0, 1, 1, 2], [0], [0]>} : vector<2x8x8xbf16>, vector<2x8x64xbf16>, vector<2x8x64xf32> -> vector<2x8x64xf32>
    "tpu.trace_stop"() : () -> ()
    %46 = vector.shape_cast %45 : vector<2x8x64xf32> to vector<16x64xf32>
    %47 = arith.truncf %46 : vector<16x64xf32> to vector<16x64xbf16>
    %c0_26 = arith.constant 0 : index
    %c0_27 = arith.constant 0 : index
    %48 = vector.load %arg16[%c0_26, %c0_27] : memref<16x512xbf16, #tpu.memory_space<vmem>>, vector<16x64xbf16>
    tpu.vector_store %arg16[%c0_26, %c0_27], %47 {strides = array<i32>} : memref<16x512xbf16, #tpu.memory_space<vmem>>, vector<16x64xbf16>,
    %49 = vector.extract_strided_slice %11 {offsets = [0, 64], sizes = [16, 64], strides = [1, 1]} : vector<16x512xf32> to vector<16x64xf32>
    %50 = arith.truncf %49 : vector<16x64xf32> to vector<16x64xbf16>
    %51 = vector.shape_cast %50 : vector<16x64xbf16> to vector<2x8x64xbf16>
    %52 = vector.extract_strided_slice %17 {offsets = [0, 64], sizes = [16, 64], strides = [1, 1]} : vector<16x512xf32> to vector<16x64xf32>
    %53 = arith.truncf %52 : vector<16x64xf32> to vector<16x64xbf16>
    %54 = vector.shape_cast %53 : vector<16x64xbf16> to vector<2x8x64xbf16>
    %55 = vector.extract_strided_slice %23 {offsets = [0, 64], sizes = [16, 64], strides = [1, 1]} : vector<16x512xf32> to vector<16x64xf32>
    %56 = arith.truncf %55 : vector<16x64xf32> to vector<16x64xbf16>
    %57 = vector.shape_cast %56 : vector<16x64xbf16> to vector<2x8x64xbf16>
    "tpu.trace_start"() <{level = 10 : i32, message = "bqd,bkd->bqk"}> : () -> ()
    %cst_28 = arith.constant dense<0.000000e+00> : vector<2x8x8xf32>
    %58 = tpu.matmul %51, %54, %cst_28 {dimension_numbers = #tpu.dot_dimension_numbers<[2], [2], [1], [1], [0, 0, 0, 1, 1, 1], [0], [0]>} : vector<2x8x64xbf16>, vector<2x8x64xbf16>, vector<2x8x8xf32> -> vector<2x8x8xf32>
    "tpu.trace_stop"() : () -> ()
    %cst_29 = arith.constant dense<0xFF800000> : vector<2x8xf32>
    %59 = vector.multi_reduction <maximumf>, %58, %cst_29 [2] : vector<2x8x8xf32> to vector<2x8xf32>
    %60 = vector.shape_cast %59 : vector<2x8xf32> to vector<2x8x1xf32>
    %61 = vector.broadcast %60 : vector<2x8x1xf32> to vector<2x8x8xf32>
    %62 = arith.subf %58, %61 : vector<2x8x8xf32>
    %63 = math.exp %62 : vector<2x8x8xf32>
    %cst_30 = arith.constant dense<0.000000e+00> : vector<2x8xf32>
    %64 = vector.multi_reduction <add>, %63, %cst_30 [2] : vector<2x8x8xf32> to vector<2x8xf32>
    %65 = vector.shape_cast %64 : vector<2x8xf32> to vector<2x8x1xf32>
    %66 = tpu.reciprocal %65 {approx = true} : vector<2x8x1xf32> -> vector<2x8x1xf32>
    %67 = vector.broadcast %66 : vector<2x8x1xf32> to vector<2x8x8xf32>
    %68 = arith.mulf %63, %67 : vector<2x8x8xf32>
    %69 = arith.truncf %68 : vector<2x8x8xf32> to vector<2x8x8xbf16>
    "tpu.trace_start"() <{level = 10 : i32, message = "bqk,bkd->bqd"}> : () -> ()
    %cst_31 = arith.constant dense<0.000000e+00> : vector<2x8x64xf32>
    %70 = tpu.matmul %69, %57, %cst_31 {dimension_numbers = #tpu.dot_dimension_numbers<[2], [1], [1], [2], [0, 0, 0, 1, 1, 2], [0], [0]>} : vector<2x8x8xbf16>, vector<2x8x64xbf16>, vector<2x8x64xf32> -> vector<2x8x64xf32>
    "tpu.trace_stop"() : () -> ()
    %71 = vector.shape_cast %70 : vector<2x8x64xf32> to vector<16x64xf32>
    %72 = arith.truncf %71 : vector<16x64xf32> to vector<16x64xbf16>
    %c0_32 = arith.constant 0 : index
    %c64 = arith.constant 64 : index
    %73 = vector.load %arg16[%c0_32, %c64] : memref<16x512xbf16, #tpu.memory_space<vmem>>, vector<16x64xbf16>
    tpu.vector_store %arg16[%c0_32, %c64], %72 {strides = array<i32>} : memref<16x512xbf16, #tpu.memory_space<vmem>>, vector<16x64xbf16>,
    %74 = vector.extract_strided_slice %11 {offsets = [0, 128], sizes = [16, 64], strides = [1, 1]} : vector<16x512xf32> to vector<16x64xf32>
    %75 = arith.truncf %74 : vector<16x64xf32> to vector<16x64xbf16>
    %76 = vector.shape_cast %75 : vector<16x64xbf16> to vector<2x8x64xbf16>
    %77 = vector.extract_strided_slice %17 {offsets = [0, 128], sizes = [16, 64], strides = [1, 1]} : vector<16x512xf32> to vector<16x64xf32>
    %78 = arith.truncf %77 : vector<16x64xf32> to vector<16x64xbf16>
    %79 = vector.shape_cast %78 : vector<16x64xbf16> to vector<2x8x64xbf16>
    %80 = vector.extract_strided_slice %23 {offsets = [0, 128], sizes = [16, 64], strides = [1, 1]} : vector<16x512xf32> to vector<16x64xf32>
    %81 = arith.truncf %80 : vector<16x64xf32> to vector<16x64xbf16>
    %82 = vector.shape_cast %81 : vector<16x64xbf16> to vector<2x8x64xbf16>
    "tpu.trace_start"() <{level = 10 : i32, message = "bqd,bkd->bqk"}> : () -> ()
    %cst_33 = arith.constant dense<0.000000e+00> : vector<2x8x8xf32>
    %83 = tpu.matmul %76, %79, %cst_33 {dimension_numbers = #tpu.dot_dimension_numbers<[2], [2], [1], [1], [0, 0, 0, 1, 1, 1], [0], [0]>} : vector<2x8x64xbf16>, vector<2x8x64xbf16>, vector<2x8x8xf32> -> vector<2x8x8xf32>
    "tpu.trace_stop"() : () -> ()
    %cst_34 = arith.constant dense<0xFF800000> : vector<2x8xf32>
    %84 = vector.multi_reduction <maximumf>, %83, %cst_34 [2] : vector<2x8x8xf32> to vector<2x8xf32>
    %85 = vector.shape_cast %84 : vector<2x8xf32> to vector<2x8x1xf32>
    %86 = vector.broadcast %85 : vector<2x8x1xf32> to vector<2x8x8xf32>
    %87 = arith.subf %83, %86 : vector<2x8x8xf32>
    %88 = math.exp %87 : vector<2x8x8xf32>
    %cst_35 = arith.constant dense<0.000000e+00> : vector<2x8xf32>
    %89 = vector.multi_reduction <add>, %88, %cst_35 [2] : vector<2x8x8xf32> to vector<2x8xf32>
    %90 = vector.shape_cast %89 : vector<2x8xf32> to vector<2x8x1xf32>
    %91 = tpu.reciprocal %90 {approx = true} : vector<2x8x1xf32> -> vector<2x8x1xf32>
    %92 = vector.broadcast %91 : vector<2x8x1xf32> to vector<2x8x8xf32>
    %93 = arith.mulf %88, %92 : vector<2x8x8xf32>
    %94 = arith.truncf %93 : vector<2x8x8xf32> to vector<2x8x8xbf16>
    "tpu.trace_start"() <{level = 10 : i32, message = "bqk,bkd->bqd"}> : () -> ()
    %cst_36 = arith.constant dense<0.000000e+00> : vector<2x8x64xf32>
    %95 = tpu.matmul %94, %82, %cst_36 {dimension_numbers = #tpu.dot_dimension_numbers<[2], [1], [1], [2], [0, 0, 0, 1, 1, 2], [0], [0]>} : vector<2x8x8xbf16>, vector<2x8x64xbf16>, vector<2x8x64xf32> -> vector<2x8x64xf32>
    "tpu.trace_stop"() : () -> ()
    %96 = vector.shape_cast %95 : vector<2x8x64xf32> to vector<16x64xf32>
    %97 = arith.truncf %96 : vector<16x64xf32> to vector<16x64xbf16>
    %c0_37 = arith.constant 0 : index
    %c128 = arith.constant 128 : index
    %98 = vector.load %arg16[%c0_37, %c128] : memref<16x512xbf16, #tpu.memory_space<vmem>>, vector<16x64xbf16>
    tpu.vector_store %arg16[%c0_37, %c128], %97 {strides = array<i32>} : memref<16x512xbf16, #tpu.memory_space<vmem>>, vector<16x64xbf16>,
    %99 = vector.extract_strided_slice %11 {offsets = [0, 192], sizes = [16, 64], strides = [1, 1]} : vector<16x512xf32> to vector<16x64xf32>
    %100 = arith.truncf %99 : vector<16x64xf32> to vector<16x64xbf16>
    %101 = vector.shape_cast %100 : vector<16x64xbf16> to vector<2x8x64xbf16>
    %102 = vector.extract_strided_slice %17 {offsets = [0, 192], sizes = [16, 64], strides = [1, 1]} : vector<16x512xf32> to vector<16x64xf32>
    %103 = arith.truncf %102 : vector<16x64xf32> to vector<16x64xbf16>
    %104 = vector.shape_cast %103 : vector<16x64xbf16> to vector<2x8x64xbf16>
    %105 = vector.extract_strided_slice %23 {offsets = [0, 192], sizes = [16, 64], strides = [1, 1]} : vector<16x512xf32> to vector<16x64xf32>
    %106 = arith.truncf %105 : vector<16x64xf32> to vector<16x64xbf16>
    %107 = vector.shape_cast %106 : vector<16x64xbf16> to vector<2x8x64xbf16>
    "tpu.trace_start"() <{level = 10 : i32, message = "bqd,bkd->bqk"}> : () -> ()
    %cst_38 = arith.constant dense<0.000000e+00> : vector<2x8x8xf32>
    %108 = tpu.matmul %101, %104, %cst_38 {dimension_numbers = #tpu.dot_dimension_numbers<[2], [2], [1], [1], [0, 0, 0, 1, 1, 1], [0], [0]>} : vector<2x8x64xbf16>, vector<2x8x64xbf16>, vector<2x8x8xf32> -> vector<2x8x8xf32>
    "tpu.trace_stop"() : () -> ()
    %cst_39 = arith.constant dense<0xFF800000> : vector<2x8xf32>
    %109 = vector.multi_reduction <maximumf>, %108, %cst_39 [2] : vector<2x8x8xf32> to vector<2x8xf32>
    %110 = vector.shape_cast %109 : vector<2x8xf32> to vector<2x8x1xf32>
    %111 = vector.broadcast %110 : vector<2x8x1xf32> to vector<2x8x8xf32>
    %112 = arith.subf %108, %111 : vector<2x8x8xf32>
    %113 = math.exp %112 : vector<2x8x8xf32>
    %cst_40 = arith.constant dense<0.000000e+00> : vector<2x8xf32>
    %114 = vector.multi_reduction <add>, %113, %cst_40 [2] : vector<2x8x8xf32> to vector<2x8xf32>
    %115 = vector.shape_cast %114 : vector<2x8xf32> to vector<2x8x1xf32>
    %116 = tpu.reciprocal %115 {approx = true} : vector<2x8x1xf32> -> vector<2x8x1xf32>
    %117 = vector.broadcast %116 : vector<2x8x1xf32> to vector<2x8x8xf32>
    %118 = arith.mulf %113, %117 : vector<2x8x8xf32>
    %119 = arith.truncf %118 : vector<2x8x8xf32> to vector<2x8x8xbf16>
    "tpu.trace_start"() <{level = 10 : i32, message = "bqk,bkd->bqd"}> : () -> ()
    %cst_41 = arith.constant dense<0.000000e+00> : vector<2x8x64xf32>
    %120 = tpu.matmul %119, %107, %cst_41 {dimension_numbers = #tpu.dot_dimension_numbers<[2], [1], [1], [2], [0, 0, 0, 1, 1, 2], [0], [0]>} : vector<2x8x8xbf16>, vector<2x8x64xbf16>, vector<2x8x64xf32> -> vector<2x8x64xf32>
    "tpu.trace_stop"() : () -> ()
    %121 = vector.shape_cast %120 : vector<2x8x64xf32> to vector<16x64xf32>
    %122 = arith.truncf %121 : vector<16x64xf32> to vector<16x64xbf16>
    %c0_42 = arith.constant 0 : index
    %c192 = arith.constant 192 : index
    %123 = vector.load %arg16[%c0_42, %c192] : memref<16x512xbf16, #tpu.memory_space<vmem>>, vector<16x64xbf16>
    tpu.vector_store %arg16[%c0_42, %c192], %122 {strides = array<i32>} : memref<16x512xbf16, #tpu.memory_space<vmem>>, vector<16x64xbf16>,
    %124 = vector.extract_strided_slice %11 {offsets = [0, 256], sizes = [16, 64], strides = [1, 1]} : vector<16x512xf32> to vector<16x64xf32>
    %125 = arith.truncf %124 : vector<16x64xf32> to vector<16x64xbf16>
    %126 = vector.shape_cast %125 : vector<16x64xbf16> to vector<2x8x64xbf16>
    %127 = vector.extract_strided_slice %17 {offsets = [0, 256], sizes = [16, 64], strides = [1, 1]} : vector<16x512xf32> to vector<16x64xf32>
    %128 = arith.truncf %127 : vector<16x64xf32> to vector<16x64xbf16>
    %129 = vector.shape_cast %128 : vector<16x64xbf16> to vector<2x8x64xbf16>
    %130 = vector.extract_strided_slice %23 {offsets = [0, 256], sizes = [16, 64], strides = [1, 1]} : vector<16x512xf32> to vector<16x64xf32>
    %131 = arith.truncf %130 : vector<16x64xf32> to vector<16x64xbf16>
    %132 = vector.shape_cast %131 : vector<16x64xbf16> to vector<2x8x64xbf16>
    "tpu.trace_start"() <{level = 10 : i32, message = "bqd,bkd->bqk"}> : () -> ()
    %cst_43 = arith.constant dense<0.000000e+00> : vector<2x8x8xf32>
    %133 = tpu.matmul %126, %129, %cst_43 {dimension_numbers = #tpu.dot_dimension_numbers<[2], [2], [1], [1], [0, 0, 0, 1, 1, 1], [0], [0]>} : vector<2x8x64xbf16>, vector<2x8x64xbf16>, vector<2x8x8xf32> -> vector<2x8x8xf32>
    "tpu.trace_stop"() : () -> ()
    %cst_44 = arith.constant dense<0xFF800000> : vector<2x8xf32>
    %134 = vector.multi_reduction <maximumf>, %133, %cst_44 [2] : vector<2x8x8xf32> to vector<2x8xf32>
    %135 = vector.shape_cast %134 : vector<2x8xf32> to vector<2x8x1xf32>
    %136 = vector.broadcast %135 : vector<2x8x1xf32> to vector<2x8x8xf32>
    %137 = arith.subf %133, %136 : vector<2x8x8xf32>
    %138 = math.exp %137 : vector<2x8x8xf32>
    %cst_45 = arith.constant dense<0.000000e+00> : vector<2x8xf32>
    %139 = vector.multi_reduction <add>, %138, %cst_45 [2] : vector<2x8x8xf32> to vector<2x8xf32>
    %140 = vector.shape_cast %139 : vector<2x8xf32> to vector<2x8x1xf32>
    %141 = tpu.reciprocal %140 {approx = true} : vector<2x8x1xf32> -> vector<2x8x1xf32>
    %142 = vector.broadcast %141 : vector<2x8x1xf32> to vector<2x8x8xf32>
    %143 = arith.mulf %138, %142 : vector<2x8x8xf32>
    %144 = arith.truncf %143 : vector<2x8x8xf32> to vector<2x8x8xbf16>
    "tpu.trace_start"() <{level = 10 : i32, message = "bqk,bkd->bqd"}> : () -> ()
    %cst_46 = arith.constant dense<0.000000e+00> : vector<2x8x64xf32>
    %145 = tpu.matmul %144, %132, %cst_46 {dimension_numbers = #tpu.dot_dimension_numbers<[2], [1], [1], [2], [0, 0, 0, 1, 1, 2], [0], [0]>} : vector<2x8x8xbf16>, vector<2x8x64xbf16>, vector<2x8x64xf32> -> vector<2x8x64xf32>
    "tpu.trace_stop"() : () -> ()
    %146 = vector.shape_cast %145 : vector<2x8x64xf32> to vector<16x64xf32>
    %147 = arith.truncf %146 : vector<16x64xf32> to vector<16x64xbf16>
    %c0_47 = arith.constant 0 : index
    %c256 = arith.constant 256 : index
    %148 = vector.load %arg16[%c0_47, %c256] : memref<16x512xbf16, #tpu.memory_space<vmem>>, vector<16x64xbf16>
    tpu.vector_store %arg16[%c0_47, %c256], %147 {strides = array<i32>} : memref<16x512xbf16, #tpu.memory_space<vmem>>, vector<16x64xbf16>,
    %149 = vector.extract_strided_slice %11 {offsets = [0, 320], sizes = [16, 64], strides = [1, 1]} : vector<16x512xf32> to vector<16x64xf32>
    %150 = arith.truncf %149 : vector<16x64xf32> to vector<16x64xbf16>
    %151 = vector.shape_cast %150 : vector<16x64xbf16> to vector<2x8x64xbf16>
    %152 = vector.extract_strided_slice %17 {offsets = [0, 320], sizes = [16, 64], strides = [1, 1]} : vector<16x512xf32> to vector<16x64xf32>
    %153 = arith.truncf %152 : vector<16x64xf32> to vector<16x64xbf16>
    %154 = vector.shape_cast %153 : vector<16x64xbf16> to vector<2x8x64xbf16>
    %155 = vector.extract_strided_slice %23 {offsets = [0, 320], sizes = [16, 64], strides = [1, 1]} : vector<16x512xf32> to vector<16x64xf32>
    %156 = arith.truncf %155 : vector<16x64xf32> to vector<16x64xbf16>
    %157 = vector.shape_cast %156 : vector<16x64xbf16> to vector<2x8x64xbf16>
    "tpu.trace_start"() <{level = 10 : i32, message = "bqd,bkd->bqk"}> : () -> ()
    %cst_48 = arith.constant dense<0.000000e+00> : vector<2x8x8xf32>
    %158 = tpu.matmul %151, %154, %cst_48 {dimension_numbers = #tpu.dot_dimension_numbers<[2], [2], [1], [1], [0, 0, 0, 1, 1, 1], [0], [0]>} : vector<2x8x64xbf16>, vector<2x8x64xbf16>, vector<2x8x8xf32> -> vector<2x8x8xf32>
    "tpu.trace_stop"() : () -> ()
    %cst_49 = arith.constant dense<0xFF800000> : vector<2x8xf32>
    %159 = vector.multi_reduction <maximumf>, %158, %cst_49 [2] : vector<2x8x8xf32> to vector<2x8xf32>
    %160 = vector.shape_cast %159 : vector<2x8xf32> to vector<2x8x1xf32>
    %161 = vector.broadcast %160 : vector<2x8x1xf32> to vector<2x8x8xf32>
    %162 = arith.subf %158, %161 : vector<2x8x8xf32>
    %163 = math.exp %162 : vector<2x8x8xf32>
    %cst_50 = arith.constant dense<0.000000e+00> : vector<2x8xf32>
    %164 = vector.multi_reduction <add>, %163, %cst_50 [2] : vector<2x8x8xf32> to vector<2x8xf32>
    %165 = vector.shape_cast %164 : vector<2x8xf32> to vector<2x8x1xf32>
    %166 = tpu.reciprocal %165 {approx = true} : vector<2x8x1xf32> -> vector<2x8x1xf32>
    %167 = vector.broadcast %166 : vector<2x8x1xf32> to vector<2x8x8xf32>
    %168 = arith.mulf %163, %167 : vector<2x8x8xf32>
    %169 = arith.truncf %168 : vector<2x8x8xf32> to vector<2x8x8xbf16>
    "tpu.trace_start"() <{level = 10 : i32, message = "bqk,bkd->bqd"}> : () -> ()
    %cst_51 = arith.constant dense<0.000000e+00> : vector<2x8x64xf32>
    %170 = tpu.matmul %169, %157, %cst_51 {dimension_numbers = #tpu.dot_dimension_numbers<[2], [1], [1], [2], [0, 0, 0, 1, 1, 2], [0], [0]>} : vector<2x8x8xbf16>, vector<2x8x64xbf16>, vector<2x8x64xf32> -> vector<2x8x64xf32>
    "tpu.trace_stop"() : () -> ()
    %171 = vector.shape_cast %170 : vector<2x8x64xf32> to vector<16x64xf32>
    %172 = arith.truncf %171 : vector<16x64xf32> to vector<16x64xbf16>
    %c0_52 = arith.constant 0 : index
    %c320 = arith.constant 320 : index
    %173 = vector.load %arg16[%c0_52, %c320] : memref<16x512xbf16, #tpu.memory_space<vmem>>, vector<16x64xbf16>
    tpu.vector_store %arg16[%c0_52, %c320], %172 {strides = array<i32>} : memref<16x512xbf16, #tpu.memory_space<vmem>>, vector<16x64xbf16>,
    %174 = vector.extract_strided_slice %11 {offsets = [0, 384], sizes = [16, 64], strides = [1, 1]} : vector<16x512xf32> to vector<16x64xf32>
    %175 = arith.truncf %174 : vector<16x64xf32> to vector<16x64xbf16>
    %176 = vector.shape_cast %175 : vector<16x64xbf16> to vector<2x8x64xbf16>
    %177 = vector.extract_strided_slice %17 {offsets = [0, 384], sizes = [16, 64], strides = [1, 1]} : vector<16x512xf32> to vector<16x64xf32>
    %178 = arith.truncf %177 : vector<16x64xf32> to vector<16x64xbf16>
    %179 = vector.shape_cast %178 : vector<16x64xbf16> to vector<2x8x64xbf16>
    %180 = vector.extract_strided_slice %23 {offsets = [0, 384], sizes = [16, 64], strides = [1, 1]} : vector<16x512xf32> to vector<16x64xf32>
    %181 = arith.truncf %180 : vector<16x64xf32> to vector<16x64xbf16>
    %182 = vector.shape_cast %181 : vector<16x64xbf16> to vector<2x8x64xbf16>
    "tpu.trace_start"() <{level = 10 : i32, message = "bqd,bkd->bqk"}> : () -> ()
    %cst_53 = arith.constant dense<0.000000e+00> : vector<2x8x8xf32>
    %183 = tpu.matmul %176, %179, %cst_53 {dimension_numbers = #tpu.dot_dimension_numbers<[2], [2], [1], [1], [0, 0, 0, 1, 1, 1], [0], [0]>} : vector<2x8x64xbf16>, vector<2x8x64xbf16>, vector<2x8x8xf32> -> vector<2x8x8xf32>
    "tpu.trace_stop"() : () -> ()
    %cst_54 = arith.constant dense<0xFF800000> : vector<2x8xf32>
    %184 = vector.multi_reduction <maximumf>, %183, %cst_54 [2] : vector<2x8x8xf32> to vector<2x8xf32>
    %185 = vector.shape_cast %184 : vector<2x8xf32> to vector<2x8x1xf32>
    %186 = vector.broadcast %185 : vector<2x8x1xf32> to vector<2x8x8xf32>
    %187 = arith.subf %183, %186 : vector<2x8x8xf32>
    %188 = math.exp %187 : vector<2x8x8xf32>
    %cst_55 = arith.constant dense<0.000000e+00> : vector<2x8xf32>
    %189 = vector.multi_reduction <add>, %188, %cst_55 [2] : vector<2x8x8xf32> to vector<2x8xf32>
    %190 = vector.shape_cast %189 : vector<2x8xf32> to vector<2x8x1xf32>
    %191 = tpu.reciprocal %190 {approx = true} : vector<2x8x1xf32> -> vector<2x8x1xf32>
    %192 = vector.broadcast %191 : vector<2x8x1xf32> to vector<2x8x8xf32>
    %193 = arith.mulf %188, %192 : vector<2x8x8xf32>
    %194 = arith.truncf %193 : vector<2x8x8xf32> to vector<2x8x8xbf16>
    "tpu.trace_start"() <{level = 10 : i32, message = "bqk,bkd->bqd"}> : () -> ()
    %cst_56 = arith.constant dense<0.000000e+00> : vector<2x8x64xf32>
    %195 = tpu.matmul %194, %182, %cst_56 {dimension_numbers = #tpu.dot_dimension_numbers<[2], [1], [1], [2], [0, 0, 0, 1, 1, 2], [0], [0]>} : vector<2x8x8xbf16>, vector<2x8x64xbf16>, vector<2x8x64xf32> -> vector<2x8x64xf32>
    "tpu.trace_stop"() : () -> ()
    %196 = vector.shape_cast %195 : vector<2x8x64xf32> to vector<16x64xf32>
    %197 = arith.truncf %196 : vector<16x64xf32> to vector<16x64xbf16>
    %c0_57 = arith.constant 0 : index
    %c384 = arith.constant 384 : index
    %198 = vector.load %arg16[%c0_57, %c384] : memref<16x512xbf16, #tpu.memory_space<vmem>>, vector<16x64xbf16>
    tpu.vector_store %arg16[%c0_57, %c384], %197 {strides = array<i32>} : memref<16x512xbf16, #tpu.memory_space<vmem>>, vector<16x64xbf16>,
    %199 = vector.extract_strided_slice %11 {offsets = [0, 448], sizes = [16, 64], strides = [1, 1]} : vector<16x512xf32> to vector<16x64xf32>
    %200 = arith.truncf %199 : vector<16x64xf32> to vector<16x64xbf16>
    %201 = vector.shape_cast %200 : vector<16x64xbf16> to vector<2x8x64xbf16>
    %202 = vector.extract_strided_slice %17 {offsets = [0, 448], sizes = [16, 64], strides = [1, 1]} : vector<16x512xf32> to vector<16x64xf32>
    %203 = arith.truncf %202 : vector<16x64xf32> to vector<16x64xbf16>
    %204 = vector.shape_cast %203 : vector<16x64xbf16> to vector<2x8x64xbf16>
    %205 = vector.extract_strided_slice %23 {offsets = [0, 448], sizes = [16, 64], strides = [1, 1]} : vector<16x512xf32> to vector<16x64xf32>
    %206 = arith.truncf %205 : vector<16x64xf32> to vector<16x64xbf16>
    %207 = vector.shape_cast %206 : vector<16x64xbf16> to vector<2x8x64xbf16>
    "tpu.trace_start"() <{level = 10 : i32, message = "bqd,bkd->bqk"}> : () -> ()
    %cst_58 = arith.constant dense<0.000000e+00> : vector<2x8x8xf32>
    %208 = tpu.matmul %201, %204, %cst_58 {dimension_numbers = #tpu.dot_dimension_numbers<[2], [2], [1], [1], [0, 0, 0, 1, 1, 1], [0], [0]>} : vector<2x8x64xbf16>, vector<2x8x64xbf16>, vector<2x8x8xf32> -> vector<2x8x8xf32>
    "tpu.trace_stop"() : () -> ()
    %cst_59 = arith.constant dense<0xFF800000> : vector<2x8xf32>
    %209 = vector.multi_reduction <maximumf>, %208, %cst_59 [2] : vector<2x8x8xf32> to vector<2x8xf32>
    %210 = vector.shape_cast %209 : vector<2x8xf32> to vector<2x8x1xf32>
    %211 = vector.broadcast %210 : vector<2x8x1xf32> to vector<2x8x8xf32>
    %212 = arith.subf %208, %211 : vector<2x8x8xf32>
    %213 = math.exp %212 : vector<2x8x8xf32>
    %cst_60 = arith.constant dense<0.000000e+00> : vector<2x8xf32>
    %214 = vector.multi_reduction <add>, %213, %cst_60 [2] : vector<2x8x8xf32> to vector<2x8xf32>
    %215 = vector.shape_cast %214 : vector<2x8xf32> to vector<2x8x1xf32>
    %216 = tpu.reciprocal %215 {approx = true} : vector<2x8x1xf32> -> vector<2x8x1xf32>
    %217 = vector.broadcast %216 : vector<2x8x1xf32> to vector<2x8x8xf32>
    %218 = arith.mulf %213, %217 : vector<2x8x8xf32>
    %219 = arith.truncf %218 : vector<2x8x8xf32> to vector<2x8x8xbf16>
    "tpu.trace_start"() <{level = 10 : i32, message = "bqk,bkd->bqd"}> : () -> ()
    %cst_61 = arith.constant dense<0.000000e+00> : vector<2x8x64xf32>
    %220 = tpu.matmul %219, %207, %cst_61 {dimension_numbers = #tpu.dot_dimension_numbers<[2], [1], [1], [2], [0, 0, 0, 1, 1, 2], [0], [0]>} : vector<2x8x8xbf16>, vector<2x8x64xbf16>, vector<2x8x64xf32> -> vector<2x8x64xf32>
    "tpu.trace_stop"() : () -> ()
    %221 = vector.shape_cast %220 : vector<2x8x64xf32> to vector<16x64xf32>
    %222 = arith.truncf %221 : vector<16x64xf32> to vector<16x64xbf16>
    %c0_62 = arith.constant 0 : index
    %c448 = arith.constant 448 : index
    %223 = vector.load %arg16[%c0_62, %c448] : memref<16x512xbf16, #tpu.memory_space<vmem>>, vector<16x64xbf16>
    tpu.vector_store %arg16[%c0_62, %c448], %222 {strides = array<i32>} : memref<16x512xbf16, #tpu.memory_space<vmem>>, vector<16x64xbf16>,
    %224 = tpu.concatenate %43, %68, %93, %118, %143, %168, %193, %218 in 2 : vector<2x8x8xf32>, vector<2x8x8xf32>, vector<2x8x8xf32>, vector<2x8x8xf32>, vector<2x8x8xf32>, vector<2x8x8xf32>, vector<2x8x8xf32>, vector<2x8x8xf32> -> vector<2x8x64xf32>
    %c0_63 = arith.constant 0 : index
    %c0_64 = arith.constant 0 : index
    %c0_65 = arith.constant 0 : index
    %225 = vector.load %arg15[%c0_63, %c0_64, %c0_65] : memref<2x8x64xf32, #tpu.memory_space<vmem>>, vector<2x8x64xf32>
    tpu.vector_store %arg15[%c0_63, %c0_64, %c0_65], %224 {strides = array<i32>} : memref<2x8x64xf32, #tpu.memory_space<vmem>>, vector<2x8x64xf32>,
    %c0_66 = arith.constant 0 : index
    %c0_67 = arith.constant 0 : index
    %226 = vector.load %arg16[%c0_66, %c0_67] : memref<16x512xbf16, #tpu.memory_space<vmem>>, vector<16x512xbf16>
    %c0_68 = arith.constant 0 : index
    %c0_69 = arith.constant 0 : index
    %227 = vector.load %arg10[%c0_68, %c0_69] : memref<512x512xbf16, #tpu.memory_space<vmem>>, vector<512x512xbf16>
    %cst_70 = arith.constant dense<0.000000e+00> : vector<16x512xf32>
    %228 = tpu.matmul %226, %227, %cst_70 {dimension_numbers = #tpu.dot_dimension_numbers<[1], [0], [0], [1], [0, 0, 1, 1], [], []>} : vector<16x512xbf16>, vector<512x512xbf16>, vector<16x512xf32> -> vector<16x512xf32>
    %c0_71 = arith.constant 0 : index
    %c0_72 = arith.constant 0 : index
    %229 = vector.load %arg11[%c0_71, %c0_72] : memref<1x512xf32, #tpu.memory_space<vmem>>, vector<1x512xf32>
    %230 = vector.broadcast %229 : vector<1x512xf32> to vector<16x512xf32>
    %231 = arith.addf %228, %230 : vector<16x512xf32>
    %232 = arith.addf %231, %1 : vector<16x512xf32>
    %c0_73 = arith.constant 0 : index
    %c0_74 = arith.constant 0 : index
    %233 = vector.load %arg12[%c0_73, %c0_74] : memref<1x512xf32, #tpu.memory_space<vmem>>, vector<1x512xf32>
    %c0_75 = arith.constant 0 : index
    %c0_76 = arith.constant 0 : index
    %234 = vector.load %arg13[%c0_75, %c0_76] : memref<1x512xf32, #tpu.memory_space<vmem>>, vector<1x512xf32>
    %cst_77 = arith.constant dense<0.000000e+00> : vector<16xf32>
    %235 = vector.multi_reduction <add>, %232, %cst_77 [1] : vector<16x512xf32> to vector<16xf32>
    %236 = vector.shape_cast %235 : vector<16xf32> to vector<16x1xf32>
    %cst_78 = arith.constant 5.120000e+02 : f32
    %237 = vector.broadcast %cst_78 : f32 to vector<16x1xf32>
    %238 = arith.divf %236, %237 : vector<16x1xf32>
    %239 = vector.broadcast %238 : vector<16x1xf32> to vector<16x512xf32>
    %240 = arith.subf %232, %239 : vector<16x512xf32>
    %241 = arith.mulf %240, %240 : vector<16x512xf32>
    %cst_79 = arith.constant dense<0.000000e+00> : vector<16xf32>
    %242 = vector.multi_reduction <add>, %241, %cst_79 [1] : vector<16x512xf32> to vector<16xf32>
    %243 = vector.shape_cast %242 : vector<16xf32> to vector<16x1xf32>
    %cst_80 = arith.constant 5.120000e+02 : f32
    %244 = vector.broadcast %cst_80 : f32 to vector<16x1xf32>
    %245 = arith.divf %243, %244 : vector<16x1xf32>
    %246 = vector.broadcast %238 : vector<16x1xf32> to vector<16x512xf32>
    %247 = arith.subf %232, %246 : vector<16x512xf32>
    %cst_81 = arith.constant 9.99999974E-6 : f32
    %248 = vector.broadcast %cst_81 : f32 to vector<16x1xf32>
    %249 = arith.addf %245, %248 : vector<16x1xf32>
    %250 = math.rsqrt %249 : vector<16x1xf32>
    %251 = vector.broadcast %250 : vector<16x1xf32> to vector<16x512xf32>
    %252 = arith.mulf %247, %251 : vector<16x512xf32>
    %253 = vector.broadcast %233 : vector<1x512xf32> to vector<16x512xf32>
    %254 = arith.mulf %252, %253 : vector<16x512xf32>
    %255 = vector.broadcast %234 : vector<1x512xf32> to vector<16x512xf32>
    %256 = arith.addf %254, %255 : vector<16x512xf32>
    %257 = vector.shape_cast %256 : vector<16x512xf32> to vector<2x8x512xf32>
    %c0_82 = arith.constant 0 : index
    %c0_83 = arith.constant 0 : index
    %c0_84 = arith.constant 0 : index
    %258 = vector.load %arg14[%c0_82, %c0_83, %c0_84] : memref<2x8x512xf32, #tpu.memory_space<vmem>>, vector<2x8x512xf32>
    tpu.vector_store %arg14[%c0_82, %c0_83, %c0_84], %257 {strides = array<i32>} : memref<2x8x512xf32, #tpu.memory_space<vmem>>, vector<2x8x512xf32>,
    return
  }
  func.func @transform_0(%arg0: i32) -> (i32, i32, i32) {
    %c0_i32 = arith.constant 0 : i32
    %c0_i32_0 = arith.constant 0 : i32
    %c0_i32_1 = arith.constant 0 : i32
    return %arg0, %c0_i32, %c0_i32_0 : i32, i32, i32
  }
  func.func @transform_1(%arg0: i32) -> (i32, i32, i32) {
    %c0_i32 = arith.constant 0 : i32
    %c0_i32_0 = arith.constant 0 : i32
    %c0_i32_1 = arith.constant 0 : i32
    return %arg0, %c0_i32, %c0_i32_0 : i32, i32, i32
  }
  func.func @transform_2(%arg0: i32) -> (i32, i32, i32) {
    %c0_i32 = arith.constant 0 : i32
    %c0_i32_0 = arith.constant 0 : i32
    %c0_i32_1 = arith.constant 0 : i32
    return %arg0, %c0_i32, %c0_i32_0 : i32, i32, i32
  }
  func.func @transform_3(%arg0: i32) -> (i32, i32) {
    %c0_i32 = arith.constant 0 : i32
    %c0_i32_0 = arith.constant 0 : i32
    %c0_i32_1 = arith.constant 0 : i32
    return %c0_i32, %c0_i32_0 : i32, i32
  }
  func.func @transform_4(%arg0: i32) -> (i32, i32) {
    %c0_i32 = arith.constant 0 : i32
    %c0_i32_0 = arith.constant 0 : i32
    %c0_i32_1 = arith.constant 0 : i32
    return %c0_i32, %c0_i32_0 : i32, i32
  }
  func.func @transform_5(%arg0: i32) -> (i32, i32) {
    %c0_i32 = arith.constant 0 : i32
    %c0_i32_0 = arith.constant 0 : i32
    %c0_i32_1 = arith.constant 0 : i32
    return %c0_i32, %c0_i32_0 : i32, i32
  }
  func.func @transform_6(%arg0: i32) -> (i32, i32) {
    %c0_i32 = arith.constant 0 : i32
    %c0_i32_0 = arith.constant 0 : i32
    %c0_i32_1 = arith.constant 0 : i32
    return %c0_i32, %c0_i32_0 : i32, i32
  }
  func.func @transform_7(%arg0: i32) -> (i32, i32) {
    %c0_i32 = arith.constant 0 : i32
    %c0_i32_0 = arith.constant 0 : i32
    %c0_i32_1 = arith.constant 0 : i32
    return %c0_i32, %c0_i32_0 : i32, i32
  }
  func.func @transform_8(%arg0: i32) -> (i32, i32) {
    %c0_i32 = arith.constant 0 : i32
    %c0_i32_0 = arith.constant 0 : i32
    %c0_i32_1 = arith.constant 0 : i32
    return %c0_i32, %c0_i32_0 : i32, i32
  }
  func.func @transform_9(%arg0: i32) -> (i32, i32) {
    %c0_i32 = arith.constant 0 : i32
    %c0_i32_0 = arith.constant 0 : i32
    %c0_i32_1 = arith.constant 0 : i32
    return %c0_i32, %c0_i32_0 : i32, i32
  }
  func.func @transform_10(%arg0: i32) -> (i32, i32) {
    %c0_i32 = arith.constant 0 : i32
    %c0_i32_0 = arith.constant 0 : i32
    %c0_i32_1 = arith.constant 0 : i32
    return %c0_i32, %c0_i32_0 : i32, i32
  }
  func.func @transform_11(%arg0: i32) -> (i32, i32) {
    %c0_i32 = arith.constant 0 : i32
    %c0_i32_0 = arith.constant 0 : i32
    %c0_i32_1 = arith.constant 0 : i32
    return %c0_i32, %c0_i32_0 : i32, i32
  }
  func.func @transform_12(%arg0: i32) -> (i32, i32) {
    %c0_i32 = arith.constant 0 : i32
    %c0_i32_0 = arith.constant 0 : i32
    %c0_i32_1 = arith.constant 0 : i32
    return %c0_i32, %c0_i32_0 : i32, i32
  }
  func.func @transform_13(%arg0: i32) -> (i32, i32, i32) {
    %c0_i32 = arith.constant 0 : i32
    %c0_i32_0 = arith.constant 0 : i32
    %c0_i32_1 = arith.constant 0 : i32
    return %arg0, %c0_i32, %c0_i32_0 : i32, i32, i32
  }
  func.func @transform_14(%arg0: i32) -> (i32, i32, i32) {
    %c0_i32 = arith.constant 0 : i32
    %c0_i32_0 = arith.constant 0 : i32
    %c0_i32_1 = arith.constant 0 : i32
    return %arg0, %c0_i32, %c0_i32_0 : i32, i32, i32
  }
}

</mosaic_0001>

<bundles_post_ra>
// kernel: tpu_custom_call.1
= control target key start
LH: loop header
LB: loop body
LE: loop exit
PB: predicated region body
PF: predicated region fallthrough
CT: control target
= control target key end

     0   :  { %20 = vsyncpa [#allocation4], 0  ;;  %s8931_s0 = inlined_call_operand.hbm [shape: f32[2,8,512], index: 0, kind: input, shape index: {}]   ;;  %s8932_s1 = inlined_call_operand.hbm [shape: f32[2,8,512], index: 1, kind: input, shape index: {}]   ;;  %s8933_s2 = inlined_call_operand.hbm [shape: f32[2,8,512], index: 2, kind: input, shape index: {}]   ;;  %s8934_s3 = inlined_call_operand.hbm [shape: bf16[512,512], index: 3, kind: input, shape index: {}]   ;;  %s8935_s4 = inlined_call_operand.vmem [shape: f32[1,512], index: 4, kind: input, shape index: {}]   ;;  %s8936_s5 = inlined_call_operand.hbm [shape: bf16[512,512], index: 5, kind: input, shape index: {}]   ;;  %s8937_s6 = inlined_call_operand.vmem [shape: f32[1,512], index: 6, kind: input, shape index: {}]   ;;  %s8938_s7 = inlined_call_operand.hbm [shape: bf16[512,512], index: 7, kind: input, shape index: {}]   ;;  %s8939_s8 = inlined_call_operand.vmem [shape: f32[1,512], index: 8, kind: input, shape index: {}]   ;;  %s8940_s9 = inlined_call_operand.hbm [shape: bf16[512,512], index: 9, kind: input, shape index: {}]   ;;  %s8941_s10 = inlined_call_operand.vmem [shape: f32[1,512], index: 10, kind: input, shape index: {}]   ;;  %s8942_s11 = inlined_call_operand.vmem [shape: f32[1,512], index: 11, kind: input, shape index: {}]   ;;  %s8943_s12 = inlined_call_operand.vmem [shape: f32[1,512], index: 12, kind: input, shape index: {}]   ;;  %s8944_s13 = inlined_call_operand.hbm [shape: f32[2,8,512], index: 13, kind: output, shape index: {0}]   ;;  %s8945_s14 = inlined_call_operand.hbm [shape: f32[2,8,64], index: 14, kind: output, shape index: {1}]  }
   0x1   :  { %21 = vsyncpa [#allocation7], 0 }
   0x2   :  { %22 = vsyncpa [#allocation10], 0 }
   0x3   :  { %23 = vsyncpa [#allocation13], 0 }
   0x4   :  { %24 = vsyncpa [#allocation5], 0 }
   0x5   :  { %25 = vsyncpa [#allocation17], 0  ;;  %s8083_s29 = smov [#allocation6]   ;;  %s8084_s15 = smov [#allocation9]  }
   0x6   :  { %s43_s30 = sshll.u32 %s8083_s29, 4  ;;  %s67_s16 = sshll.u32 %s8084_s15, 4  ;;  %s44_s30 = int_to_ptr.vmem [resolvable:$true] %s43_s30  ;;  %s8180_s16 = int_to_ptr.vmem [resolvable:$true] %s67_s16 }
   0x7   :  { %s7873_s19 = scalar_lea.hbm %s8932_s1, 1024 }
   0x8   :  { %p7874_p0 = scmp.ne.s32.totalorder %s8932_s1, %s7873_s19  ;;  %p7877_p1 = scmp.lt.u32.totalorder %s7873_s19, %s8932_s1 }
   0xa   :  { %p7879_p2 = pnand %p7877_p1, %p7874_p0 }
   0xc   :  { %7882 = shalt.err (!%p7879_p2)
}
   0xd   :  { %s7883_s24 = scalar_lea.vmem %s44_s30, 1024  ;;  %p7888_p4 = scmp.lt.s32.totalorder %s44_s30, %s44_s30 }
   0xe   :  { %p7884_p3 = scmp.ne.s32.totalorder %s44_s30, %s7883_s24  ;;  %p7889_p5 = scmp.lt.s32.totalorder %s7883_s24, %s7883_s24 }
  0x10   :  { %p7890_p6 = por %p7889_p5, %p7888_p4 }
  0x12   :  { %p7891_p7 = pnand %p7890_p6, %p7884_p3 }
  0x14   :  { %7894 = shalt.err (!%p7891_p7)
}
  0x15   :  { %s8946_s25 = smov 512   ;;  %s8086_s26 = smov 32  }
  0x16   :  { %49 = dma.hbm_to_vmem [thread:$0]  %s8932_s1, 1024, %s44_s30, [#allocation7], %s8946_s25, %s8946_s25, %s8086_s26  }
  0x17   :  { %s7895_s17 = scalar_lea.hbm %s8934_s3, 16384 }
  0x18   :  { %p7896_p8 = scmp.ne.s32.totalorder %s8934_s3, %s7895_s17  ;;  %p7899_p9 = scmp.lt.u32.totalorder %s7895_s17, %s8934_s3 }
  0x1a   :  { %p7901_p10 = pnand %p7899_p9, %p7896_p8 }
  0x1c   :  { %7904 = shalt.err (!%p7901_p10)
}
  0x1d   :  { %s7905_s22 = scalar_lea.vmem %s8180_s16, 16384  ;;  %p7910_p12 = scmp.lt.s32.totalorder %s8180_s16, %s8180_s16 }
  0x1e   :  { %p7906_p11 = scmp.ne.s32.totalorder %s8180_s16, %s7905_s22  ;;  %p7911_p13 = scmp.lt.s32.totalorder %s7905_s22, %s7905_s22 }
  0x20   :  { %p7912_p0 = por %p7911_p13, %p7910_p12 }
  0x22   :  { %p7913_p1 = pnand %p7912_p0, %p7906_p11 }
  0x24   :  { %7916 = shalt.err (!%p7913_p1)
}
  0x25   :  { %s8087_s1 = smov 256   ;;  %s8088_s30 = smov 16  }
  0x26   :  { %73 = dma.hbm_to_vmem [thread:$0]  %s8934_s3, 16384, %s8180_s16, [#allocation10], %s8087_s1, %s8087_s1, %s8088_s30  }
  0x27   :  { %s8089_s27 = smov [#allocation12]   ;;  %s8090_s29 = smov [#allocation3]  }
  0x28   :  { %s95_s28 = sshll.u32 %s8089_s27, 4  ;;  %s31_s15 = sshll.u32 %s8090_s29, 4  ;;  %s96_s28 = int_to_ptr.vmem [resolvable:$true] %s95_s28  ;;  %s8217_s15 = int_to_ptr.vmem [resolvable:$true] %s31_s15 }
  0x29   :  { %s7917_s19 = scalar_lea.hbm %s8938_s7, 16384 }
  0x2a   :  { %p7918_p2 = scmp.ne.s32.totalorder %s8938_s7, %s7917_s19  ;;  %p7921_p3 = scmp.lt.u32.totalorder %s7917_s19, %s8938_s7 }
  0x2c   :  { %p7923_p4 = pnand %p7921_p3, %p7918_p2 }
  0x2e   :  { %7926 = shalt.err (!%p7923_p4)
}
  0x2f   :  { %s7927_s3 = scalar_lea.vmem %s96_s28, 16384  ;;  %p7932_p6 = scmp.lt.s32.totalorder %s96_s28, %s96_s28 }
  0x30   :  { %p7928_p5 = scmp.ne.s32.totalorder %s96_s28, %s7927_s3  ;;  %p7933_p7 = scmp.lt.s32.totalorder %s7927_s3, %s7927_s3 }
  0x32   :  { %p7934_p8 = por %p7933_p7, %p7932_p6 }
  0x34   :  { %p7935_p9 = pnand %p7934_p8, %p7928_p5 }
  0x36   :  { %7938 = shalt.err (!%p7935_p9)
}
  0x37   :  { %101 = dma.hbm_to_vmem [thread:$0]  %s8938_s7, 16384, %s96_s28, [#allocation13], %s8087_s1, %s8087_s1, %s8088_s30  }
  0x38   :  { %s7939_s25 = scalar_lea.hbm %s8931_s0, 1024 }
  0x39   :  { %p7940_p10 = scmp.ne.s32.totalorder %s8931_s0, %s7939_s25  ;;  %p7943_p11 = scmp.lt.u32.totalorder %s7939_s25, %s8931_s0 }
  0x3b   :  { %p7945_p12 = pnand %p7943_p11, %p7940_p10 }
  0x3d   :  { %7948 = shalt.err (!%p7945_p12)
}
  0x3e   :  { %s7949_s20 = scalar_lea.vmem %s8217_s15, 1024  ;;  %p7954_p0 = scmp.lt.s32.totalorder %s8217_s15, %s8217_s15 }
  0x3f   :  { %p7950_p13 = scmp.ne.s32.totalorder %s8217_s15, %s7949_s20  ;;  %p7955_p1 = scmp.lt.s32.totalorder %s7949_s20, %s7949_s20 }
  0x41   :  { %p7956_p2 = por %p7955_p1, %p7954_p0 }
  0x43   :  { %p7957_p3 = pnand %p7956_p2, %p7950_p13 }
  0x45   :  { %7960 = shalt.err (!%p7957_p3)
}
  0x46   :  { %s8948_s7 = smov 512   ;;  %s8091_s22 = smov [#allocation8]  }
  0x47   :  { %37 = dma.hbm_to_vmem [thread:$0]  %s8931_s0, 1024, %s8217_s15, [#allocation4], %s8948_s7, %s8948_s7, %s8086_s26  }
  0x48   :  { %s55_s3 = sshll.u32 %s8091_s22, 4  ;;  %s8092_s16 = smov [#allocation11]   ;;  %s56_s3 = int_to_ptr.vmem [resolvable:$true] %s55_s3 }
  0x49   :  { %s81_s23 = sshll.u32 %s8092_s16, 4  ;;  %s7961_s25 = scalar_lea.hbm %s8933_s2, 1024  ;;  %s8254_s23 = int_to_ptr.vmem [resolvable:$true] %s81_s23 }
  0x4a   :  { %p7962_p4 = scmp.ne.s32.totalorder %s8933_s2, %s7961_s25  ;;  %p7965_p5 = scmp.lt.u32.totalorder %s7961_s25, %s8933_s2 }
  0x4c   :  { %p7967_p6 = pnand %p7965_p5, %p7962_p4 }
  0x4e   :  { %7970 = shalt.err (!%p7967_p6)
}
  0x4f   :  { %s7971_s0 = scalar_lea.vmem %s56_s3, 1024  ;;  %p7976_p8 = scmp.lt.s32.totalorder %s56_s3, %s56_s3 }
  0x50   :  { %p7972_p7 = scmp.ne.s32.totalorder %s56_s3, %s7971_s0  ;;  %p7977_p9 = scmp.lt.s32.totalorder %s7971_s0, %s7971_s0 }
  0x52   :  { %p7978_p10 = por %p7977_p9, %p7976_p8 }
  0x54   :  { %p7979_p11 = pnand %p7978_p10, %p7972_p7 }
  0x56   :  { %7982 = shalt.err (!%p7979_p11)
}
  0x57   :  { %61 = dma.hbm_to_vmem [thread:$0]  %s8933_s2, 1024, %s56_s3, [#allocation7], %s8948_s7, %s8948_s7, %s8086_s26  }
  0x58   :  { %s7983_s22 = scalar_lea.hbm %s8936_s5, 16384 }
  0x59   :  { %p7984_p12 = scmp.ne.s32.totalorder %s8936_s5, %s7983_s22  ;;  %p7987_p13 = scmp.lt.u32.totalorder %s7983_s22, %s8936_s5 }
  0x5b   :  { %p7989_p0 = pnand %p7987_p13, %p7984_p12 }
  0x5d   :  { %7992 = shalt.err (!%p7989_p0)
}
  0x5e   :  { %s7993_s29 = scalar_lea.vmem %s8254_s23, 16384  ;;  %p7998_p2 = scmp.lt.s32.totalorder %s8254_s23, %s8254_s23 }
  0x5f   :  { %p7994_p1 = scmp.ne.s32.totalorder %s8254_s23, %s7993_s29  ;;  %p7999_p3 = scmp.lt.s32.totalorder %s7993_s29, %s7993_s29 }
  0x61   :  { %p8000_p4 = por %p7999_p3, %p7998_p2 }
  0x63   :  { %p8001_p5 = pnand %p8000_p4, %p7994_p1 }
  0x65   :  { %8004 = shalt.err (!%p8001_p5)
}
  0x66   :  { %87 = dma.hbm_to_vmem [thread:$0]  %s8936_s5, 16384, %s8254_s23, [#allocation10], %s8087_s1, %s8087_s1, %s8088_s30  }
  0x67   :  { %s8093_s17 = smov [#allocation14]   ;;  %s8005_s15 = scalar_lea.hbm %s8940_s9, 16384 }
  0x68   :  { %s109_s18 = sshll.u32 %s8093_s17, 4  ;;  %p8006_p6 = scmp.ne.s32.totalorder %s8940_s9, %s8005_s15  ;;  %s110_s18 = int_to_ptr.vmem [resolvable:$true] %s109_s18 }
  0x69   :  { %p8009_p7 = scmp.lt.u32.totalorder %s8005_s15, %s8940_s9 }
  0x6b   :  { %p8011_p8 = pnand %p8009_p7, %p8006_p6 }
  0x6d   :  { %8014 = shalt.err (!%p8011_p8)
}
  0x6e   :  { %s8015_s16 = scalar_lea.vmem %s110_s18, 16384  ;;  %p8020_p10 = scmp.lt.s32.totalorder %s110_s18, %s110_s18 }
  0x6f   :  { %p8016_p9 = scmp.ne.s32.totalorder %s110_s18, %s8015_s16  ;;  %p8021_p11 = scmp.lt.s32.totalorder %s8015_s16, %s8015_s16 }
  0x71   :  { %p8022_p12 = por %p8021_p11, %p8020_p10 }
  0x73   :  { %p8023_p13 = pnand %p8022_p12, %p8016_p9 }
  0x75   :  { %8026 = shalt.err (!%p8023_p13)
}
  0x76   :  { %115 = dma.hbm_to_vmem [thread:$0]  %s8940_s9, 16384, %s110_s18, [#allocation13], %s8087_s1, %s8087_s1, %s8088_s30  }
  0x77   :  { %8071 = dma.done.wait [#allocation4], 1024  }
  0x78   :  { %8072 = vsyncadd [#allocation4], 4294966272 }
  0x79   :  { %8073 = dma.done.wait [#allocation7], 2048  }
  0x7a   :  { %8074 = vsyncadd [#allocation7], 4294965248 }
  0x7b   :  { %8075 = dma.done.wait [#allocation10], 32768  }
  0x7c   :  { %8076 = vsyncadd [#allocation10], 4294934528 }
  0x7d   :  { %8077 = dma.done.wait [#allocation13], 32768  }
  0x7e   :  { %8078 = vsyncadd [#allocation13], 4294934528  ;;  %v7029_v0 = vld [vmem:[#allocation9 + $0x4] ss:$16 sps:$4 sm:$0xff]   ;;  %v7031_v1 = vld [vmem:[#allocation9] ss:$16 sps:$4 sm:$0xff]  }
  0x7f   :  { %962 = vmatprep.subr.bf16.mxu0 %v7029_v0  ;;  %v7032_v2 = vld [vmem:[#allocation9 + $0x24] ss:$16 sps:$4 sm:$0xff]   ;;  %v7034_v3 = vld [vmem:[#allocation9 + $0x20] ss:$16 sps:$4 sm:$0xff]   ;;  %v7047_v7 = vld [vmem:[#allocation9 + $0xc] ss:$16 sps:$4 sm:$0xff]  }
  0x80   :  { %963 = vmatpush1.bf16.msra.mxu0 %v7031_v1  ;;  %v7035_v4 = vld [vmem:[#allocation9 + $0x44] ss:$16 sps:$4 sm:$0xff]   ;;  %v7037_v5 = vld [vmem:[#allocation9 + $0x40] ss:$16 sps:$4 sm:$0xff]   ;;  %v7049_v8 = vld [vmem:[#allocation9 + $0x8] ss:$16 sps:$4 sm:$0xff]   ;;  %1048 = vmatprep.subr.bf16.mxu1 %v7047_v7 }
  0x81   :  { %964 = vmatprep.subr.bf16.mxu0 %v7032_v2  ;;  %v7038_v6 = vld [vmem:[#allocation9 + $0x64] ss:$16 sps:$4 sm:$0xff]   ;;  %v7040_v9 = vld [vmem:[#allocation9 + $0x60] ss:$16 sps:$4 sm:$0xff]   ;;  %1049 = vmatpush1.bf16.msra.mxu1 %v7049_v8  ;;  %v7053_v10 = vld [vmem:[#allocation9 + $0x2c] ss:$16 sps:$4 sm:$0xff]  }
  0x82   :  { %v7055_v11 = vld [vmem:[#allocation9 + $0x28] ss:$16 sps:$4 sm:$0xff]   ;;  %v7041_v12 = vld [vmem:[#allocation9 + $0x84] ss:$16 sps:$4 sm:$0xff]   ;;  %1050 = vmatprep.subr.bf16.mxu1 %v7053_v10  ;;  %v7043_v13 = vld [vmem:[#allocation9 + $0x80] ss:$16 sps:$4 sm:$0xff]  }
  0x83   :  { %v7059_v14 = vld [vmem:[#allocation9 + $0x4c] ss:$16 sps:$4 sm:$0xff]   ;;  %v7044_v15 = vld [vmem:[#allocation9 + $0xa4] ss:$16 sps:$4 sm:$0xff]   ;;  %v7061_v16 = vld [vmem:[#allocation9 + $0x48] ss:$16 sps:$4 sm:$0xff]  }
  0x84   :  { %965 = vmatpush1.bf16.msra.mxu0 %v7034_v3  ;;  %v7065_v17 = vld [vmem:[#allocation9 + $0x6c] ss:$16 sps:$4 sm:$0xff]   ;;  %v7046_v18 = vld [vmem:[#allocation9 + $0xa0] ss:$16 sps:$4 sm:$0xff]   ;;  %v7050_v19 = vld [vmem:[#allocation9 + $0xc4] ss:$16 sps:$4 sm:$0xff]  }
  0x85   :  { %966 = vmatprep.subr.bf16.mxu0 %v7035_v4  ;;  %1051 = vmatpush1.bf16.msra.mxu1 %v7055_v11  ;;  %v7067_v20 = vld [vmem:[#allocation9 + $0x68] ss:$16 sps:$4 sm:$0xff]   ;;  %v7071_v21 = vld [vmem:[#allocation9 + $0x8c] ss:$16 sps:$4 sm:$0xff]   ;;  %v7052_v22 = vld [vmem:[#allocation9 + $0xc0] ss:$16 sps:$4 sm:$0xff]  }
  0x86   :  { %1052 = vmatprep.subr.bf16.mxu1 %v7059_v14  ;;  %v7056_v23 = vld [vmem:[#allocation9 + $0xe4] ss:$16 sps:$4 sm:$0xff]   ;;  %v7073_v24 = vld [vmem:[#allocation9 + $0x88] ss:$16 sps:$4 sm:$0xff]   ;;  %v7077_v25 = vld [vmem:[#allocation9 + $0xac] ss:$16 sps:$4 sm:$0xff]  }
  0x87   :  { %v7058_v26 = vld [vmem:[#allocation9 + $0xe0] ss:$16 sps:$4 sm:$0xff]   ;;  %v7062_v27 = vld [vmem:[#allocation9 + $0x104] ss:$16 sps:$4 sm:$0xff]   ;;  %v7079_v28 = vld [vmem:[#allocation9 + $0xa8] ss:$16 sps:$4 sm:$0xff]  }
  0x88   :  { %967 = vmatpush1.bf16.msra.mxu0 %v7037_v5  ;;  %v7083_v29 = vld [vmem:[#allocation9 + $0xcc] ss:$16 sps:$4 sm:$0xff]   ;;  %v7064_v30 = vld [vmem:[#allocation9 + $0x100] ss:$16 sps:$4 sm:$0xff]   ;;  %v7068_v31 = vld [vmem:[#allocation9 + $0x124] ss:$16 sps:$4 sm:$0xff]  }
  0x89   :  { %968 = vmatprep.subr.bf16.mxu0 %v7038_v6  ;;  %1053 = vmatpush1.bf16.msra.mxu1 %v7061_v16  ;;  %v7085_v32 = vld [vmem:[#allocation9 + $0xc8] ss:$16 sps:$4 sm:$0xff]   ;;  %v7089_v33 = vld [vmem:[#allocation9 + $0xec] ss:$16 sps:$4 sm:$0xff]   ;;  %v7070_v34 = vld [vmem:[#allocation9 + $0x120] ss:$16 sps:$4 sm:$0xff]  }
  0x8a   :  { %1054 = vmatprep.subr.bf16.mxu1 %v7065_v17  ;;  %v7074_v35 = vld [vmem:[#allocation9 + $0x144] ss:$16 sps:$4 sm:$0xff]   ;;  %v7091_v36 = vld [vmem:[#allocation9 + $0xe8] ss:$16 sps:$4 sm:$0xff]   ;;  %v7095_v37 = vld [vmem:[#allocation9 + $0x10c] ss:$16 sps:$4 sm:$0xff]  }
  0x8b   :  { %v145_v38 = vld [vmem:[#allocation3 + $0x8] sm:$0xff]  ;;  %v7076_v41 = vld [vmem:[#allocation9 + $0x140] ss:$16 sps:$4 sm:$0xff]   ;;  %v7080_v42 = vld [vmem:[#allocation9 + $0x164] ss:$16 sps:$4 sm:$0xff]   ;;  %vm8095_vm0 = vmmov 0  }
  0x8c   :  { %969 = vmatpush1.bf16.msra.mxu0 %v7040_v9  ;;  %v149_v39 = vld [vmem:[#allocation3 + $0x28] sm:$0xff]  ;;  %v7082_v45 = vld [vmem:[#allocation9 + $0x160] ss:$16 sps:$4 sm:$0xff]   ;;  %v7086_v46 = vld [vmem:[#allocation9 + $0x184] ss:$16 sps:$4 sm:$0xff]   ;;  %vm3084_vm1 = vcmask 523264  }
  0x8d   :  { %970 = vmatprep.subr.bf16.mxu0 %v7041_v12  ;;  %1055 = vmatpush1.bf16.msra.mxu1 %v7067_v20  ;;  %v169_v40 = vpack.c.bf16 %v149_v39, %v145_v38  ;;  %v7097_v43 = vld [vmem:[#allocation9 + $0x108] ss:$16 sps:$4 sm:$0xff]   ;;  %v7101_v44 = vld [vmem:[#allocation9 + $0x12c] ss:$16 sps:$4 sm:$0xff]   ;;  %v7088_v49 = vld [vmem:[#allocation9 + $0x180] ss:$16 sps:$4 sm:$0xff]  }
  0x8e   :  { %1056 = vmatprep.subr.bf16.mxu1 %v7071_v21  ;;  %v7103_v47 = vld [vmem:[#allocation9 + $0x128] ss:$16 sps:$4 sm:$0xff]   ;;  %v7107_v48 = vld [vmem:[#allocation9 + $0x14c] ss:$16 sps:$4 sm:$0xff]   ;;  %v7092_v50 = vld [vmem:[#allocation9 + $0x1a4] ss:$16 sps:$4 sm:$0xff]  }
  0x8f   :  { %994 = vmatprep.mubr.bf16.mxu0 %v169_v40  ;;  %1080 = vmatprep.mubr.bf16.mxu1 %v169_v40  ;;  %v7109_v51 = vld [vmem:[#allocation9 + $0x148] ss:$16 sps:$4 sm:$0xff]   ;;  %v7113_v52 = vld [vmem:[#allocation9 + $0x16c] ss:$16 sps:$4 sm:$0xff]   ;;  %v7094_v53 = vld [vmem:[#allocation9 + $0x1a0] ss:$16 sps:$4 sm:$0xff]  }
  0x90   :  { %971 = vmatpush1.bf16.msra.mxu0 %v7043_v13  ;;  %v7098_v54 = vld [vmem:[#allocation9 + $0x1c4] ss:$16 sps:$4 sm:$0xff]   ;;  %v7115_v55 = vld [vmem:[#allocation9 + $0x168] ss:$16 sps:$4 sm:$0xff]   ;;  %v7119_v56 = vld [vmem:[#allocation9 + $0x18c] ss:$16 sps:$4 sm:$0xff]  }
  0x91   :  { %972 = vmatprep.subr.bf16.mxu0 %v7044_v15  ;;  %1057 = vmatpush1.bf16.msra.mxu1 %v7073_v24  ;;  %v7100_v57 = vld [vmem:[#allocation9 + $0x1c0] ss:$16 sps:$4 sm:$0xff]   ;;  %v7104_v58 = vld [vmem:[#allocation9 + $0x1e4] ss:$16 sps:$4 sm:$0xff]   ;;  %v7121_v59 = vld [vmem:[#allocation9 + $0x188] ss:$16 sps:$4 sm:$0xff]  }
  0x92   :  { %1058 = vmatprep.subr.bf16.mxu1 %v7077_v25  ;;  %v7125_v60 = vld [vmem:[#allocation9 + $0x1ac] ss:$16 sps:$4 sm:$0xff]   ;;  %v7106_v61 = vld [vmem:[#allocation9 + $0x1e0] ss:$16 sps:$4 sm:$0xff]   ;;  %v7112_v62 = vld [vmem:[#allocation9 + $0x204] ss:$16 sps:$4 sm:$0xff]  }
  0x93   :  { %v144_v63 = vld [vmem:[#allocation3] sm:$0xff]  ;;  %v7127_v1 = vld [vmem:[#allocation9 + $0x1a8] ss:$16 sps:$4 sm:$0xff]   ;;  %v7131_v2 = vld [vmem:[#allocation9 + $0x1cc] ss:$16 sps:$4 sm:$0xff]   ;;  %vm3205_vm2 = vcmask 1043456  }
  0x94   :  { %973 = vmatpush1.bf16.msra.mxu0 %v7046_v18  ;;  %v148_v0 = vld [vmem:[#allocation3 + $0x20] sm:$0xff]  ;;  %v7133_v6 = vld [vmem:[#allocation9 + $0x1c8] ss:$16 sps:$4 sm:$0xff]   ;;  %v7137_v7 = vld [vmem:[#allocation9 + $0x1ec] ss:$16 sps:$4 sm:$0xff]   ;;  %vm3177_vm3 = vcmask 64512  }
  0x95   :  { %974 = vmatprep.subr.bf16.mxu0 %v7050_v19  ;;  %1059 = vmatpush1.bf16.msra.mxu1 %v7079_v28  ;;  %v7110_v3 = vld [vmem:[#allocation9 + $0x200] ss:$16 sps:$4 sm:$0xff]   ;;  %v168_v4 = vpack.c.bf16 %v148_v0, %v144_v63  ;;  %v7118_v5 = vld [vmem:[#allocation9 + $0x224] ss:$16 sps:$4 sm:$0xff]   ;;  %v7139_v10 = vld [vmem:[#allocation9 + $0x1e8] ss:$16 sps:$4 sm:$0xff]  }
  0x96   :  { %1060 = vmatprep.subr.bf16.mxu1 %v7083_v29  ;;  %v7116_v8 = vld [vmem:[#allocation9 + $0x220] ss:$16 sps:$4 sm:$0xff]   ;;  %v7124_v9 = vld [vmem:[#allocation9 + $0x244] ss:$16 sps:$4 sm:$0xff]   ;;  %v7145_v11 = vld [vmem:[#allocation9 + $0x20c] ss:$16 sps:$4 sm:$0xff]  }
  0x97   :  { %v7122_v12 = vld [vmem:[#allocation9 + $0x240] ss:$16 sps:$4 sm:$0xff]   ;;  %v7130_v13 = vld [vmem:[#allocation9 + $0x264] ss:$16 sps:$4 sm:$0xff]   ;;  %v7143_v14 = vld [vmem:[#allocation9 + $0x208] ss:$16 sps:$4 sm:$0xff]  }
  0x98   :  { %975 = vmatpush1.bf16.msra.mxu0 %v7052_v22  ;;  %v7151_v15 = vld [vmem:[#allocation9 + $0x22c] ss:$16 sps:$4 sm:$0xff]   ;;  %v7128_v16 = vld [vmem:[#allocation9 + $0x260] ss:$16 sps:$4 sm:$0xff]   ;;  %v7136_v17 = vld [vmem:[#allocation9 + $0x284] ss:$16 sps:$4 sm:$0xff]  }
  0x99   :  { %976 = vmatprep.subr.bf16.mxu0 %v7056_v23  ;;  %1061 = vmatpush1.bf16.msra.mxu1 %v7085_v32  ;;  %v7149_v18 = vld [vmem:[#allocation9 + $0x228] ss:$16 sps:$4 sm:$0xff]   ;;  %v7157_v19 = vld [vmem:[#allocation9 + $0x24c] ss:$16 sps:$4 sm:$0xff]   ;;  %v7134_v20 = vld [vmem:[#allocation9 + $0x280] ss:$16 sps:$4 sm:$0xff]  }
  0x9a   :  { %1062 = vmatprep.subr.bf16.mxu1 %v7089_v33  ;;  %v7142_v21 = vld [vmem:[#allocation9 + $0x2a4] ss:$16 sps:$4 sm:$0xff]   ;;  %v7155_v22 = vld [vmem:[#allocation9 + $0x248] ss:$16 sps:$4 sm:$0xff]   ;;  %v7163_v23 = vld [vmem:[#allocation9 + $0x26c] ss:$16 sps:$4 sm:$0xff]  }
  0x9b   :  { %v147_v24 = vld [vmem:[#allocation3 + $0x18] sm:$0xff]  ;;  %v7148_v28 = vld [vmem:[#allocation9 + $0x2c4] ss:$16 sps:$4 sm:$0xff]   ;;  %v7158_v39 = vld [vmem:[#allocation9 + $0x300] ss:$16 sps:$4 sm:$0xff]   ;;  %vm3522_vm4 = vcmask 1048064  }
  0x9c   :  { %977 = vmatpush1.bf16.msra.mxu0 %v7058_v26  ;;  %v151_v25 = vld [vmem:[#allocation3 + $0x38] sm:$0xff]  ;;  %v7154_v32 = vld [vmem:[#allocation9 + $0x2e4] ss:$16 sps:$4 sm:$0xff]   ;;  %v7194_v63 = vld [vmem:[#allocation9 + $0x3c0] ss:$16 sps:$4 sm:$0xff]   ;;  %s8098_s2 = smov 24  }
  0x9d   :  { %978 = vmatprep.subr.bf16.mxu0 %v7062_v27  ;;  %1063 = vmatpush1.bf16.msra.mxu1 %v7091_v36  ;;  %v171_v26 = vpack.c.bf16 %v151_v25, %v147_v24  ;;  %v7140_v27 = vld [vmem:[#allocation9 + $0x2a0] ss:$16 sps:$4 sm:$0xff]   ;;  %v7161_v29 = vld [vmem:[#allocation9 + $0x268] ss:$16 sps:$4 sm:$0xff]   ;;  %v7160_v36 = vld [vmem:[#allocation9 + $0x304] ss:$16 sps:$4 sm:$0xff]  }
  0x9e   :  { %1064 = vmatprep.subr.bf16.mxu1 %v7095_v37  ;;  %v7167_v33 = vld [vmem:[#allocation9 + $0x288] ss:$16 sps:$4 sm:$0xff]   ;;  %v7181_v38 = vld [vmem:[#allocation9 + $0x2cc] ss:$16 sps:$4 sm:$0xff]   ;;  %v7166_v40 = vld [vmem:[#allocation9 + $0x324] ss:$16 sps:$4 sm:$0xff]  }
  0x9f   :  { %v7173_v37 = vld [vmem:[#allocation9 + $0x2a8] ss:$16 sps:$4 sm:$0xff]   ;;  %v7202_v0 = vld [vmem:[#allocation9 + $0x3e4] ss:$16 sps:$4 sm:$0xff]   ;;  %v7247_v24 = vld [vmem:[#allocation11 + $0x2c] ss:$16 sps:$4 sm:$0xff]  }
  0xa0   :  { %979 = vmatpush1.bf16.msra.mxu0 %v7064_v30  ;;  %v7169_v30 = vld [vmem:[#allocation9 + $0x28c] ss:$16 sps:$4 sm:$0xff]   ;;  %v7224_v25 = vld [vmem:[#allocation11 + $0x60] ss:$16 sps:$4 sm:$0xff]   ;;  %s8099_s3 = smov 40   ;;  %s8100_s17 = smov 48  }
  0xa1   :  { %980 = vmatprep.subr.bf16.mxu0 %v7068_v31  ;;  %1065 = vmatpush1.bf16.msra.mxu1 %v7097_v43  ;;  %v7146_v31 = vld [vmem:[#allocation9 + $0x2c0] ss:$16 sps:$4 sm:$0xff]   ;;  %s8101_s18 = smov 56   ;;  %vm4944_vm5 = vcmask 130048   ;;  %vm4947_vm6 = vcmask 195584   ;;  %vm4950_vm7 = vcmask 261120  }
  0xa2   :  { %1066 = vmatprep.subr.bf16.mxu1 %v7101_v44  ;;  %v7164_v43 = vld [vmem:[#allocation9 + $0x320] ss:$16 sps:$4 sm:$0xff]   ;;  %v7172_v44 = vld [vmem:[#allocation9 + $0x344] ss:$16 sps:$4 sm:$0xff]   ;;  %vm4953_vm8 = vcmask 326656   ;;  %vm4956_vm9 = vcmask 392192  }
  0xa3   :  { %vm4959_vm10 = vcmask 457728  }
  0xa4   :  { %981 = vmatpush1.bf16.msra.mxu0 %v7070_v34  ;;  %v7175_v34 = vld [vmem:[#allocation9 + $0x2ac] ss:$16 sps:$4 sm:$0xff]  }
  0xa5   :  { %982 = vmatprep.subr.bf16.mxu0 %v7074_v35  ;;  %1067 = vmatpush1.bf16.msra.mxu1 %v7103_v47  ;;  %v7152_v35 = vld [vmem:[#allocation9 + $0x2e0] ss:$16 sps:$4 sm:$0xff]  }
  0xa6   :  { %1068 = vmatprep.subr.bf16.mxu1 %v7107_v48  ;;  %v7170_v47 = vld [vmem:[#allocation9 + $0x340] ss:$16 sps:$4 sm:$0xff]   ;;  %v7178_v48 = vld [vmem:[#allocation9 + $0x364] ss:$16 sps:$4 sm:$0xff]  }
  0xa8   :  { %983 = vmatpush1.bf16.msra.mxu0 %v7076_v41  ;;  %v7179_v41 = vld [vmem:[#allocation9 + $0x2c8] ss:$16 sps:$4 sm:$0xff]  }
  0xa9   :  { %984 = vmatprep.subr.bf16.mxu0 %v7080_v42  ;;  %1069 = vmatpush1.bf16.msra.mxu1 %v7109_v51  ;;  %v7187_v42 = vld [vmem:[#allocation9 + $0x2ec] ss:$16 sps:$4 sm:$0xff]   ;;  %v7176_v51 = vld [vmem:[#allocation9 + $0x360] ss:$16 sps:$4 sm:$0xff]  }
  0xaa   :  { %1070 = vmatprep.subr.bf16.mxu1 %v7113_v52  ;;  %v7184_v52 = vld [vmem:[#allocation9 + $0x384] ss:$16 sps:$4 sm:$0xff]  }
  0xac   :  { %985 = vmatpush1.bf16.msra.mxu0 %v7082_v45  ;;  %v7185_v45 = vld [vmem:[#allocation9 + $0x2e8] ss:$16 sps:$4 sm:$0xff]  }
  0xad   :  { %986 = vmatprep.subr.bf16.mxu0 %v7086_v46  ;;  %1071 = vmatpush1.bf16.msra.mxu1 %v7115_v55  ;;  %v7193_v46 = vld [vmem:[#allocation9 + $0x30c] ss:$16 sps:$4 sm:$0xff]   ;;  %v7182_v55 = vld [vmem:[#allocation9 + $0x380] ss:$16 sps:$4 sm:$0xff]  }
  0xae   :  { %1072 = vmatprep.subr.bf16.mxu1 %v7119_v56  ;;  %v7190_v56 = vld [vmem:[#allocation9 + $0x3a4] ss:$16 sps:$4 sm:$0xff]  }
  0xb0   :  { %987 = vmatpush1.bf16.msra.mxu0 %v7088_v49  ;;  %v7191_v49 = vld [vmem:[#allocation9 + $0x308] ss:$16 sps:$4 sm:$0xff]  }
  0xb1   :  { %988 = vmatprep.subr.bf16.mxu0 %v7092_v50  ;;  %1073 = vmatpush1.bf16.msra.mxu1 %v7121_v59  ;;  %v7199_v50 = vld [vmem:[#allocation9 + $0x32c] ss:$16 sps:$4 sm:$0xff]   ;;  %v7188_v59 = vld [vmem:[#allocation9 + $0x3a0] ss:$16 sps:$4 sm:$0xff]  }
  0xb2   :  { %1074 = vmatprep.subr.bf16.mxu1 %v7125_v60  ;;  %v7196_v60 = vld [vmem:[#allocation9 + $0x3c4] ss:$16 sps:$4 sm:$0xff]  }
  0xb4   :  { %989 = vmatpush1.bf16.msra.mxu0 %v7094_v53  ;;  %v7197_v53 = vld [vmem:[#allocation9 + $0x328] ss:$16 sps:$4 sm:$0xff]  }
  0xb5   :  { %990 = vmatprep.subr.bf16.mxu0 %v7098_v54  ;;  %1075 = vmatpush1.bf16.msra.mxu1 %v7127_v1  ;;  %v7205_v54 = vld [vmem:[#allocation9 + $0x34c] ss:$16 sps:$4 sm:$0xff]   ;;  %v7215_v1 = vld [vmem:[#allocation9 + $0x388] ss:$16 sps:$4 sm:$0xff]  }
  0xb6   :  { %1076 = vmatprep.subr.bf16.mxu1 %v7131_v2  ;;  %v7223_v2 = vld [vmem:[#allocation9 + $0x3ac] ss:$16 sps:$4 sm:$0xff]  }
  0xb8   :  { %991 = vmatpush1.bf16.msra.mxu0 %v7100_v57  ;;  %v7203_v57 = vld [vmem:[#allocation9 + $0x348] ss:$16 sps:$4 sm:$0xff]  }
  0xb9   :  { %992 = vmatprep.subr.bf16.mxu0 %v7104_v58  ;;  %1077 = vmatpush1.bf16.msra.mxu1 %v7133_v6  ;;  %v7211_v58 = vld [vmem:[#allocation9 + $0x36c] ss:$16 sps:$4 sm:$0xff]   ;;  %v7221_v6 = vld [vmem:[#allocation9 + $0x3a8] ss:$16 sps:$4 sm:$0xff]  }
  0xba   :  { %1078 = vmatprep.subr.bf16.mxu1 %v7137_v7  ;;  %v7208_v7 = vld [vmem:[#allocation11 + $0x4] ss:$16 sps:$4 sm:$0xff]  }
  0xbc   :  { %993 = vmatpush1.bf16.msra.mxu0 %v7106_v61  ;;  %v7209_v61 = vld [vmem:[#allocation9 + $0x368] ss:$16 sps:$4 sm:$0xff]  }
  0xbd   :  { %1005 = vmatprep.subr.bf16.mxu0 %v7112_v62  ;;  %1079 = vmatpush1.bf16.msra.mxu1 %v7139_v10  ;;  %v7217_v62 = vld [vmem:[#allocation9 + $0x38c] ss:$16 sps:$4 sm:$0xff]  }
  0xbe   :  { %1091 = vmatprep.subr.bf16.mxu1 %v7145_v11  ;;  %v153_v11 = vld [vmem:[#allocation6 + $0x8] sm:$0xff] }
  0xbf   :  { %995 = vmatmul.mubr.bf16.vlgmr.msra.gmra.mrb[0].mxu0 %v168_v4 }
  0xc0   :  { %1006 = vmatpush1.bf16.msra.mxu0 %v7110_v3  ;;  %1081 = vmatmul.mubr.bf16.vlgmr.msra.gmra.mrb[0].mxu1 %v168_v4  ;;  %v7200_v3 = vld [vmem:[#allocation9 + $0x3e0] ss:$16 sps:$4 sm:$0xff]  }
  0xc1   :  { %1007 = vmatprep.subr.bf16.mxu0 %v7118_v5  ;;  %1092 = vmatpush1.bf16.msra.mxu1 %v7143_v14  ;;  %v146_v4 = vld [vmem:[#allocation3 + $0x10] sm:$0xff]  ;;  %v7227_v14 = vld [vmem:[#allocation9 + $0x3c8] ss:$16 sps:$4 sm:$0xff]  }
  0xc2   :  { %1093 = vmatprep.subr.bf16.mxu1 %v7151_v15  ;;  %1037 = vmatprep.mubr.bf16.mxu0 %v171_v26  ;;  %v150_v5 = vld [vmem:[#allocation3 + $0x30] sm:$0xff]  ;;  %v7235_v15 = vld [vmem:[#allocation9 + $0x3ec] ss:$16 sps:$4 sm:$0xff]  }
  0xc3   :  { %1123 = vmatprep.mubr.bf16.mxu1 %v171_v26  ;;  %v170_v10 = vpack.c.bf16 %v150_v5, %v146_v4  ;;  %v7232_v26 = vld [vmem:[#allocation11 + $0x84] ss:$16 sps:$4 sm:$0xff]   ;;  %v7313_v4 = vld [vmem:[#allocation11 + $0x18c] ss:$16 sps:$4 sm:$0xff]   ;;  %v7290_v5 = vld [vmem:[#allocation11 + $0x1c0] ss:$16 sps:$4 sm:$0xff]  }
  0xc4   :  { %1008 = vmatpush1.bf16.msra.mxu0 %v7116_v8  ;;  %v7229_v8 = vld [vmem:[#allocation9 + $0x3cc] ss:$16 sps:$4 sm:$0xff]  }
  0xc5   :  { %1009 = vmatprep.subr.bf16.mxu0 %v7124_v9  ;;  %1094 = vmatpush1.bf16.msra.mxu1 %v7149_v18  ;;  %v7206_v9 = vld [vmem:[#allocation11] ss:$16 sps:$4 sm:$0xff]   ;;  %v7220_v18 = vld [vmem:[#allocation11 + $0x44] ss:$16 sps:$4 sm:$0xff]  }
  0xc6   :  { %1095 = vmatprep.subr.bf16.mxu1 %v7157_v19  ;;  %v7233_v19 = vld [vmem:[#allocation9 + $0x3e8] ss:$16 sps:$4 sm:$0xff]  }
  0xc8   :  { %1010 = vmatpush1.bf16.msra.mxu0 %v7122_v12  ;;  %v157_v12 = vld [vmem:[#allocation6 + $0x28] sm:$0xff] }
  0xc9   :  { %1011 = vmatprep.subr.bf16.mxu0 %v7130_v13  ;;  %1096 = vmatpush1.bf16.msra.mxu1 %v7155_v22  ;;  %v7214_v13 = vld [vmem:[#allocation11 + $0x24] ss:$16 sps:$4 sm:$0xff]  }
  0xca   :  { %1097 = vmatprep.subr.bf16.mxu1 %v7163_v23  ;;  %v7226_v22 = vld [vmem:[#allocation11 + $0x64] ss:$16 sps:$4 sm:$0xff]   ;;  %v7239_v23 = vld [vmem:[#allocation11 + $0x8] ss:$16 sps:$4 sm:$0xff]  }
  0xcc   :  { %1012 = vmatpush1.bf16.msra.mxu0 %v7128_v16  ;;  %v1135_v16 = vpack.c.bf16 %v157_v12, %v153_v11  ;;  %v152_v11 = vld [vmem:[#allocation6] sm:$0xff] }
  0xcd   :  { %1013 = vmatprep.subr.bf16.mxu0 %v7136_v17  ;;  %1098 = vmatpush1.bf16.msra.mxu1 %v7161_v29  ;;  %v7212_v17 = vld [vmem:[#allocation11 + $0x20] ss:$16 sps:$4 sm:$0xff]  }
  0xce   :  { %1099 = vmatprep.subr.bf16.mxu1 %v7169_v30  ;;  %v7230_v29 = vld [vmem:[#allocation11 + $0x80] ss:$16 sps:$4 sm:$0xff]   ;;  %v7238_v30 = vld [vmem:[#allocation11 + $0xa4] ss:$16 sps:$4 sm:$0xff]  }
  0xcf   :  { %v156_v12 = vld [vmem:[#allocation6 + $0x20] sm:$0xff] }
  0xd0   :  { %1014 = vmatpush1.bf16.msra.mxu0 %v7134_v20  ;;  %v7241_v20 = vld [vmem:[#allocation11 + $0xc] ss:$16 sps:$4 sm:$0xff]  }
  0xd1   :  { %1015 = vmatprep.subr.bf16.mxu0 %v7142_v21  ;;  %1100 = vmatpush1.bf16.msra.mxu1 %v7167_v33  ;;  %v7218_v21 = vld [vmem:[#allocation11 + $0x40] ss:$16 sps:$4 sm:$0xff]  }
  0xd2   :  { %1101 = vmatprep.subr.bf16.mxu1 %v7175_v34  ;;  %v7236_v33 = vld [vmem:[#allocation11 + $0xa0] ss:$16 sps:$4 sm:$0xff]   ;;  %v7244_v34 = vld [vmem:[#allocation11 + $0xc4] ss:$16 sps:$4 sm:$0xff]  }
  0xd4   :  { %1016 = vmatpush1.bf16.msra.mxu0 %v7140_v27  ;;  %v7245_v27 = vld [vmem:[#allocation11 + $0x28] ss:$16 sps:$4 sm:$0xff]  }
  0xd5   :  { %1017 = vmatprep.subr.bf16.mxu0 %v7148_v28  ;;  %1102 = vmatpush1.bf16.msra.mxu1 %v7173_v37  ;;  %v7253_v28 = vld [vmem:[#allocation11 + $0x4c] ss:$16 sps:$4 sm:$0xff]   ;;  %v7242_v37 = vld [vmem:[#allocation11 + $0xc0] ss:$16 sps:$4 sm:$0xff]  }
  0xd6   :  { %1103 = vmatprep.subr.bf16.mxu1 %v7181_v38  ;;  %v7250_v38 = vld [vmem:[#allocation11 + $0xe4] ss:$16 sps:$4 sm:$0xff]  }
  0xd8   :  { %1018 = vmatpush1.bf16.msra.mxu0 %v7146_v31  ;;  %v7251_v31 = vld [vmem:[#allocation11 + $0x48] ss:$16 sps:$4 sm:$0xff]  }
  0xd9   :  { %1019 = vmatprep.subr.bf16.mxu0 %v7154_v32  ;;  %1104 = vmatpush1.bf16.msra.mxu1 %v7179_v41  ;;  %v7259_v32 = vld [vmem:[#allocation11 + $0x6c] ss:$16 sps:$4 sm:$0xff]   ;;  %v7248_v41 = vld [vmem:[#allocation11 + $0xe0] ss:$16 sps:$4 sm:$0xff]  }
  0xda   :  { %1105 = vmatprep.subr.bf16.mxu1 %v7187_v42  ;;  %v7256_v42 = vld [vmem:[#allocation11 + $0x104] ss:$16 sps:$4 sm:$0xff]  }
  0xdc   :  { %1020 = vmatpush1.bf16.msra.mxu0 %v7152_v35  ;;  %v7257_v35 = vld [vmem:[#allocation11 + $0x68] ss:$16 sps:$4 sm:$0xff]  }
  0xdd   :  { %1021 = vmatprep.subr.bf16.mxu0 %v7160_v36  ;;  %1106 = vmatpush1.bf16.msra.mxu1 %v7185_v45  ;;  %v7265_v36 = vld [vmem:[#allocation11 + $0x8c] ss:$16 sps:$4 sm:$0xff]   ;;  %v7254_v45 = vld [vmem:[#allocation11 + $0x100] ss:$16 sps:$4 sm:$0xff]  }
  0xde   :  { %1107 = vmatprep.subr.bf16.mxu1 %v7193_v46  ;;  %v7262_v46 = vld [vmem:[#allocation11 + $0x124] ss:$16 sps:$4 sm:$0xff]  }
  0xe0   :  { %1022 = vmatpush1.bf16.msra.mxu0 %v7158_v39  ;;  %v7263_v39 = vld [vmem:[#allocation11 + $0x88] ss:$16 sps:$4 sm:$0xff]  }
  0xe1   :  { %1023 = vmatprep.subr.bf16.mxu0 %v7166_v40  ;;  %1108 = vmatpush1.bf16.msra.mxu1 %v7191_v49  ;;  %v7271_v40 = vld [vmem:[#allocation11 + $0xac] ss:$16 sps:$4 sm:$0xff]   ;;  %v7260_v49 = vld [vmem:[#allocation11 + $0x120] ss:$16 sps:$4 sm:$0xff]  }
  0xe2   :  { %1109 = vmatprep.subr.bf16.mxu1 %v7199_v50  ;;  %v7268_v50 = vld [vmem:[#allocation11 + $0x144] ss:$16 sps:$4 sm:$0xff]  }
  0xe4   :  { %1024 = vmatpush1.bf16.msra.mxu0 %v7164_v43  ;;  %v7269_v43 = vld [vmem:[#allocation11 + $0xa8] ss:$16 sps:$4 sm:$0xff]  }
  0xe5   :  { %1025 = vmatprep.subr.bf16.mxu0 %v7172_v44  ;;  %1110 = vmatpush1.bf16.msra.mxu1 %v7197_v53  ;;  %v7277_v44 = vld [vmem:[#allocation11 + $0xcc] ss:$16 sps:$4 sm:$0xff]   ;;  %v7266_v53 = vld [vmem:[#allocation11 + $0x140] ss:$16 sps:$4 sm:$0xff]  }
  0xe6   :  { %1111 = vmatprep.subr.bf16.mxu1 %v7205_v54  ;;  %v7287_v54 = vld [vmem:[#allocation11 + $0x108] ss:$16 sps:$4 sm:$0xff]  }
  0xe8   :  { %1026 = vmatpush1.bf16.msra.mxu0 %v7170_v47  ;;  %v7275_v47 = vld [vmem:[#allocation11 + $0xc8] ss:$16 sps:$4 sm:$0xff]  }
  0xe9   :  { %1027 = vmatprep.subr.bf16.mxu0 %v7178_v48  ;;  %1112 = vmatpush1.bf16.msra.mxu1 %v7203_v57  ;;  %v7283_v48 = vld [vmem:[#allocation11 + $0xec] ss:$16 sps:$4 sm:$0xff]   ;;  %v7272_v57 = vld [vmem:[#allocation11 + $0x160] ss:$16 sps:$4 sm:$0xff]  }
  0xea   :  { %1113 = vmatprep.subr.bf16.mxu1 %v7211_v58  ;;  %v7280_v58 = vld [vmem:[#allocation11 + $0x184] ss:$16 sps:$4 sm:$0xff]  }
  0xec   :  { %1028 = vmatpush1.bf16.msra.mxu0 %v7176_v51  ;;  %v7281_v51 = vld [vmem:[#allocation11 + $0xe8] ss:$16 sps:$4 sm:$0xff]  }
  0xed   :  { %1029 = vmatprep.subr.bf16.mxu0 %v7184_v52  ;;  %1114 = vmatpush1.bf16.msra.mxu1 %v7209_v61  ;;  %v7289_v52 = vld [vmem:[#allocation11 + $0x10c] ss:$16 sps:$4 sm:$0xff]   ;;  %v7278_v61 = vld [vmem:[#allocation11 + $0x180] ss:$16 sps:$4 sm:$0xff]  }
  0xee   :  { %1115 = vmatprep.subr.bf16.mxu1 %v7217_v62  ;;  %v7286_v62 = vld [vmem:[#allocation11 + $0x1a4] ss:$16 sps:$4 sm:$0xff]  }
  0xf0   :  { %1030 = vmatpush1.bf16.msra.mxu0 %v7182_v55  ;;  %v7274_v55 = vld [vmem:[#allocation11 + $0x164] ss:$16 sps:$4 sm:$0xff]  }
  0xf1   :  { %1031 = vmatprep.subr.bf16.mxu0 %v7190_v56  ;;  %1116 = vmatpush1.bf16.msra.mxu1 %v7215_v1  ;;  %v7295_v56 = vld [vmem:[#allocation11 + $0x12c] ss:$16 sps:$4 sm:$0xff]   ;;  %v7284_v1 = vld [vmem:[#allocation11 + $0x1a0] ss:$16 sps:$4 sm:$0xff]  }
  0xf2   :  { %1117 = vmatprep.subr.bf16.mxu1 %v7223_v2  ;;  %v7292_v2 = vld [vmem:[#allocation11 + $0x1c4] ss:$16 sps:$4 sm:$0xff]  }
  0xf4   :  { %1032 = vmatpush1.bf16.msra.mxu0 %v7188_v59  ;;  %v7293_v59 = vld [vmem:[#allocation11 + $0x128] ss:$16 sps:$4 sm:$0xff]  }
  0xf5   :  { %1033 = vmatprep.subr.bf16.mxu0 %v7196_v60  ;;  %1118 = vmatpush1.bf16.msra.mxu1 %v7221_v6  ;;  %v7301_v60 = vld [vmem:[#allocation11 + $0x14c] ss:$16 sps:$4 sm:$0xff]   ;;  %v7298_v6 = vld [vmem:[#allocation11 + $0x1e4] ss:$16 sps:$4 sm:$0xff]  }
  0xf6   :  { %1119 = vmatprep.subr.bf16.mxu1 %v7229_v8  ;;  %v7319_v8 = vld [vmem:[#allocation11 + $0x1ac] ss:$16 sps:$4 sm:$0xff]  }
  0xf8   :  { %1034 = vmatpush1.bf16.msra.mxu0 %v7194_v63  ;;  %v7299_v63 = vld [vmem:[#allocation11 + $0x148] ss:$16 sps:$4 sm:$0xff]  }
  0xf9   :  { %1035 = vmatprep.subr.bf16.mxu0 %v7202_v0  ;;  %1120 = vmatpush1.bf16.msra.mxu1 %v7227_v14  ;;  %v7307_v0 = vld [vmem:[#allocation11 + $0x16c] ss:$16 sps:$4 sm:$0xff]  }
  0xfa   :  { %1121 = vmatprep.subr.bf16.mxu1 %v7235_v15  ;;  %v7325_v14 = vld [vmem:[#allocation11 + $0x1cc] ss:$16 sps:$4 sm:$0xff]   ;;  %v7302_v15 = vld [vmem:[#allocation11 + $0x200] ss:$16 sps:$4 sm:$0xff]  }
  0xfc   :  { %1036 = vmatpush1.bf16.msra.mxu0 %v7200_v3  ;;  %v7305_v3 = vld [vmem:[#allocation11 + $0x168] ss:$16 sps:$4 sm:$0xff]  }
  0xfd   :  { %1928 = vmatprep.subr.bf16.mxu0 %v7208_v7  ;;  %1122 = vmatpush1.bf16.msra.mxu1 %v7233_v19  ;;  %v7311_v7 = vld [vmem:[#allocation11 + $0x188] ss:$16 sps:$4 sm:$0xff]   ;;  %v7310_v19 = vld [vmem:[#allocation11 + $0x224] ss:$16 sps:$4 sm:$0xff]  }
  0xfe   :  { %2014 = vmatprep.subr.bf16.mxu1 %v7241_v20  ;;  %v7323_v20 = vld [vmem:[#allocation11 + $0x1c8] ss:$16 sps:$4 sm:$0xff]  }
  0xff   :  { %1038 = vmatmul.mubr.bf16.vlgmr.msra.gmra.mrb[0].mxu0 %v170_v10 }
 0x100   :  { %1929 = vmatpush1.bf16.msra.mxu0 %v7206_v9  ;;  %1960 = vmatprep.mubr.bf16.mxu0 %v1135_v16  ;;  %v7296_v9 = vld [vmem:[#allocation11 + $0x1e0] ss:$16 sps:$4 sm:$0xff]  }
 0x101   :  { %1930 = vmatprep.subr.bf16.mxu0 %v7214_v13  ;;  %1124 = vmatmul.mubr.bf16.vlgmr.msra.gmra.mrb[0].mxu1 %v170_v10  ;;  %v7304_v10 = vld [vmem:[#allocation11 + $0x204] ss:$16 sps:$4 sm:$0xff]   ;;  %v7317_v13 = vld [vmem:[#allocation11 + $0x1a8] ss:$16 sps:$4 sm:$0xff]  }
 0x102   :  { %2015 = vmatpush1.bf16.msra.mxu1 %v7239_v23  ;;  %2046 = vmatprep.mubr.bf16.mxu1 %v1135_v16  ;;  %v1134_v16 = vpack.c.bf16 %v156_v12, %v152_v11  ;;  %v7308_v23 = vld [vmem:[#allocation11 + $0x220] ss:$16 sps:$4 sm:$0xff]   ;;  %v7394_v12 = vld [vmem:[#allocation11 + $0x3e4] ss:$16 sps:$4 sm:$0xff]  }
 0x103   :  { %2016 = vmatprep.subr.bf16.mxu1 %v7247_v24  ;;  %v7316_v24 = vld [vmem:[#allocation11 + $0x244] ss:$16 sps:$4 sm:$0xff]   ;;  %v7386_v11 = vld [vmem:[#allocation11 + $0x3c0] ss:$16 sps:$4 sm:$0xff]  }
 0x104   :  { %1931 = vmatpush1.bf16.msra.mxu0 %v7212_v17  ;;  %v155_v17 = vld [vmem:[#allocation6 + $0x18] sm:$0xff] }
 0x105   :  { %1932 = vmatprep.subr.bf16.mxu0 %v7220_v18  ;;  %v159_v18 = vld [vmem:[#allocation6 + $0x38] sm:$0xff] }
 0x106   :  { %2017 = vmatpush1.bf16.msra.mxu1 %v7245_v27  ;;  %v7314_v27 = vld [vmem:[#allocation11 + $0x240] ss:$16 sps:$4 sm:$0xff]  }
 0x107   :  { %2018 = vmatprep.subr.bf16.mxu1 %v7253_v28  ;;  %v7322_v28 = vld [vmem:[#allocation11 + $0x264] ss:$16 sps:$4 sm:$0xff]  }
 0x108   :  { %1933 = vmatpush1.bf16.msra.mxu0 %v7218_v21  ;;  %v7331_v21 = vld [vmem:[#allocation11 + $0x1ec] ss:$16 sps:$4 sm:$0xff]  }
 0x109   :  { %1934 = vmatprep.subr.bf16.mxu0 %v7226_v22  ;;  %v1137_v22 = vpack.c.bf16 %v159_v18, %v155_v17  ;;  %v158_v17 = vld [vmem:[#allocation6 + $0x30] sm:$0xff]  ;;  %v7404_v18 = vld [vmem:[#allocation11 + $0x3a8] ss:$16 sps:$4 sm:$0xff]  }
 0x10a   :  { %2019 = vmatpush1.bf16.msra.mxu1 %v7251_v31  ;;  %v7320_v31 = vld [vmem:[#allocation11 + $0x260] ss:$16 sps:$4 sm:$0xff]  }
 0x10b   :  { %2020 = vmatprep.subr.bf16.mxu1 %v7259_v32  ;;  %v7328_v32 = vld [vmem:[#allocation11 + $0x284] ss:$16 sps:$4 sm:$0xff]  }
 0x10c   :  { %1935 = vmatpush1.bf16.msra.mxu0 %v7224_v25  ;;  %v7329_v25 = vld [vmem:[#allocation11 + $0x1e8] ss:$16 sps:$4 sm:$0xff]  }
 0x10d   :  { %1936 = vmatprep.subr.bf16.mxu0 %v7232_v26  ;;  %v7337_v26 = vld [vmem:[#allocation11 + $0x20c] ss:$16 sps:$4 sm:$0xff]  }
 0x10e   :  { %2021 = vmatpush1.bf16.msra.mxu1 %v7257_v35  ;;  %v7326_v35 = vld [vmem:[#allocation11 + $0x280] ss:$16 sps:$4 sm:$0xff]  }
 0x10f   :  { %2022 = vmatprep.subr.bf16.mxu1 %v7265_v36  ;;  %v7334_v36 = vld [vmem:[#allocation11 + $0x2a4] ss:$16 sps:$4 sm:$0xff]  }
 0x110   :  { %1937 = vmatpush1.bf16.msra.mxu0 %v7230_v29  ;;  %v7335_v29 = vld [vmem:[#allocation11 + $0x208] ss:$16 sps:$4 sm:$0xff]  }
 0x111   :  { %1938 = vmatprep.subr.bf16.mxu0 %v7238_v30  ;;  %v7343_v30 = vld [vmem:[#allocation11 + $0x22c] ss:$16 sps:$4 sm:$0xff]  }
 0x112   :  { %2023 = vmatpush1.bf16.msra.mxu1 %v7263_v39  ;;  %v7332_v39 = vld [vmem:[#allocation11 + $0x2a0] ss:$16 sps:$4 sm:$0xff]  }
 0x113   :  { %2024 = vmatprep.subr.bf16.mxu1 %v7271_v40  ;;  %v7340_v40 = vld [vmem:[#allocation11 + $0x2c4] ss:$16 sps:$4 sm:$0xff]  }
 0x114   :  { %1939 = vmatpush1.bf16.msra.mxu0 %v7236_v33  ;;  %v7341_v33 = vld [vmem:[#allocation11 + $0x228] ss:$16 sps:$4 sm:$0xff]  }
 0x115   :  { %1940 = vmatprep.subr.bf16.mxu0 %v7244_v34  ;;  %v7349_v34 = vld [vmem:[#allocation11 + $0x24c] ss:$16 sps:$4 sm:$0xff]  }
 0x116   :  { %2025 = vmatpush1.bf16.msra.mxu1 %v7269_v43  ;;  %v7338_v43 = vld [vmem:[#allocation11 + $0x2c0] ss:$16 sps:$4 sm:$0xff]  }
 0x117   :  { %2026 = vmatprep.subr.bf16.mxu1 %v7277_v44  ;;  %v7346_v44 = vld [vmem:[#allocation11 + $0x2e4] ss:$16 sps:$4 sm:$0xff]  }
 0x118   :  { %1941 = vmatpush1.bf16.msra.mxu0 %v7242_v37  ;;  %v7347_v37 = vld [vmem:[#allocation11 + $0x248] ss:$16 sps:$4 sm:$0xff]  }
 0x119   :  { %1942 = vmatprep.subr.bf16.mxu0 %v7250_v38  ;;  %v7355_v38 = vld [vmem:[#allocation11 + $0x26c] ss:$16 sps:$4 sm:$0xff]  }
 0x11a   :  { %2027 = vmatpush1.bf16.msra.mxu1 %v7275_v47  ;;  %v7344_v47 = vld [vmem:[#allocation11 + $0x2e0] ss:$16 sps:$4 sm:$0xff]  }
 0x11b   :  { %2028 = vmatprep.subr.bf16.mxu1 %v7283_v48  ;;  %v7365_v48 = vld [vmem:[#allocation11 + $0x2a8] ss:$16 sps:$4 sm:$0xff]  }
 0x11c   :  { %1943 = vmatpush1.bf16.msra.mxu0 %v7248_v41  ;;  %v7353_v41 = vld [vmem:[#allocation11 + $0x268] ss:$16 sps:$4 sm:$0xff]  }
 0x11d   :  { %1944 = vmatprep.subr.bf16.mxu0 %v7256_v42  ;;  %v7361_v42 = vld [vmem:[#allocation11 + $0x28c] ss:$16 sps:$4 sm:$0xff]  }
 0x11e   :  { %2029 = vmatpush1.bf16.msra.mxu1 %v7281_v51  ;;  %v7350_v51 = vld [vmem:[#allocation11 + $0x300] ss:$16 sps:$4 sm:$0xff]  }
 0x11f   :  { %2030 = vmatprep.subr.bf16.mxu1 %v7289_v52  ;;  %v7358_v52 = vld [vmem:[#allocation11 + $0x324] ss:$16 sps:$4 sm:$0xff]  }
 0x120   :  { %1945 = vmatpush1.bf16.msra.mxu0 %v7254_v45  ;;  %v7359_v45 = vld [vmem:[#allocation11 + $0x288] ss:$16 sps:$4 sm:$0xff]  }
 0x121   :  { %1946 = vmatprep.subr.bf16.mxu0 %v7262_v46  ;;  %v7367_v46 = vld [vmem:[#allocation11 + $0x2ac] ss:$16 sps:$4 sm:$0xff]  }
 0x122   :  { %2031 = vmatpush1.bf16.msra.mxu1 %v7287_v54  ;;  %v7379_v54 = vld [vmem:[#allocation11 + $0x2ec] ss:$16 sps:$4 sm:$0xff]  }
 0x123   :  { %2032 = vmatprep.subr.bf16.mxu1 %v7295_v56  ;;  %v7364_v56 = vld [vmem:[#allocation11 + $0x344] ss:$16 sps:$4 sm:$0xff]  }
 0x124   :  { %1947 = vmatpush1.bf16.msra.mxu0 %v7260_v49  ;;  %v7352_v49 = vld [vmem:[#allocation11 + $0x304] ss:$16 sps:$4 sm:$0xff]  }
 0x125   :  { %1948 = vmatprep.subr.bf16.mxu0 %v7268_v50  ;;  %v7373_v50 = vld [vmem:[#allocation11 + $0x2cc] ss:$16 sps:$4 sm:$0xff]  }
 0x126   :  { %2033 = vmatpush1.bf16.msra.mxu1 %v7293_v59  ;;  %v7362_v59 = vld [vmem:[#allocation11 + $0x340] ss:$16 sps:$4 sm:$0xff]  }
 0x127   :  { %2034 = vmatprep.subr.bf16.mxu1 %v7301_v60  ;;  %v7370_v60 = vld [vmem:[#allocation11 + $0x364] ss:$16 sps:$4 sm:$0xff]  }
 0x128   :  { %1949 = vmatpush1.bf16.msra.mxu0 %v7266_v53  ;;  %v7371_v53 = vld [vmem:[#allocation11 + $0x2c8] ss:$16 sps:$4 sm:$0xff]  }
 0x129   :  { %1950 = vmatprep.subr.bf16.mxu0 %v7274_v55  ;;  %v7356_v55 = vld [vmem:[#allocation11 + $0x320] ss:$16 sps:$4 sm:$0xff]  }
 0x12a   :  { %2035 = vmatpush1.bf16.msra.mxu1 %v7299_v63  ;;  %v7368_v63 = vld [vmem:[#allocation11 + $0x360] ss:$16 sps:$4 sm:$0xff]  }
 0x12b   :  { %2036 = vmatprep.subr.bf16.mxu1 %v7307_v0  ;;  %v7376_v0 = vld [vmem:[#allocation11 + $0x384] ss:$16 sps:$4 sm:$0xff]  }
 0x12c   :  { %1951 = vmatpush1.bf16.msra.mxu0 %v7272_v57  ;;  %v7377_v57 = vld [vmem:[#allocation11 + $0x2e8] ss:$16 sps:$4 sm:$0xff]  }
 0x12d   :  { %1952 = vmatprep.subr.bf16.mxu0 %v7280_v58  ;;  %v7385_v58 = vld [vmem:[#allocation11 + $0x30c] ss:$16 sps:$4 sm:$0xff]  }
 0x12e   :  { %2037 = vmatpush1.bf16.msra.mxu1 %v7305_v3  ;;  %v7374_v3 = vld [vmem:[#allocation11 + $0x380] ss:$16 sps:$4 sm:$0xff]  }
 0x12f   :  { %2038 = vmatprep.subr.bf16.mxu1 %v7313_v4  ;;  %v7382_v4 = vld [vmem:[#allocation11 + $0x3a4] ss:$16 sps:$4 sm:$0xff]  }
 0x130   :  { %1953 = vmatpush1.bf16.msra.mxu0 %v7278_v61  ;;  %v7383_v61 = vld [vmem:[#allocation11 + $0x308] ss:$16 sps:$4 sm:$0xff]  }
 0x131   :  { %1954 = vmatprep.subr.bf16.mxu0 %v7286_v62  ;;  %v7391_v62 = vld [vmem:[#allocation11 + $0x32c] ss:$16 sps:$4 sm:$0xff]  }
 0x132   :  { %2039 = vmatpush1.bf16.msra.mxu1 %v7311_v7  ;;  %v7380_v7 = vld [vmem:[#allocation11 + $0x3a0] ss:$16 sps:$4 sm:$0xff]  }
 0x133   :  { %2040 = vmatprep.subr.bf16.mxu1 %v7319_v8  ;;  %v7388_v8 = vld [vmem:[#allocation11 + $0x3c4] ss:$16 sps:$4 sm:$0xff]  }
 0x134   :  { %1955 = vmatpush1.bf16.msra.mxu0 %v7284_v1  ;;  %v7389_v1 = vld [vmem:[#allocation11 + $0x328] ss:$16 sps:$4 sm:$0xff]  }
 0x135   :  { %1956 = vmatprep.subr.bf16.mxu0 %v7292_v2  ;;  %v7397_v2 = vld [vmem:[#allocation11 + $0x34c] ss:$16 sps:$4 sm:$0xff]  }
 0x136   :  { %2041 = vmatpush1.bf16.msra.mxu1 %v7317_v13  ;;  %v7401_v13 = vld [vmem:[#allocation11 + $0x388] ss:$16 sps:$4 sm:$0xff]  }
 0x137   :  { %2042 = vmatprep.subr.bf16.mxu1 %v7325_v14  ;;  %v7406_v14 = vld [vmem:[#allocation11 + $0x3ac] ss:$16 sps:$4 sm:$0xff]  }
 0x138   :  { %1957 = vmatpush1.bf16.msra.mxu0 %v7290_v5  ;;  %v7395_v5 = vld [vmem:[#allocation11 + $0x348] ss:$16 sps:$4 sm:$0xff]  }
 0x139   :  { %1958 = vmatprep.subr.bf16.mxu0 %v7298_v6  ;;  %v7400_v6 = vld [vmem:[#allocation11 + $0x36c] ss:$16 sps:$4 sm:$0xff]  }
 0x13a   :  { %2043 = vmatpush1.bf16.msra.mxu1 %v7323_v20  ;;  %v7415_v20 = vld [vmem:[#allocation12 + $0x4] ss:$16 sps:$4 sm:$0xff]  }
 0x13b   :  { %2044 = vmatprep.subr.bf16.mxu1 %v7331_v21  ;;  %v7407_v21 = vld [vmem:[#allocation11 + $0x3c8] ss:$16 sps:$4 sm:$0xff]  }
 0x13c   :  { %1959 = vmatpush1.bf16.msra.mxu0 %v7296_v9  ;;  %v7398_v9 = vld [vmem:[#allocation11 + $0x368] ss:$16 sps:$4 sm:$0xff]  }
 0x13d   :  { %1971 = vmatprep.subr.bf16.mxu0 %v7304_v10  ;;  %v7403_v10 = vld [vmem:[#allocation11 + $0x38c] ss:$16 sps:$4 sm:$0xff]  }
 0x13e   :  { %2045 = vmatpush1.bf16.msra.mxu1 %v7329_v25  ;;  %v165_v25 = vld [vmem:[#allocation8 + $0x28] sm:$0xff] }
 0x13f   :  { %1961 = vmatmul.mubr.bf16.vlgmr.msra.gmra.mrb[4].mxu0 %v1134_v16  ;;  %2057 = vmatprep.subr.bf16.mxu1 %v7337_v26  ;;  %v7413_v26 = vld [vmem:[#allocation12] ss:$16 sps:$4 sm:$0xff]  }
 0x140   :  { %1972 = vmatpush1.bf16.msra.mxu0 %v7302_v15  ;;  %2003 = vmatprep.mubr.bf16.mxu0 %v1137_v22  ;;  %v7392_v15 = vld [vmem:[#allocation11 + $0x3e0] ss:$16 sps:$4 sm:$0xff]  }
 0x141   :  { %1973 = vmatprep.subr.bf16.mxu0 %v7310_v19  ;;  %2047 = vmatmul.mubr.bf16.vlgmr.msra.gmra.mrb[4].mxu1 %v1134_v16  ;;  %v154_v16 = vld [vmem:[#allocation6 + $0x10] sm:$0xff]  ;;  %v7409_v19 = vld [vmem:[#allocation11 + $0x3cc] ss:$16 sps:$4 sm:$0xff]  }
 0x142   :  { %2058 = vmatpush1.bf16.msra.mxu1 %v7335_v29  ;;  %2089 = vmatprep.mubr.bf16.mxu1 %v1137_v22  ;;  %v1136_v22 = vpack.c.bf16 %v158_v17, %v154_v16  ;;  %v7410_v29 = vld [vmem:[#allocation11 + $0x3e8] ss:$16 sps:$4 sm:$0xff]   ;;  %v7496_v16 = vld [vmem:[#allocation12 + $0x1c4] ss:$16 sps:$4 sm:$0xff]  }
 0x143   :  { %2059 = vmatprep.subr.bf16.mxu1 %v7343_v30  ;;  %v7416_v30 = vld [vmem:[#allocation12 + $0x20] ss:$16 sps:$4 sm:$0xff]   ;;  %v7491_v17 = vld [vmem:[#allocation12 + $0x188] ss:$16 sps:$4 sm:$0xff]  }
 0x144   :  { %1974 = vmatpush1.bf16.msra.mxu0 %v7308_v23  ;;  %v7412_v23 = vld [vmem:[#allocation11 + $0x3ec] ss:$16 sps:$4 sm:$0xff]  }
 0x145   :  { %1975 = vmatprep.subr.bf16.mxu0 %v7316_v24  ;;  %v161_v24 = vld [vmem:[#allocation8 + $0x8] sm:$0xff] }
 0x146   :  { %2060 = vmatpush1.bf16.msra.mxu1 %v7341_v33  ;;  %v7419_v33 = vld [vmem:[#allocation12 + $0x8] ss:$16 sps:$4 sm:$0xff]  }
 0x147   :  { %2061 = vmatprep.subr.bf16.mxu1 %v7349_v34  ;;  %v7422_v34 = vld [vmem:[#allocation12 + $0x40] ss:$16 sps:$4 sm:$0xff]  }
 0x148   :  { %1976 = vmatpush1.bf16.msra.mxu0 %v7314_v27  ;;  %v7418_v27 = vld [vmem:[#allocation12 + $0x24] ss:$16 sps:$4 sm:$0xff]  }
 0x149   :  { %1977 = vmatprep.subr.bf16.mxu0 %v7322_v28  ;;  %v2101_v28 = vpack.c.bf16 %v165_v25, %v161_v24  ;;  %v164_v24 = vld [vmem:[#allocation8 + $0x20] sm:$0xff]  ;;  %v7505_v25 = vld [vmem:[#allocation12 + $0x1cc] ss:$16 sps:$4 sm:$0xff]  }
 0x14a   :  { %2062 = vmatpush1.bf16.msra.mxu1 %v7347_v37  ;;  %v7425_v37 = vld [vmem:[#allocation12 + $0x28] ss:$16 sps:$4 sm:$0xff]  }
 0x14b   :  { %2063 = vmatprep.subr.bf16.mxu1 %v7355_v38  ;;  %v7428_v38 = vld [vmem:[#allocation12 + $0x60] ss:$16 sps:$4 sm:$0xff]  }
 0x14c   :  { %1978 = vmatpush1.bf16.msra.mxu0 %v7320_v31  ;;  %v7421_v31 = vld [vmem:[#allocation12 + $0xc] ss:$16 sps:$4 sm:$0xff]  }
 0x14d   :  { %1979 = vmatprep.subr.bf16.mxu0 %v7328_v32  ;;  %v7424_v32 = vld [vmem:[#allocation12 + $0x44] ss:$16 sps:$4 sm:$0xff]  }
 0x14e   :  { %2064 = vmatpush1.bf16.msra.mxu1 %v7353_v41  ;;  %v7431_v41 = vld [vmem:[#allocation12 + $0x48] ss:$16 sps:$4 sm:$0xff]  }
 0x14f   :  { %2065 = vmatprep.subr.bf16.mxu1 %v7361_v42  ;;  %v7434_v42 = vld [vmem:[#allocation12 + $0x80] ss:$16 sps:$4 sm:$0xff]  }
 0x150   :  { %1980 = vmatpush1.bf16.msra.mxu0 %v7326_v35  ;;  %v7427_v35 = vld [vmem:[#allocation12 + $0x2c] ss:$16 sps:$4 sm:$0xff]  }
 0x151   :  { %1981 = vmatprep.subr.bf16.mxu0 %v7334_v36  ;;  %v7430_v36 = vld [vmem:[#allocation12 + $0x64] ss:$16 sps:$4 sm:$0xff]  }
 0x152   :  { %2066 = vmatpush1.bf16.msra.mxu1 %v7359_v45  ;;  %v7437_v45 = vld [vmem:[#allocation12 + $0x68] ss:$16 sps:$4 sm:$0xff]  }
 0x153   :  { %2067 = vmatprep.subr.bf16.mxu1 %v7367_v46  ;;  %v7440_v46 = vld [vmem:[#allocation12 + $0xa0] ss:$16 sps:$4 sm:$0xff]  }
 0x154   :  { %1982 = vmatpush1.bf16.msra.mxu0 %v7332_v39  ;;  %v7433_v39 = vld [vmem:[#allocation12 + $0x4c] ss:$16 sps:$4 sm:$0xff]  }
 0x155   :  { %1983 = vmatprep.subr.bf16.mxu0 %v7340_v40  ;;  %v7436_v40 = vld [vmem:[#allocation12 + $0x84] ss:$16 sps:$4 sm:$0xff]  }
 0x156   :  { %2068 = vmatpush1.bf16.msra.mxu1 %v7365_v48  ;;  %v7448_v48 = vld [vmem:[#allocation12 + $0xc4] ss:$16 sps:$4 sm:$0xff]  }
 0x157   :  { %2069 = vmatprep.subr.bf16.mxu1 %v7373_v50  ;;  %v7446_v50 = vld [vmem:[#allocation12 + $0xc0] ss:$16 sps:$4 sm:$0xff]  }
 0x158   :  { %1984 = vmatpush1.bf16.msra.mxu0 %v7338_v43  ;;  %v7439_v43 = vld [vmem:[#allocation12 + $0x6c] ss:$16 sps:$4 sm:$0xff]  }
 0x159   :  { %1985 = vmatprep.subr.bf16.mxu0 %v7346_v44  ;;  %v7442_v44 = vld [vmem:[#allocation12 + $0xa4] ss:$16 sps:$4 sm:$0xff]  }
 0x15a   :  { %2070 = vmatpush1.bf16.msra.mxu1 %v7371_v53  ;;  %v7449_v53 = vld [vmem:[#allocation12 + $0xa8] ss:$16 sps:$4 sm:$0xff]  }
 0x15b   :  { %2071 = vmatprep.subr.bf16.mxu1 %v7379_v54  ;;  %v7452_v54 = vld [vmem:[#allocation12 + $0xe0] ss:$16 sps:$4 sm:$0xff]  }
 0x15c   :  { %1986 = vmatpush1.bf16.msra.mxu0 %v7344_v47  ;;  %v7445_v47 = vld [vmem:[#allocation12 + $0x8c] ss:$16 sps:$4 sm:$0xff]  }
 0x15d   :  { %1987 = vmatprep.subr.bf16.mxu0 %v7352_v49  ;;  %v7443_v49 = vld [vmem:[#allocation12 + $0x88] ss:$16 sps:$4 sm:$0xff]  }
 0x15e   :  { %2072 = vmatpush1.bf16.msra.mxu1 %v7377_v57  ;;  %v7455_v57 = vld [vmem:[#allocation12 + $0xc8] ss:$16 sps:$4 sm:$0xff]  }
 0x15f   :  { %2073 = vmatprep.subr.bf16.mxu1 %v7385_v58  ;;  %v7458_v58 = vld [vmem:[#allocation12 + $0x100] ss:$16 sps:$4 sm:$0xff]  }
 0x160   :  { %1988 = vmatpush1.bf16.msra.mxu0 %v7350_v51  ;;  %v7451_v51 = vld [vmem:[#allocation12 + $0xac] ss:$16 sps:$4 sm:$0xff]  }
 0x161   :  { %1989 = vmatprep.subr.bf16.mxu0 %v7358_v52  ;;  %v7454_v52 = vld [vmem:[#allocation12 + $0xe4] ss:$16 sps:$4 sm:$0xff]  }
 0x162   :  { %2074 = vmatpush1.bf16.msra.mxu1 %v7383_v61  ;;  %v7461_v61 = vld [vmem:[#allocation12 + $0xe8] ss:$16 sps:$4 sm:$0xff]  }
 0x163   :  { %2075 = vmatprep.subr.bf16.mxu1 %v7391_v62  ;;  %v7464_v62 = vld [vmem:[#allocation12 + $0x120] ss:$16 sps:$4 sm:$0xff]  }
 0x164   :  { %1990 = vmatpush1.bf16.msra.mxu0 %v7356_v55  ;;  %v7457_v55 = vld [vmem:[#allocation12 + $0xcc] ss:$16 sps:$4 sm:$0xff]  }
 0x165   :  { %1991 = vmatprep.subr.bf16.mxu0 %v7364_v56  ;;  %v7460_v56 = vld [vmem:[#allocation12 + $0x104] ss:$16 sps:$4 sm:$0xff]  }
 0x166   :  { %2076 = vmatpush1.bf16.msra.mxu1 %v7389_v1  ;;  %v7467_v1 = vld [vmem:[#allocation12 + $0x108] ss:$16 sps:$4 sm:$0xff]  }
 0x167   :  { %2077 = vmatprep.subr.bf16.mxu1 %v7397_v2  ;;  %v7470_v2 = vld [vmem:[#allocation12 + $0x140] ss:$16 sps:$4 sm:$0xff]  }
 0x168   :  { %1992 = vmatpush1.bf16.msra.mxu0 %v7362_v59  ;;  %v7463_v59 = vld [vmem:[#allocation12 + $0xec] ss:$16 sps:$4 sm:$0xff]  }
 0x169   :  { %1993 = vmatprep.subr.bf16.mxu0 %v7370_v60  ;;  %v7466_v60 = vld [vmem:[#allocation12 + $0x124] ss:$16 sps:$4 sm:$0xff]  }
 0x16a   :  { %2078 = vmatpush1.bf16.msra.mxu1 %v7395_v5  ;;  %v7473_v5 = vld [vmem:[#allocation12 + $0x128] ss:$16 sps:$4 sm:$0xff]  }
 0x16b   :  { %2079 = vmatprep.subr.bf16.mxu1 %v7400_v6  ;;  %v7476_v6 = vld [vmem:[#allocation12 + $0x160] ss:$16 sps:$4 sm:$0xff]  }
 0x16c   :  { %1994 = vmatpush1.bf16.msra.mxu0 %v7368_v63  ;;  %v7469_v63 = vld [vmem:[#allocation12 + $0x10c] ss:$16 sps:$4 sm:$0xff]  }
 0x16d   :  { %1995 = vmatprep.subr.bf16.mxu0 %v7376_v0  ;;  %v7472_v0 = vld [vmem:[#allocation12 + $0x144] ss:$16 sps:$4 sm:$0xff]  }
 0x16e   :  { %2080 = vmatpush1.bf16.msra.mxu1 %v7398_v9  ;;  %v7479_v9 = vld [vmem:[#allocation12 + $0x148] ss:$16 sps:$4 sm:$0xff]  }
 0x16f   :  { %2081 = vmatprep.subr.bf16.mxu1 %v7403_v10  ;;  %v7482_v10 = vld [vmem:[#allocation12 + $0x180] ss:$16 sps:$4 sm:$0xff]  }
 0x170   :  { %1996 = vmatpush1.bf16.msra.mxu0 %v7374_v3  ;;  %v7475_v3 = vld [vmem:[#allocation12 + $0x12c] ss:$16 sps:$4 sm:$0xff]  }
 0x171   :  { %1997 = vmatprep.subr.bf16.mxu0 %v7382_v4  ;;  %v7478_v4 = vld [vmem:[#allocation12 + $0x164] ss:$16 sps:$4 sm:$0xff]  }
 0x172   :  { %2082 = vmatpush1.bf16.msra.mxu1 %v7401_v13  ;;  %v7485_v13 = vld [vmem:[#allocation12 + $0x168] ss:$16 sps:$4 sm:$0xff]  }
 0x173   :  { %2083 = vmatprep.subr.bf16.mxu1 %v7406_v14  ;;  %v7488_v14 = vld [vmem:[#allocation12 + $0x1a0] ss:$16 sps:$4 sm:$0xff]  }
 0x174   :  { %1998 = vmatpush1.bf16.msra.mxu0 %v7380_v7  ;;  %v7481_v7 = vld [vmem:[#allocation12 + $0x14c] ss:$16 sps:$4 sm:$0xff]  }
 0x175   :  { %1999 = vmatprep.subr.bf16.mxu0 %v7388_v8  ;;  %v7484_v8 = vld [vmem:[#allocation12 + $0x184] ss:$16 sps:$4 sm:$0xff]  }
 0x176   :  { %2084 = vmatpush1.bf16.msra.mxu1 %v7404_v18  ;;  %v7494_v18 = vld [vmem:[#allocation12 + $0x1c0] ss:$16 sps:$4 sm:$0xff]  }
 0x177   :  { %2085 = vmatprep.subr.bf16.mxu1 %v7409_v19  ;;  %v7499_v19 = vld [vmem:[#allocation12 + $0x1ac] ss:$16 sps:$4 sm:$0xff]  }
 0x178   :  { %2000 = vmatpush1.bf16.msra.mxu0 %v7386_v11  ;;  %v7487_v11 = vld [vmem:[#allocation12 + $0x16c] ss:$16 sps:$4 sm:$0xff]  }
 0x179   :  { %2001 = vmatprep.subr.bf16.mxu0 %v7394_v12  ;;  %v7490_v12 = vld [vmem:[#allocation12 + $0x1a4] ss:$16 sps:$4 sm:$0xff]  }
 0x17a   :  { %2086 = vmatpush1.bf16.msra.mxu1 %v7407_v21  ;;  %v7497_v21 = vld [vmem:[#allocation12 + $0x1a8] ss:$16 sps:$4 sm:$0xff]  }
 0x17b   :  { %2087 = vmatprep.subr.bf16.mxu1 %v7412_v23  ;;  %v160_v23 = vld [vmem:[#allocation8] sm:$0xff] }
 0x17c   :  { %2002 = vmatpush1.bf16.msra.mxu0 %v7392_v15  ;;  %v7493_v15 = vld [vmem:[#allocation12 + $0x18c] ss:$16 sps:$4 sm:$0xff]  }
 0x17d   :  { %2894 = vmatprep.subr.bf16.mxu0 %v7415_v20  ;;  %v7502_v20 = vld [vmem:[#allocation12 + $0x1e4] ss:$16 sps:$4 sm:$0xff]  }
 0x17e   :  { %2088 = vmatpush1.bf16.msra.mxu1 %v7410_v29  ;;  %v167_v29 = vld [vmem:[#allocation8 + $0x38] sm:$0xff] }
 0x17f   :  { %2004 = vmatmul.mubr.bf16.vlgmr.msra.gmra.mrb[4].mxu0 %v1136_v22  ;;  %2980 = vmatprep.subr.bf16.mxu1 %v7421_v31  ;;  %v7506_v31 = vld [vmem:[#allocation12 + $0x200] ss:$16 sps:$4 sm:$0xff]  }
 0x180   :  { %2895 = vmatpush1.bf16.msra.mxu0 %v7413_v26  ;;  %2926 = vmatprep.mubr.bf16.mxu0 %v2101_v28  ;;  %v7508_v26 = vld [vmem:[#allocation12 + $0x204] ss:$16 sps:$4 sm:$0xff]  }
 0x181   :  { %2896 = vmatprep.subr.bf16.mxu0 %v7418_v27  ;;  %2090 = vmatmul.mubr.bf16.vlgmr.msra.gmra.mrb[4].mxu1 %v1136_v22  ;;  %v7500_v22 = vld [vmem:[#allocation12 + $0x1e0] ss:$16 sps:$4 sm:$0xff]   ;;  %v2100_v27 = vpack.c.bf16 %v164_v24, %v160_v23  ;;  %v7559_v23 = vld [vmem:[#allocation12 + $0x2ec] ss:$16 sps:$4 sm:$0xff]   ;;  %v7562_v24 = vld [vmem:[#allocation12 + $0x324] ss:$16 sps:$4 sm:$0xff]  }
 0x182   :  { %2981 = vmatpush1.bf16.msra.mxu1 %v7419_v33  ;;  %3012 = vmatprep.mubr.bf16.mxu1 %v2101_v28  ;;  %v163_v28 = vld [vmem:[#allocation8 + $0x18] sm:$0xff]  ;;  %v7514_v33 = vld [vmem:[#allocation12 + $0x224] ss:$16 sps:$4 sm:$0xff]  }
 0x183   :  { %2982 = vmatprep.subr.bf16.mxu1 %v7427_v35  ;;  %v7509_v35 = vld [vmem:[#allocation12 + $0x1e8] ss:$16 sps:$4 sm:$0xff]  }
 0x184   :  { %2897 = vmatpush1.bf16.msra.mxu0 %v7416_v30  ;;  %v7503_v30 = vld [vmem:[#allocation12 + $0x1c8] ss:$16 sps:$4 sm:$0xff]  }
 0x185   :  { %2898 = vmatprep.subr.bf16.mxu0 %v7424_v32  ;;  %v7511_v32 = vld [vmem:[#allocation12 + $0x1ec] ss:$16 sps:$4 sm:$0xff]  }
 0x186   :  { %2983 = vmatpush1.bf16.msra.mxu1 %v7425_v37  ;;  %v7517_v37 = vld [vmem:[#allocation12 + $0x20c] ss:$16 sps:$4 sm:$0xff]  }
 0x187   :  { %2984 = vmatprep.subr.bf16.mxu1 %v7433_v39  ;;  %v302_v39 = vlaneseq }
 0x188   :  { %2899 = vmatpush1.bf16.msra.mxu0 %v7422_v34  ;;  %v2103_v34 = vpack.c.bf16 %v167_v29, %v163_v28  ;;  %v7565_v28 = vld [vmem:[#allocation12 + $0x30c] ss:$16 sps:$4 sm:$0xff]   ;;  %v7568_v29 = vld [vmem:[#allocation12 + $0x344] ss:$16 sps:$4 sm:$0xff]  }
 0x189   :  { %2900 = vmatprep.subr.bf16.mxu0 %v7430_v36  ;;  %v7512_v36 = vld [vmem:[#allocation12 + $0x220] ss:$16 sps:$4 sm:$0xff]  }
 0x18a   :  { %2985 = vmatpush1.bf16.msra.mxu1 %v7431_v41  ;;  %v7518_v41 = vld [vmem:[#allocation12 + $0x240] ss:$16 sps:$4 sm:$0xff]  }
 0x18b   :  { %2986 = vmatprep.subr.bf16.mxu1 %v7439_v43  ;;  %v7526_v43 = vld [vmem:[#allocation12 + $0x264] ss:$16 sps:$4 sm:$0xff]  }
 0x18c   :  { %2901 = vmatpush1.bf16.msra.mxu0 %v7428_v38  ;;  %v7520_v38 = vld [vmem:[#allocation12 + $0x244] ss:$16 sps:$4 sm:$0xff]  }
 0x18d   :  { %2902 = vmatprep.subr.bf16.mxu0 %v7436_v40  ;;  %v7515_v40 = vld [vmem:[#allocation12 + $0x208] ss:$16 sps:$4 sm:$0xff]  }
 0x18e   :  { %2987 = vmatpush1.bf16.msra.mxu1 %v7437_v45  ;;  %v7521_v45 = vld [vmem:[#allocation12 + $0x228] ss:$16 sps:$4 sm:$0xff]  }
 0x18f   :  { %2988 = vmatprep.subr.bf16.mxu1 %v7445_v47  ;;  %v7529_v47 = vld [vmem:[#allocation12 + $0x24c] ss:$16 sps:$4 sm:$0xff]  }
 0x190   :  { %2903 = vmatpush1.bf16.msra.mxu0 %v7434_v42  ;;  %v7523_v42 = vld [vmem:[#allocation12 + $0x22c] ss:$16 sps:$4 sm:$0xff]  }
 0x191   :  { %2904 = vmatprep.subr.bf16.mxu0 %v7442_v44  ;;  %v8306_v44 = vshrl.u32 %v302_v39, 7  ;;  %v7578_v39 = vld [vmem:[#allocation12 + $0x380] ss:$16 sps:$4 sm:$0xff]  }
 0x192   :  { %2989 = vmatpush1.bf16.msra.mxu1 %v7443_v49 }
 0x193   :  { %2990 = vmatprep.subr.bf16.mxu1 %v7451_v51  ;;  %v8309_v49 = vsub.s32 1, %v8306_v44  ;;  %v7530_v51 = vld [vmem:[#allocation12 + $0x280] ss:$16 sps:$4 sm:$0xff]  }
 0x194   :  { %2905 = vmatpush1.bf16.msra.mxu0 %v7440_v46  ;;  %v7524_v46 = vld [vmem:[#allocation12 + $0x260] ss:$16 sps:$4 sm:$0xff]  }
 0x195   :  { %2906 = vmatprep.subr.bf16.mxu0 %v7448_v48  ;;  %v7532_v48 = vld [vmem:[#allocation12 + $0x284] ss:$16 sps:$4 sm:$0xff]  }
 0x196   :  { %2991 = vmatpush1.bf16.msra.mxu1 %v7449_v53  ;;  %v7535_v53 = vld [vmem:[#allocation12 + $0x26c] ss:$16 sps:$4 sm:$0xff]  }
 0x197   :  { %2992 = vmatprep.subr.bf16.mxu1 %v7457_v55 }
 0x198   :  { %2907 = vmatpush1.bf16.msra.mxu0 %v7446_v50  ;;  %v7527_v50 = vld [vmem:[#allocation12 + $0x248] ss:$16 sps:$4 sm:$0xff]  }
 0x199   :  { %2908 = vmatprep.subr.bf16.mxu0 %v7454_v52  ;;  %v8314_v52 = vld [vmem:[%s8935_s4] sm:$0xf] }
 0x19a   :  { %2993 = vmatpush1.bf16.msra.mxu1 %v7455_v57  ;;  %v309_v55 = vrot.slane %v8314_v52, %v8309_v49  ;;  %v7536_v57 = vld [vmem:[#allocation12 + $0x2a0] ss:$16 sps:$4 sm:$0xff]  }
 0x19b   :  { %2994 = vmatprep.subr.bf16.mxu1 %v7463_v59  ;;  %v7544_v59 = vld [vmem:[#allocation12 + $0x2c4] ss:$16 sps:$4 sm:$0xff]  }
 0x19c   :  { %2909 = vmatpush1.bf16.msra.mxu0 %v7452_v54  ;;  %v7538_v54 = vld [vmem:[#allocation12 + $0x2a4] ss:$16 sps:$4 sm:$0xff]  }
 0x19d   :  { %2910 = vmatprep.subr.bf16.mxu0 %v7460_v56  ;;  %v7533_v56 = vld [vmem:[#allocation12 + $0x268] ss:$16 sps:$4 sm:$0xff]  }
 0x19e   :  { %2995 = vmatpush1.bf16.msra.mxu1 %v7461_v61 }
 0x19f   :  { %2996 = vmatprep.subr.bf16.mxu1 %v7469_v63 }
 0x1a0   :  { %2911 = vmatpush1.bf16.msra.mxu0 %v7458_v58  ;;  %v7541_v58 = vld [vmem:[#allocation12 + $0x28c] ss:$16 sps:$4 sm:$0xff]  }
 0x1a1   :  { %2912 = vmatprep.subr.bf16.mxu0 %v7466_v60 }
 0x1a2   :  { %2997 = vmatpush1.bf16.msra.mxu1 %v7467_v1  ;;  %v7539_v1 = vld [vmem:[#allocation12 + $0x288] ss:$16 sps:$4 sm:$0xff]  }
 0x1a3   :  { %2998 = vmatprep.subr.bf16.mxu1 %v7475_v3  ;;  %v7542_v3 = vld [vmem:[#allocation12 + $0x2c0] ss:$16 sps:$4 sm:$0xff]  }
 0x1a4   :  { %2913 = vmatpush1.bf16.msra.mxu0 %v7464_v62  ;;  %v8321_v62 = vsub.s32 2, %v8306_v44 }
 0x1a5   :  { %2914 = vmatprep.subr.bf16.mxu0 %v7472_v0 }
 0x1a6   :  { %2999 = vmatpush1.bf16.msra.mxu1 %v7473_v5  ;;  %v7547_v5 = vld [vmem:[#allocation12 + $0x2ac] ss:$16 sps:$4 sm:$0xff]  }
 0x1a7   :  { %3000 = vmatprep.subr.bf16.mxu1 %v7481_v7 }
 0x1a8   :  { %2915 = vmatpush1.bf16.msra.mxu0 %v7470_v2  ;;  %v8328_v2 = vsub.s32 3, %v8306_v44 }
 0x1a9   :  { %2916 = vmatprep.subr.bf16.mxu0 %v7478_v4 }
 0x1aa   :  { %3001 = vmatpush1.bf16.msra.mxu1 %v7479_v9  ;;  %v317_v9 = vrot.slane %v8314_v52, %v8328_v2 }
 0x1ab   :  { %3002 = vmatprep.subr.bf16.mxu1 %v7487_v11  ;;  %v7548_v11 = vld [vmem:[#allocation12 + $0x2e0] ss:$16 sps:$4 sm:$0xff]  }
 0x1ac   :  { %2917 = vmatpush1.bf16.msra.mxu0 %v7476_v6  ;;  %v7550_v6 = vld [vmem:[#allocation12 + $0x2e4] ss:$16 sps:$4 sm:$0xff]  }
 0x1ad   :  { %2918 = vmatprep.subr.bf16.mxu0 %v7484_v8  ;;  %v313_v8 = vrot.slane %v8314_v52, %v8321_v62 }
 0x1ae   :  { %3003 = vmatpush1.bf16.msra.mxu1 %v7485_v13  ;;  %v7556_v13 = vld [vmem:[#allocation12 + $0x304] ss:$16 sps:$4 sm:$0xff]  }
 0x1af   :  { %3004 = vmatprep.subr.bf16.mxu1 %v7493_v15 }
 0x1b0   :  { %2919 = vmatpush1.bf16.msra.mxu0 %v7482_v10  ;;  %v7545_v10 = vld [vmem:[#allocation12 + $0x2a8] ss:$16 sps:$4 sm:$0xff]  }
 0x1b1   :  { %2920 = vmatprep.subr.bf16.mxu0 %v7490_v12  ;;  %v7553_v12 = vld [vmem:[#allocation12 + $0x2cc] ss:$16 sps:$4 sm:$0xff]  }
 0x1b2   :  { %3005 = vmatpush1.bf16.msra.mxu1 %v7491_v17 }
 0x1b3   :  { %3006 = vmatprep.subr.bf16.mxu1 %v7499_v19  ;;  %v7551_v19 = vld [vmem:[#allocation12 + $0x2c8] ss:$16 sps:$4 sm:$0xff]  }
 0x1b4   :  { %2921 = vmatpush1.bf16.msra.mxu0 %v7488_v14 }
 0x1b5   :  { %2922 = vmatprep.subr.bf16.mxu0 %v7496_v16 }
 0x1b6   :  { %3007 = vmatpush1.bf16.msra.mxu1 %v7497_v21 }
 0x1b7   :  { %3008 = vmatprep.subr.bf16.mxu1 %v7505_v25 }
 0x1b8   :  { %2923 = vmatpush1.bf16.msra.mxu0 %v7494_v18 }
 0x1b9   :  { %2924 = vmatprep.subr.bf16.mxu0 %v7502_v20  ;;  %v7554_v20 = vld [vmem:[#allocation12 + $0x300] ss:$16 sps:$4 sm:$0xff]  }
 0x1ba   :  { %3009 = vmatpush1.bf16.msra.mxu1 %v7503_v30  ;;  %v7563_v30 = vld [vmem:[#allocation12 + $0x308] ss:$16 sps:$4 sm:$0xff]  }
 0x1bb   :  { %3010 = vmatprep.subr.bf16.mxu1 %v7511_v32  ;;  %v7571_v32 = vld [vmem:[#allocation12 + $0x32c] ss:$16 sps:$4 sm:$0xff]  }
 0x1bc   :  { %2925 = vmatpush1.bf16.msra.mxu0 %v7500_v22 }
 0x1bd   :  { %2937 = vmatprep.subr.bf16.mxu0 %v7508_v26  ;;  %v7557_v26 = vld [vmem:[#allocation12 + $0x2e8] ss:$16 sps:$4 sm:$0xff]  }
 0x1be   :  { %3011 = vmatpush1.bf16.msra.mxu1 %v7509_v35  ;;  %v7572_v35 = vld [vmem:[#allocation12 + $0x360] ss:$16 sps:$4 sm:$0xff]  }
 0x1bf   :  { %2927 = vmatmul.mubr.bf16.vlgmr.msra.gmra.mrb[8].mxu0 %v2100_v27  ;;  %3023 = vmatprep.subr.bf16.mxu1 %v7517_v37  ;;  %v7580_v37 = vld [vmem:[#allocation12 + $0x384] ss:$16 sps:$4 sm:$0xff]  }
 0x1c0   :  { %2938 = vmatpush1.bf16.msra.mxu0 %v7506_v31  ;;  %2969 = vmatprep.mubr.bf16.mxu0 %v2103_v34  ;;  %v7566_v31 = vld [vmem:[#allocation12 + $0x340] ss:$16 sps:$4 sm:$0xff]  }
 0x1c1   :  { %2939 = vmatprep.subr.bf16.mxu0 %v7514_v33  ;;  %3013 = vmatmul.mubr.bf16.vlgmr.msra.gmra.mrb[8].mxu1 %v2100_v27  ;;  %v7560_v27 = vld [vmem:[#allocation12 + $0x320] ss:$16 sps:$4 sm:$0xff]   ;;  %v7574_v33 = vld [vmem:[#allocation12 + $0x364] ss:$16 sps:$4 sm:$0xff]  }
 0x1c2   :  { %3024 = vmatpush1.bf16.msra.mxu1 %v7515_v40  ;;  %3055 = vmatprep.mubr.bf16.mxu1 %v2103_v34  ;;  %v7569_v34 = vld [vmem:[#allocation12 + $0x328] ss:$16 sps:$4 sm:$0xff]   ;;  %v7583_v40 = vld [vmem:[#allocation12 + $0x36c] ss:$16 sps:$4 sm:$0xff]  }
 0x1c3   :  { %3025 = vmatprep.subr.bf16.mxu1 %v7523_v42  ;;  %v7581_v42 = vld [vmem:[#allocation12 + $0x368] ss:$16 sps:$4 sm:$0xff]  }
 0x1c4   :  { %2940 = vmatpush1.bf16.msra.mxu0 %v7512_v36  ;;  %v7577_v36 = vld [vmem:[#allocation12 + $0x34c] ss:$16 sps:$4 sm:$0xff]  }
 0x1c5   :  { %2941 = vmatprep.subr.bf16.mxu0 %v7520_v38  ;;  %v7575_v38 = vld [vmem:[#allocation12 + $0x348] ss:$16 sps:$4 sm:$0xff]  }
 0x1c6   :  { %3026 = vmatpush1.bf16.msra.mxu1 %v7521_v45  ;;  %v7589_v45 = vld [vmem:[#allocation12 + $0x38c] ss:$16 sps:$4 sm:$0xff]  }
 0x1c7   :  { %3027 = vmatprep.subr.bf16.mxu1 %v7529_v47  ;;  %v7587_v47 = vld [vmem:[#allocation12 + $0x388] ss:$16 sps:$4 sm:$0xff]  }
 0x1c8   :  { %2942 = vmatpush1.bf16.msra.mxu0 %v7518_v41  ;;  %v7586_v41 = vld [vmem:[#allocation12 + $0x3a4] ss:$16 sps:$4 sm:$0xff]  }
 0x1c9   :  { %2943 = vmatprep.subr.bf16.mxu0 %v7526_v43  ;;  %v7584_v43 = vld [vmem:[#allocation12 + $0x3a0] ss:$16 sps:$4 sm:$0xff]  }
 0x1ca   :  { %3028 = vmatpush1.bf16.msra.mxu1 %v7527_v50  ;;  %v7595_v50 = vld [vmem:[#allocation12 + $0x3ac] ss:$16 sps:$4 sm:$0xff]  }
 0x1cb   :  { %3029 = vmatprep.subr.bf16.mxu1 %v7535_v53  ;;  %v7593_v53 = vld [vmem:[#allocation12 + $0x3a8] ss:$16 sps:$4 sm:$0xff]  }
 0x1cc   :  { %2944 = vmatpush1.bf16.msra.mxu0 %v7524_v46  ;;  %v7592_v46 = vld [vmem:[#allocation12 + $0x3c4] ss:$16 sps:$4 sm:$0xff]  }
 0x1cd   :  { %2945 = vmatprep.subr.bf16.mxu0 %v7532_v48  ;;  %v7590_v48 = vld [vmem:[#allocation12 + $0x3c0] ss:$16 sps:$4 sm:$0xff]  }
 0x1ce   :  { %3030 = vmatpush1.bf16.msra.mxu1 %v7533_v56  ;;  %v166_v56 = vld [vmem:[#allocation8 + $0x30] sm:$0xff] }
 0x1cf   :  { %3031 = vmatprep.subr.bf16.mxu1 %v7541_v58 }
 0x1d0   :  { %2946 = vmatpush1.bf16.msra.mxu0 %v7530_v51  ;;  %v7598_v51 = vld [vmem:[#allocation12 + $0x3e4] ss:$16 sps:$4 sm:$0xff]  }
 0x1d1   :  { %2947 = vmatprep.subr.bf16.mxu0 %v7538_v54  ;;  %v7596_v54 = vld [vmem:[#allocation12 + $0x3e0] ss:$16 sps:$4 sm:$0xff]  }
 0x1d2   :  { %v8318_v60 = vpop.f32.mrb[0].mxu0  ;;  %3032 = vmatpush1.bf16.msra.mxu1 %v7539_v1  ;;  %v8094_v1 = vmov 0.0  }
 0x1d3   :  { %v1041_v61 = vpop.f32.mrb[1].mxu0  ;;  %3033 = vmatprep.subr.bf16.mxu1 %v7547_v5  ;;  %v8356_v5 = vsub.s32 0, %v8306_v44 }
 0x1d4   :  { %v8323_v63 = vadd.f32 %v1041_v61, %v309_v55  ;;  %v8325_v0 = vpop.f32.mrb[2].mxu0  ;;  %2948 = vmatpush1.bf16.msra.mxu0 %v7536_v57  ;;  %v1125_v14 = vpop.f32.mrb[0].mxu1  ;;  %v7601_v57 = vld [vmem:[#allocation12 + $0x3cc] ss:$16 sps:$4 sm:$0xff]  }
 0x1d5   :  { %v1045_v4 = vpop.f32.mrb[3].mxu0  ;;  %2949 = vmatprep.subr.bf16.mxu0 %v7544_v59  ;;  %v8336_v15 = vadd.f32 %v1125_v14, %v313_v8  ;;  %v1127_v16 = vpop.f32.mrb[1].mxu1  ;;  %v7599_v59 = vld [vmem:[#allocation12 + $0x3c8] ss:$16 sps:$4 sm:$0xff]   ;;  %v7604_v61 = vld [vmem:[#allocation12 + $0x3ec] ss:$16 sps:$4 sm:$0xff]  }
 0x1d6   :  { %v8330_v7 = vadd.f32 %v1045_v4, %v309_v55  ;;  %v8338_v17 = vadd.f32 %v1127_v16, %v317_v9  ;;  %v1129_v18 = vpop.f32.mrb[2].mxu1  ;;  %3034 = vmatpush1.bf16.msra.mxu1 %v7545_v10  ;;  %v162_v55 = vld [vmem:[#allocation8 + $0x10] sm:$0xff]  ;;  %v8353_v4 = vld [vmem:[%s8937_s6] sm:$0xf]  ;;  %s8096_s6 = smov 64  }
 0x1d7   :  { %v8340_v21 = vadd.f32 %v1129_v18, %v313_v8  ;;  %v1131_v22 = vpop.f32.mrb[3].mxu1  ;;  %3035 = vmatprep.subr.bf16.mxu1 %v7553_v12  ;;  %v2102_v58 = vpack.c.bf16 %v166_v56, %v162_v55  ;;  %v305_v12 = vrot.slane %v8314_v52, %v8356_v5 }
 0x1d8   :  { %2950 = vmatpush1.bf16.msra.mxu0 %v7542_v3  ;;  %v8342_v25 = vadd.f32 %v1131_v22, %v317_v9  ;;  %v7602_v3 = vld [vmem:[#allocation12 + $0x3e8] ss:$16 sps:$4 sm:$0xff]  }
 0x1d9   :  { %2951 = vmatprep.subr.bf16.mxu0 %v7550_v6  ;;  %v1271_v6 = vrot.slane %v8353_v4, %v8356_v5  ;;  %v6945_v22 = vadd.f32 %v8325_v0, %v305_v12  ;;  %v2232_v0 = vld [vmem:[%s8939_s8] sm:$0xf] }
 0x1da   :  { %3036 = vmatpush1.bf16.msra.mxu1 %v7551_v19  ;;  %v6943_v19 = vadd.f32 %v8318_v60, %v305_v12 }
 0x1db   :  { %3037 = vmatprep.subr.bf16.mxu1 %v7559_v23 }
 0x1dc   :  { %2952 = vmatpush1.bf16.msra.mxu0 %v7548_v11 }
 0x1dd   :  { %2953 = vmatprep.subr.bf16.mxu0 %v7556_v13 }
 0x1de   :  { %3038 = vmatpush1.bf16.msra.mxu1 %v7557_v26  ;;  %v8382_v26 = vpack.c.bf16 %v6943_v19, %v6943_v19 }
 0x1df   :  { %3039 = vmatprep.subr.bf16.mxu1 %v7565_v28  ;;  %v2237_v28 = vrot.slane %v2232_v0, %v8356_v5 }
 0x1e0   :  { %2954 = vmatpush1.bf16.msra.mxu0 %v7554_v20 }
 0x1e1   :  { %2955 = vmatprep.subr.bf16.mxu0 %v7562_v24 }
 0x1e2   :  { %3040 = vmatpush1.bf16.msra.mxu1 %v7563_v30 }
 0x1e3   :  { %3041 = vmatprep.subr.bf16.mxu1 %v7571_v32 }
 0x1e4   :  { %2956 = vmatpush1.bf16.msra.mxu0 %v7560_v27  ;;  %v8386_v27 = vpack.c.bf16 %v6945_v22, %v6945_v22 }
 0x1e5   :  { %2957 = vmatprep.subr.bf16.mxu0 %v7568_v29  ;;  %v2241_v29 = vrot.slane %v2232_v0, %v8309_v49 }
 0x1e6   :  { %3042 = vmatpush1.bf16.msra.mxu1 %v7569_v34 }
 0x1e7   :  { %3043 = vmatprep.subr.bf16.mxu1 %v7577_v36 }
 0x1e8   :  { %2958 = vmatpush1.bf16.msra.mxu0 %v7566_v31 }
 0x1e9   :  { %2959 = vmatprep.subr.bf16.mxu0 %v7574_v33 }
 0x1ea   :  { %3044 = vmatpush1.bf16.msra.mxu1 %v7575_v38 }
 0x1eb   :  { %3045 = vmatprep.subr.bf16.mxu1 %v7583_v40 }
 0x1ec   :  { %2960 = vmatpush1.bf16.msra.mxu0 %v7572_v35 }
 0x1ed   :  { %2961 = vmatprep.subr.bf16.mxu0 %v7580_v37 }
 0x1ee   :  { %3046 = vmatpush1.bf16.msra.mxu1 %v7581_v42  ;;  %v2249_v42 = vrot.slane %v2232_v0, %v8328_v2 }
 0x1ef   :  { %3047 = vmatprep.subr.bf16.mxu1 %v7589_v45 }
 0x1f0   :  { %2962 = vmatpush1.bf16.msra.mxu0 %v7578_v39 }
 0x1f1   :  { %2963 = vmatprep.subr.bf16.mxu0 %v7586_v41  ;;  %v2245_v41 = vrot.slane %v2232_v0, %v8321_v62 }
 0x1f2   :  { %3048 = vmatpush1.bf16.msra.mxu1 %v7587_v47 }
 0x1f3   :  { %3049 = vmatprep.subr.bf16.mxu1 %v7595_v50 }
 0x1f4   :  { %2964 = vmatpush1.bf16.msra.mxu0 %v7584_v43 }
 0x1f5   :  { %2965 = vmatprep.subr.bf16.mxu0 %v7592_v46 }
 0x1f6   :  { %3050 = vmatpush1.bf16.msra.mxu1 %v7593_v53 }
 0x1f7   :  { %3051 = vmatprep.subr.bf16.mxu1 %v7601_v57 }
 0x1f8   :  { %2966 = vmatpush1.bf16.msra.mxu0 %v7590_v48 }
 0x1f9   :  { %2967 = vmatprep.subr.bf16.mxu0 %v7598_v51 }
 0x1fa   :  { %3052 = vmatpush1.bf16.msra.mxu1 %v7599_v59 }
 0x1fb   :  { %3053 = vmatprep.subr.bf16.mxu1 %v7604_v61 }
 0x1fc   :  { %2968 = vmatpush1.bf16.msra.mxu0 %v7596_v54 }
 0x1fd   :  { %6751 = vmatprep.subr.bf16.mxu0 %v8094_v1 }
 0x1fe   :  { %3054 = vmatpush1.bf16.msra.mxu1 %v7602_v3 }
 0x1ff   :  { %2970 = vmatmul.mubr.bf16.vlgmr.msra.gmra.mrb[8].mxu0 %v2102_v58  ;;  %6757 = vmatprep.subr.bf16.mxu1 %v8094_v1 }
 0x200   :  { %6753 = vmatprep.mubr.msk.bf16.mxu0 %vm8095_vm0, %v8094_v1 }
 0x201   :  { %3056 = vmatmul.mubr.bf16.vlgmr.msra.gmra.mrb[8].mxu1 %v2102_v58 }
 0x202   :  { %6759 = vmatprep.mubr.msk.bf16.mxu1 %vm8095_vm0, %v8094_v1 }
 0x252   :  { %v2005_v8 = vpop.f32.mrb[4].mxu0 }
 0x253   :  { %v6951_v9 = vadd.f32 %v2005_v8, %v1271_v6  ;;  %v8360_v10 = vpop.f32.mrb[5].mxu0 }
 0x254   :  { %v2009_v11 = vpop.f32.mrb[6].mxu0  ;;  %v8374_v52 = vpop.f32.mrb[4].mxu1 }
 0x255   :  { %v8364_v13 = vpack.c.bf16 %v6951_v9, %v6951_v9  ;;  %v6953_v14 = vadd.f32 %v2009_v11, %v1271_v6  ;;  %v8366_v16 = vpop.f32.mrb[7].mxu0  ;;  %v8377_v23 = vpop.f32.mrb[5].mxu1 }
 0x256   :  { %v8380_v24 = vpop.f32.mrb[6].mxu1 }
 0x257   :  { %v3089_v44 = vsel %vm3084_vm1, %v8364_v13, 0  ;;  %v6666_v18 = vpack.c.bf16 %v6953_v14, %v6953_v14  ;;  %v8384_v60 = vpop.f32.mrb[7].mxu1 }
 0x258   :  { %6752 = vmatpush3.bf16.xpose.msra.mxu0 %v3089_v44 }
 0x259   :  { %v3135_v20 = vsel %vm3084_vm1, %v6666_v18, 0  ;;  %3349 = vrot.lane.b32.xlu1 %v6666_v18, %s8096_s6  ;;  %6763 = vmatprep.subr.bf16.mxu0 %v8094_v1 }
 0x25a   :  { %6758 = vmatpush3.bf16.xpose.msra.mxu1 %v3135_v20 }
 0x25b   :  { %6769 = vmatprep.subr.bf16.mxu1 %v8094_v1 }
 0x25f   :  { %6754 = vmatmul.mubr.msk.bf16.vlgmr.msra.gmra.mrb[12].mxu0 %vm3084_vm1, %v8382_v26 }
 0x260   :  { %6765 = vmatprep.mubr.msk.bf16.mxu0 %vm8095_vm0, %v8094_v1 }
 0x261   :  { %6760 = vmatmul.mubr.msk.bf16.vlgmr.msra.gmra.mrb[12].mxu1 %vm3084_vm1, %v8386_v27 }
 0x262   :  { %6771 = vmatprep.mubr.msk.bf16.mxu1 %vm8095_vm0, %v8094_v1 }
 0x2d2   :  { %v2971_v30 = vpop.f32.mrb[8].mxu0 }
 0x2d3   :  { %v6959_v31 = vadd.f32 %v2971_v30, %v2237_v28  ;;  %v2973_v32 = vpop.f32.mrb[9].mxu0 }
 0x2d4   :  { %v8401_v33 = vadd.f32 %v2973_v32, %v2241_v29  ;;  %v2975_v34 = vpop.f32.mrb[10].mxu0  ;;  %v3057_v45 = vpop.f32.mrb[8].mxu1 }
 0x2d5   :  { %v8403_v35 = vpack.c.bf16 %v6959_v31, %v6959_v31  ;;  %v6961_v36 = vadd.f32 %v2975_v34, %v2237_v28  ;;  %v2977_v37 = vpop.f32.mrb[11].mxu0  ;;  %v8416_v46 = vadd.f32 %v3057_v45, %v2245_v41  ;;  %v3059_v47 = vpop.f32.mrb[9].mxu1 }
 0x2d6   :  { %v8405_v38 = vadd.f32 %v2977_v37, %v2241_v29  ;;  %v8419_v48 = vadd.f32 %v3059_v47, %v2249_v42  ;;  %v3061_v50 = vpop.f32.mrb[10].mxu1 }
 0x2d7   :  { %v3207_v39 = vsel %vm3205_vm2, %v8403_v35, 0  ;;  %v8409_v40 = vpack.c.bf16 %v6961_v36, %v6961_v36  ;;  %v8421_v51 = vadd.f32 %v3061_v50, %v2245_v41  ;;  %v3063_v53 = vpop.f32.mrb[11].mxu1 }
 0x2d8   :  { %6764 = vmatpush3.bf16.msra.mxu0 %v3207_v39  ;;  %v8423_v54 = vadd.f32 %v3063_v53, %v2249_v42 }
 0x2d9   :  { %v3253_v43 = vsel %vm3205_vm2, %v8409_v40, 0  ;;  %6775 = vmatprep.subr.bf16.mxu0 %v8094_v1 }
 0x2da   :  { %6770 = vmatpush3.bf16.msra.mxu1 %v3253_v43 }
 0x2db   :  { %6781 = vmatprep.subr.bf16.mxu1 %v8094_v1 }
 0x332   :  { %v3125_v55 = vpop.f32.mrb[12].mxu0 }
 0x333   :  { %v6755_v56 = vpop.f32.mrb[13].mxu0  ;;  %v3178_v57 = vsel %vm3177_vm3, %v3125_v55, -inf }
 0x334   :  { %v3171_v58 = vpop.f32.mrb[12].mxu1  ;;  %3179 = vmax.xlane.f32.xlu0 %v3178_v57  ;;  %v3128_v59 = vpop.f32.mrb[14].mxu0 }
 0x335   :  { %v6756_v61 = vpop.f32.mrb[15].mxu0  ;;  %v6761_v3 = vpop.f32.mrb[13].mxu1  ;;  %v3181_v9 = vsel %vm3177_vm3, %v3171_v58, -inf }
 0x336   :  { %v3174_v6 = vpop.f32.mrb[14].mxu1 }
 0x337   :  { %v6762_v8 = vpop.f32.mrb[15].mxu1 }
 0x338   :  { %3182 = vmax.xlane.f32.xlu0 %v3181_v9 }
 0x34e   :  { %3299 = vrot.lane.b32.xlu0 %v8364_v13, %s8096_s6  ;;  %v3350_v13 = vpop.permute.xlu1 %3349 }
 0x3c1   :  { %v3180_v11 = vpop.xlane.xlu0 %3179 }
 0x3c2   :  { %v3184_v12 = vsub.f32 %v3125_v55, %v3180_v11 }
 0x3c4   :  { %v3186_v14 = vmul.f32 1.442695, %v3184_v12 }
 0x3c5   :  { %v3183_v44 = vpop.xlane.xlu0 %3182 }
 0x3c6   :  { %7797 = vpow2.f32 %v3186_v14  ;;  %v3185_v18 = vsub.f32 %v3171_v58, %v3183_v44 }
 0x3c8   :  { %v3188_v19 = vmul.f32 1.442695, %v3185_v18 }
 0x3c9   :  { %v3300_v34 = vpop.permute.xlu0 %3299 }
 0x3ca   :  { %7799 = vpow2.f32 %v3188_v19  ;;  %v3305_v39 = vsel %vm3084_vm1, %v3300_v34, 0 }
 0x3d0   :  { %v7798_v20 = vpop.eup %7797 }
 0x3d1   :  { %v3190_v22 = vsel %vm3177_vm3, %v7798_v20, 0.0 }
 0x3d2   :  { %3191 = vadd.xlane.f32.xlu1 %v3190_v22 }
 0x3d4   :  { %v7800_v0 = vpop.eup %7799 }
 0x3d5   :  { %v3193_v28 = vsel %vm3177_vm3, %v7800_v0, 0.0 }
 0x3d6   :  { %3194 = vadd.xlane.f32.xlu1 %v3193_v28 }
 0x3e7   :  { %3297 = vrot.lane.b32.xlu1 %v8382_v26, %s8096_s6 }
 0x3eb   :  { %3347 = vrot.lane.b32.xlu1 %v8386_v27, %s8096_s6  ;;  %v3355_v27 = vsel %vm3084_vm1, %v3350_v13, 0 }
 0x45f   :  { %v3192_v29 = vpop.xlane.xlu1 %3191 }
 0x460   :  { %7801 = vrcp.f32 %v3192_v29 }
 0x463   :  { %v3195_v30 = vpop.xlane.xlu1 %3194 }
 0x464   :  { %7803 = vrcp.f32 %v3195_v30 }
 0x467   :  { %v3298_v42 = vpop.permute.xlu1 %3297 }
 0x46a   :  { %v7802_v31 = vpop.eup %7801 }
 0x46b   :  { %v8435_v32 = vmul.f32 %v7802_v31, %v7798_v20  ;;  %v3348_v43 = vpop.permute.xlu1 %3347 }
 0x46d   :  { %v3200_v36 = vpack.c.bf16 %v8435_v32, %v8435_v32 }
 0x46e   :  { %v7804_v37 = vpop.eup %7803 }
 0x46f   :  { %v8440_v41 = vmul.f32 %v7804_v37, %v7800_v0  ;;  %6766 = vmatmul.mubr.msk.bf16.vlgmr.msra.gmra.mrb[16].mxu0 %vm3177_vm3, %v3200_v36 }
 0x470   :  { %6776 = vmatpush3.bf16.xpose.msra.mxu0 %v3305_v39  ;;  %6777 = vmatprep.mubr.msk.bf16.mxu0 %vm8095_vm0, %v8094_v1 }
 0x471   :  { %v3201_v26 = vpack.c.bf16 %v8440_v41, %v8440_v41  ;;  %6787 = vmatprep.subr.bf16.mxu0 %v8094_v1 }
 0x473   :  { %6772 = vmatmul.mubr.msk.bf16.vlgmr.msra.gmra.mrb[16].mxu1 %vm3177_vm3, %v3201_v26  ;;  %v1275_v26 = vrot.slane %v8353_v4, %v8309_v49 }
 0x474   :  { %6782 = vmatpush3.bf16.xpose.msra.mxu1 %v3355_v27  ;;  %6783 = vmatprep.mubr.msk.bf16.mxu1 %vm8095_vm0, %v8094_v1 }
 0x475   :  { %6793 = vmatprep.subr.bf16.mxu1 %v8094_v1 }
 0x477   :  { %6778 = vmatmul.mubr.msk.bf16.vlgmr.msra.gmra.mrb[20].mxu0 %vm3084_vm1, %v3298_v42 }
 0x478   :  { %6789 = vmatprep.mubr.msk.bf16.mxu0 %vm8095_vm0, %v8094_v1 }
 0x47b   :  { %6784 = vmatmul.mubr.msk.bf16.vlgmr.msra.gmra.mrb[20].mxu1 %vm3084_vm1, %v3348_v43  ;;  %v6952_v43 = vadd.f32 %v8360_v10, %v1275_v26 }
 0x47c   :  { %6795 = vmatprep.mubr.msk.bf16.mxu1 %vm8095_vm0, %v8094_v1 }
 0x542   :  { %v3243_v45 = vpop.f32.mrb[16].mxu0 }
 0x543   :  { %v6767_v47 = vpop.f32.mrb[17].mxu0 }
 0x544   :  { %v3246_v50 = vpop.f32.mrb[18].mxu0  ;;  %v6954_v47 = vadd.f32 %v8366_v16, %v1275_v26 }
 0x545   :  { %v6768_v53 = vpop.f32.mrb[19].mxu0 }
 0x546   :  { %v3289_v55 = vpop.f32.mrb[16].mxu1 }
 0x547   :  { %v3295_v56 = vpack.c.bf16 %v3289_v55, %v3243_v45  ;;  %v6773_v57 = vpop.f32.mrb[17].mxu1 }
 0x548   :  { %v3292_v58 = vpop.f32.mrb[18].mxu1 }
 0x549   :  { %3296 = vst.msk [vmem:[#allocation2] sm:$0xff] %vm3084_vm1, %v3295_v56  ;;  %v6774_v59 = vpop.f32.mrb[19].mxu1  ;;  %v6672_v56 = vpack.c.bf16 %v6954_v47, %v6954_v47 }
 0x54a   :  { %v3341_v61 = vpop.f32.mrb[20].mxu0  ;;  %v8498_v59 = vpack.c.bf16 %v8401_v33, %v8401_v33 }
 0x54b   :  { %v6779_v3 = vpop.f32.mrb[21].mxu0  ;;  %v3397_v6 = vsel %vm3177_vm3, %v3341_v61, -inf  ;;  %v3592_v58 = vsel %vm3084_vm1, %v6672_v56, 0 }
 0x54c   :  { %3398 = vmax.xlane.f32.xlu0 %v3397_v6  ;;  %v3344_v8 = vpop.f32.mrb[22].mxu0  ;;  %v8505_v3 = vpack.c.bf16 %v8405_v38, %v8405_v38  ;;  %v6670_v6 = vpack.c.bf16 %v8330_v7, %v8330_v7 }
 0x54d   :  { %v6780_v9 = vpop.f32.mrb[23].mxu0  ;;  %v3662_v8 = vsel %vm3205_vm2, %v8498_v59, 0 }
 0x54e   :  { %v3391_v11 = vpop.f32.mrb[20].mxu1  ;;  %v3708_v33 = vsel %vm3205_vm2, %v8505_v3, 0 }
 0x54f   :  { %v6785_v12 = vpop.f32.mrb[21].mxu1  ;;  %v3400_v14 = vsel %vm3177_vm3, %v3391_v11, -inf }
 0x550   :  { %3401 = vmax.xlane.f32.xlu1 %v3400_v14  ;;  %v3394_v44 = vpop.f32.mrb[22].mxu1 }
 0x551   :  { %v6786_v18 = vpop.f32.mrb[23].mxu1 }
 0x561   :  { %3469 = vrot.lane.b32.xlu1 %v8409_v40, %s8096_s6 }
 0x5d9   :  { %v3399_v19 = vpop.xlane.xlu0 %3398 }
 0x5da   :  { %v3403_v20 = vsub.f32 %v3341_v61, %v3399_v19  ;;  %v6669_v61 = vpack.c.bf16 %v8323_v63, %v8323_v63 }
 0x5dc   :  { %v3405_v22 = vmul.f32 1.442695, %v3403_v20 }
 0x5dd   :  { %v3402_v0 = vpop.xlane.xlu1 %3401 }
 0x5de   :  { %7805 = vpow2.f32 %v3405_v22  ;;  %v3404_v28 = vsub.f32 %v3391_v11, %v3402_v0 }
 0x5e0   :  { %v3407_v13 = vmul.f32 1.442695, %v3404_v28 }
 0x5e1   :  { %v3470_v29 = vpop.permute.xlu1 %3469 }
 0x5e2   :  { %7807 = vpow2.f32 %v3407_v13  ;;  %v3475_v30 = vsel %vm3205_vm2, %v3470_v29, 0 }
 0x5e3   :  { %6794 = vmatpush3.bf16.msra.mxu1 %v3475_v30 }
 0x5e4   :  { %6805 = vmatprep.subr.bf16.mxu1 %v8094_v1 }
 0x5e8   :  { %v7806_v31 = vpop.eup %7805 }
 0x5e9   :  { %v3409_v34 = vsel %vm3177_vm3, %v7806_v31, 0.0 }
 0x5ea   :  { %3410 = vadd.xlane.f32.xlu0 %v3409_v34 }
 0x5ec   :  { %v7808_v36 = vpop.eup %7807 }
 0x5ed   :  { %v3412_v40 = vsel %vm3177_vm3, %v7808_v36, 0.0 }
 0x5ee   :  { %3413 = vadd.xlane.f32.xlu0 %v3412_v40 }
 0x604   :  { %3421 = vrot.lane.b32.xlu0 %v8403_v35, %s8096_s6  ;;  %v8478_v35 = vpack.c.bf16 %v6952_v43, %v6952_v43 }
 0x606   :  { %v3546_v10 = vsel %vm3084_vm1, %v8478_v35, 0 }
 0x677   :  { %v3411_v37 = vpop.xlane.xlu0 %3410 }
 0x678   :  { %7809 = vrcp.f32 %v3411_v37 }
 0x67b   :  { %v3414_v39 = vpop.xlane.xlu0 %3413 }
 0x67c   :  { %7811 = vrcp.f32 %v3414_v39 }
 0x67f   :  { %v3422_v27 = vpop.permute.xlu0 %3421 }
 0x680   :  { %v3427_v42 = vsel %vm3205_vm2, %v3422_v27, 0 }
 0x681   :  { %6788 = vmatpush3.bf16.msra.mxu0 %v3427_v42 }
 0x682   :  { %v7810_v45 = vpop.eup %7809  ;;  %6799 = vmatprep.subr.bf16.mxu0 %v8094_v1 }
 0x683   :  { %v8476_v50 = vmul.f32 %v7810_v45, %v7806_v31 }
 0x685   :  { %v3419_v53 = vpack.c.bf16 %v8476_v50, %v8476_v50 }
 0x686   :  { %v7812_v55 = vpop.eup %7811 }
 0x687   :  { %v8482_v57 = vmul.f32 %v7812_v55, %v7808_v36  ;;  %6790 = vmatmul.mubr.msk.bf16.vlgmr.msra.gmra.mrb[24].mxu0 %vm3177_vm3, %v3419_v53 }
 0x688   :  { %6801 = vmatprep.mubr.msk.bf16.mxu0 %vm8095_vm0, %v8094_v1 }
 0x689   :  { %v3420_v16 = vpack.c.bf16 %v8482_v57, %v8482_v57 }
 0x68a   :  { %6800 = vmatpush3.bf16.xpose.msra.mxu0 %v3546_v10 }
 0x68b   :  { %6796 = vmatmul.mubr.msk.bf16.vlgmr.msra.gmra.mrb[24].mxu1 %vm3177_vm3, %v3420_v16  ;;  %6811 = vmatprep.subr.bf16.mxu0 %v8094_v1 }
 0x68c   :  { %6806 = vmatpush3.bf16.xpose.msra.mxu1 %v3592_v58  ;;  %6807 = vmatprep.mubr.msk.bf16.mxu1 %vm8095_vm0, %v8094_v1 }
 0x68d   :  { %6817 = vmatprep.subr.bf16.mxu1 %v8094_v1 }
 0x691   :  { %6802 = vmatmul.mubr.msk.bf16.vlgmr.msra.gmra.mrb[28].mxu0 %vm3084_vm1, %v6669_v61 }
 0x692   :  { %6812 = vmatpush3.bf16.msra.mxu0 %v3662_v8  ;;  %6813 = vmatprep.mubr.msk.bf16.mxu0 %vm8095_vm0, %v8094_v1 }
 0x693   :  { %6808 = vmatmul.mubr.msk.bf16.vlgmr.msra.gmra.mrb[28].mxu1 %vm3084_vm1, %v6670_v6  ;;  %6823 = vmatprep.subr.bf16.mxu0 %v8094_v1 }
 0x694   :  { %6818 = vmatpush3.bf16.msra.mxu1 %v3708_v33  ;;  %6819 = vmatprep.mubr.msk.bf16.mxu1 %vm8095_vm0, %v8094_v1 }
 0x695   :  { %6829 = vmatprep.subr.bf16.mxu1 %v8094_v1 }
 0x75a   :  { %v8521_v63 = vpop.f32.mrb[24].mxu0 }
 0x75b   :  { %v6791_v7 = vpop.f32.mrb[25].mxu0 }
 0x75c   :  { %v3466_v38 = vpop.f32.mrb[26].mxu0 }
 0x75d   :  { %v6792_v9 = vpop.f32.mrb[27].mxu0 }
 0x75e   :  { %v8523_v11 = vpop.f32.mrb[24].mxu1 }
 0x75f   :  { %v3517_v12 = vpack.c.bf16 %v8523_v11, %v8521_v63  ;;  %v6797_v14 = vpop.f32.mrb[25].mxu1 }
 0x760   :  { %v3514_v44 = vpop.f32.mrb[26].mxu1 }
 0x761   :  { %v6798_v18 = vpop.f32.mrb[27].mxu1 }
 0x764   :  { %v3582_v19 = vpop.f32.mrb[28].mxu0 }
 0x765   :  { %v6803_v20 = vpop.f32.mrb[29].mxu0  ;;  %v3634_v22 = vsel %vm3177_vm3, %v3582_v19, -inf }
 0x766   :  { %v3628_v0 = vpop.f32.mrb[28].mxu1  ;;  %3635 = vmax.xlane.f32.xlu1 %v3634_v22  ;;  %v3585_v28 = vpop.f32.mrb[30].mxu0 }
 0x767   :  { %v6804_v13 = vpop.f32.mrb[31].mxu0  ;;  %v6809_v29 = vpop.f32.mrb[29].mxu1  ;;  %v3637_v30 = vsel %vm3177_vm3, %v3628_v0, -inf }
 0x768   :  { %3638 = vmax.xlane.f32.xlu0 %v3637_v30  ;;  %v3631_v31 = vpop.f32.mrb[30].mxu1 }
 0x769   :  { %v6810_v34 = vpop.f32.mrb[31].mxu1 }
 0x777   :  { %3804 = vrot.lane.b32.xlu1 %v6672_v56, %s8096_s6 }
 0x7f3   :  { %v3636_v36 = vpop.xlane.xlu1 %3635 }
 0x7f4   :  { %v3640_v40 = vsub.f32 %v3582_v19, %v3636_v36 }
 0x7f5   :  { %v3639_v37 = vpop.xlane.xlu0 %3638 }
 0x7f6   :  { %v3642_v39 = vmul.f32 1.442695, %v3640_v40  ;;  %v3641_v26 = vsub.f32 %v3628_v0, %v3639_v37 }
 0x7f7   :  { %v3805_v53 = vpop.permute.xlu1 %3804 }
 0x7f8   :  { %7813 = vpow2.f32 %v3642_v39  ;;  %v3644_v27 = vmul.f32 1.442695, %v3641_v26 }
 0x7fa   :  { %7815 = vpow2.f32 %v3644_v27 }
 0x802   :  { %v7814_v42 = vpop.eup %7813 }
 0x803   :  { %v3646_v43 = vsel %vm3177_vm3, %v7814_v42, 0.0 }
 0x804   :  { %v7816_v45 = vpop.eup %7815  ;;  %3647 = vadd.xlane.f32.xlu0 %v3646_v43 }
 0x805   :  { %v3649_v47 = vsel %vm3177_vm3, %v7816_v45, 0.0 }
 0x806   :  { %3650 = vadd.xlane.f32.xlu1 %v3649_v47 }
 0x817   :  { %3752 = vrot.lane.b32.xlu1 %v6669_v61, %s8096_s6 }
 0x81a   :  { %3754 = vrot.lane.b32.xlu0 %v8478_v35, %s8096_s6 }
 0x81b   :  { %3802 = vrot.lane.b32.xlu1 %v6670_v6, %s8096_s6  ;;  %v3810_v6 = vsel %vm3084_vm1, %v3805_v53, 0 }
 0x891   :  { %v3648_v55 = vpop.xlane.xlu0 %3647 }
 0x892   :  { %7817 = vrcp.f32 %v3648_v55 }
 0x893   :  { %v3651_v56 = vpop.xlane.xlu1 %3650 }
 0x894   :  { %7819 = vrcp.f32 %v3651_v56 }
 0x895   :  { %v3755_v8 = vpop.permute.xlu0 %3754 }
 0x896   :  { %v3760_v7 = vsel %vm3084_vm1, %v3755_v8, 0 }
 0x897   :  { %v3753_v38 = vpop.permute.xlu1 %3752 }
 0x89b   :  { %v3803_v9 = vpop.permute.xlu1 %3802 }
 0x89c   :  { %v7818_v10 = vpop.eup %7817 }
 0x89d   :  { %v8536_v16 = vmul.f32 %v7818_v10, %v7814_v42 }
 0x89e   :  { %v7820_v58 = vpop.eup %7819 }
 0x89f   :  { %v8538_v33 = vmul.f32 %v7820_v58, %v7816_v45  ;;  %v3656_v61 = vpack.c.bf16 %v8536_v16, %v8536_v16 }
 0x8a1   :  { %6814 = vmatmul.mubr.msk.bf16.vlgmr.msra.gmra.mrb[32].mxu0 %vm3177_vm3, %v3656_v61  ;;  %v3657_v35 = vpack.c.bf16 %v8538_v33, %v8538_v33 }
 0x8a2   :  { %6824 = vmatpush3.bf16.xpose.msra.mxu0 %v3760_v7  ;;  %6825 = vmatprep.mubr.msk.bf16.mxu0 %vm8095_vm0, %v8094_v1 }
 0x8a3   :  { %6820 = vmatmul.mubr.msk.bf16.vlgmr.msra.gmra.mrb[32].mxu1 %vm3177_vm3, %v3657_v35  ;;  %6835 = vmatprep.subr.bf16.mxu0 %v8094_v1 }
 0x8a4   :  { %6830 = vmatpush3.bf16.xpose.msra.mxu1 %v3810_v6  ;;  %6831 = vmatprep.mubr.msk.bf16.mxu1 %vm8095_vm0, %v8094_v1  ;;  %v1279_v6 = vrot.slane %v8353_v4, %v8321_v62 }
 0x8a5   :  { %6841 = vmatprep.subr.bf16.mxu1 %v8094_v1 }
 0x8a9   :  { %6826 = vmatmul.mubr.msk.bf16.vlgmr.msra.gmra.mrb[36].mxu0 %vm3084_vm1, %v3753_v38 }
 0x8aa   :  { %6837 = vmatprep.mubr.msk.bf16.mxu0 %vm8095_vm0, %v8094_v1 }
 0x8ab   :  { %6832 = vmatmul.mubr.msk.bf16.vlgmr.msra.gmra.mrb[36].mxu1 %vm3084_vm1, %v3803_v9 }
 0x8ac   :  { %6843 = vmatprep.mubr.msk.bf16.mxu1 %vm8095_vm0, %v8094_v1 }
 0x974   :  { %v3698_v14 = vpop.f32.mrb[32].mxu0 }
 0x975   :  { %v6815_v44 = vpop.f32.mrb[33].mxu0 }
 0x976   :  { %v3701_v18 = vpop.f32.mrb[34].mxu0  ;;  %v3744_v19 = vpop.f32.mrb[32].mxu1 }
 0x977   :  { %v3750_v20 = vpack.c.bf16 %v3744_v19, %v3698_v14  ;;  %v6816_v22 = vpop.f32.mrb[35].mxu0  ;;  %v6821_v0 = vpop.f32.mrb[33].mxu1  ;;  %v6955_v14 = vadd.f32 %v8374_v52, %v1279_v6  ;;  %v6957_v18 = vadd.f32 %v8380_v24, %v1279_v6 }
 0x978   :  { %v3747_v28 = vpop.f32.mrb[34].mxu1 }
 0x979   :  { %3751 = vst.msk [vmem:[#allocation2 + $0x8] sm:$0xff] %vm3084_vm1, %v3750_v20  ;;  %v6822_v13 = vpop.f32.mrb[35].mxu1  ;;  %v6678_v0 = vpack.c.bf16 %v6957_v18, %v6957_v18 }
 0x97b   :  { %v4046_v13 = vsel %vm3084_vm1, %v6678_v0, 0 }
 0x97c   :  { %v3796_v29 = vpop.f32.mrb[36].mxu0 }
 0x97d   :  { %v6827_v30 = vpop.f32.mrb[37].mxu0  ;;  %v3852_v31 = vsel %vm3177_vm3, %v3796_v29, -inf }
 0x97e   :  { %v3846_v34 = vpop.f32.mrb[36].mxu1  ;;  %3853 = vmax.xlane.f32.xlu0 %v3852_v31  ;;  %v3799_v36 = vpop.f32.mrb[38].mxu0  ;;  %v6675_v30 = vpack.c.bf16 %v8336_v15, %v8336_v15  ;;  %v8606_v31 = vpack.c.bf16 %v8421_v51, %v8421_v51 }
 0x97f   :  { %v6828_v40 = vpop.f32.mrb[39].mxu0  ;;  %v6833_v37 = vpop.f32.mrb[37].mxu1  ;;  %v3855_v39 = vsel %vm3177_vm3, %v3846_v34, -inf }
 0x980   :  { %3856 = vmax.xlane.f32.xlu1 %v3855_v39  ;;  %v3849_v26 = vpop.f32.mrb[38].mxu1 }
 0x981   :  { %v6834_v27 = vpop.f32.mrb[39].mxu1 }
 0x991   :  { %3924 = vrot.lane.b32.xlu1 %v8505_v3, %s8096_s6 }
 0xa0b   :  { %v3854_v42 = vpop.xlane.xlu0 %3853 }
 0xa0c   :  { %v3858_v43 = vsub.f32 %v3796_v29, %v3854_v42  ;;  %v8599_v29 = vpack.c.bf16 %v8416_v46, %v8416_v46  ;;  %v4162_v46 = vsel %vm3205_vm2, %v8606_v31, 0 }
 0xa0d   :  { %v3857_v45 = vpop.xlane.xlu1 %3856 }
 0xa0e   :  { %v3860_v47 = vmul.f32 1.442695, %v3858_v43  ;;  %v3859_v53 = vsub.f32 %v3846_v34, %v3857_v45  ;;  %v6676_v34 = vpack.c.bf16 %v8340_v21, %v8340_v21  ;;  %v4116_v36 = vsel %vm3205_vm2, %v8599_v29, 0 }
 0xa10   :  { %7821 = vpow2.f32 %v3860_v47  ;;  %v3862_v55 = vmul.f32 1.442695, %v3859_v53 }
 0xa11   :  { %v3925_v56 = vpop.permute.xlu1 %3924 }
 0xa12   :  { %7823 = vpow2.f32 %v3862_v55  ;;  %v3930_v10 = vsel %vm3205_vm2, %v3925_v56, 0 }
 0xa13   :  { %6842 = vmatpush3.bf16.msra.mxu1 %v3930_v10 }
 0xa14   :  { %6853 = vmatprep.subr.bf16.mxu1 %v8094_v1 }
 0xa1a   :  { %v7822_v58 = vpop.eup %7821 }
 0xa1b   :  { %v3864_v8 = vsel %vm3177_vm3, %v7822_v58, 0.0 }
 0xa1c   :  { %v7824_v61 = vpop.eup %7823  ;;  %3865 = vadd.xlane.f32.xlu0 %v3864_v8 }
 0xa1d   :  { %v3867_v3 = vsel %vm3177_vm3, %v7824_v61, 0.0 }
 0xa20   :  { %3868 = vadd.xlane.f32.xlu0 %v3867_v3 }
 0xa36   :  { %3876 = vrot.lane.b32.xlu0 %v8498_v59, %s8096_s6  ;;  %v8579_v59 = vpack.c.bf16 %v6955_v14, %v6955_v14 }
 0xa38   :  { %v4000_v52 = vsel %vm3084_vm1, %v8579_v59, 0 }
 0xaa9   :  { %v3866_v7 = vpop.xlane.xlu0 %3865 }
 0xaaa   :  { %7825 = vrcp.f32 %v3866_v7 }
 0xaad   :  { %v3869_v35 = vpop.xlane.xlu0 %3868 }
 0xaae   :  { %7827 = vrcp.f32 %v3869_v35 }
 0xab1   :  { %v3877_v38 = vpop.permute.xlu0 %3876 }
 0xab2   :  { %v3882_v9 = vsel %vm3205_vm2, %v3877_v38, 0 }
 0xab3   :  { %6836 = vmatpush3.bf16.msra.mxu0 %v3882_v9 }
 0xab4   :  { %v7826_v44 = vpop.eup %7825  ;;  %6847 = vmatprep.subr.bf16.mxu0 %v8094_v1 }
 0xab5   :  { %v8577_v19 = vmul.f32 %v7826_v44, %v7822_v58 }
 0xab7   :  { %v3874_v20 = vpack.c.bf16 %v8577_v19, %v8577_v19 }
 0xab8   :  { %v7828_v22 = vpop.eup %7827 }
 0xab9   :  { %v8583_v28 = vmul.f32 %v7828_v22, %v7824_v61  ;;  %6838 = vmatmul.mubr.msk.bf16.vlgmr.msra.gmra.mrb[40].mxu0 %vm3177_vm3, %v3874_v20 }
 0xaba   :  { %6849 = vmatprep.mubr.msk.bf16.mxu0 %vm8095_vm0, %v8094_v1 }
 0xabb   :  { %v3875_v24 = vpack.c.bf16 %v8583_v28, %v8583_v28 }
 0xabc   :  { %6848 = vmatpush3.bf16.xpose.msra.mxu0 %v4000_v52 }
 0xabd   :  { %6844 = vmatmul.mubr.msk.bf16.vlgmr.msra.gmra.mrb[40].mxu1 %vm3177_vm3, %v3875_v24  ;;  %6859 = vmatprep.subr.bf16.mxu0 %v8094_v1 }
 0xabe   :  { %6854 = vmatpush3.bf16.xpose.msra.mxu1 %v4046_v13  ;;  %6855 = vmatprep.mubr.msk.bf16.mxu1 %vm8095_vm0, %v8094_v1 }
 0xabf   :  { %6865 = vmatprep.subr.bf16.mxu1 %v8094_v1 }
 0xac3   :  { %6850 = vmatmul.mubr.msk.bf16.vlgmr.msra.gmra.mrb[44].mxu0 %vm3084_vm1, %v6675_v30 }
 0xac4   :  { %6860 = vmatpush3.bf16.msra.mxu0 %v4116_v36  ;;  %6861 = vmatprep.mubr.msk.bf16.mxu0 %vm8095_vm0, %v8094_v1 }
 0xac5   :  { %6856 = vmatmul.mubr.msk.bf16.vlgmr.msra.gmra.mrb[44].mxu1 %vm3084_vm1, %v6676_v34  ;;  %6871 = vmatprep.subr.bf16.mxu0 %v8094_v1 }
 0xac6   :  { %6866 = vmatpush3.bf16.msra.mxu1 %v4162_v46  ;;  %6867 = vmatprep.mubr.msk.bf16.mxu1 %vm8095_vm0, %v8094_v1 }
 0xac7   :  { %6877 = vmatprep.subr.bf16.mxu1 %v8094_v1 }
 0xb8c   :  { %v8622_v15 = vpop.f32.mrb[40].mxu0 }
 0xb8d   :  { %v6839_v21 = vpop.f32.mrb[41].mxu0 }
 0xb8e   :  { %v3921_v51 = vpop.f32.mrb[42].mxu0 }
 0xb8f   :  { %v6840_v40 = vpop.f32.mrb[43].mxu0 }
 0xb90   :  { %v8624_v37 = vpop.f32.mrb[40].mxu1 }
 0xb91   :  { %v3972_v39 = vpack.c.bf16 %v8624_v37, %v8622_v15  ;;  %v6845_v26 = vpop.f32.mrb[41].mxu1 }
 0xb92   :  { %v3969_v27 = vpop.f32.mrb[42].mxu1 }
 0xb93   :  { %v6846_v42 = vpop.f32.mrb[43].mxu1 }
 0xb96   :  { %v4036_v43 = vpop.f32.mrb[44].mxu0 }
 0xb97   :  { %v6851_v45 = vpop.f32.mrb[45].mxu0  ;;  %v4088_v47 = vsel %vm3177_vm3, %v4036_v43, -inf }
 0xb98   :  { %v4082_v53 = vpop.f32.mrb[44].mxu1  ;;  %4089 = vmax.xlane.f32.xlu1 %v4088_v47  ;;  %v4039_v55 = vpop.f32.mrb[46].mxu0 }
 0xb99   :  { %v6852_v56 = vpop.f32.mrb[47].mxu0  ;;  %v6857_v10 = vpop.f32.mrb[45].mxu1  ;;  %v4091_v58 = vsel %vm3177_vm3, %v4082_v53, -inf }
 0xb9a   :  { %4092 = vmax.xlane.f32.xlu0 %v4091_v58  ;;  %v4085_v8 = vpop.f32.mrb[46].mxu1 }
 0xb9b   :  { %v6858_v61 = vpop.f32.mrb[47].mxu1 }
 0xba9   :  { %4258 = vrot.lane.b32.xlu1 %v6678_v0, %s8096_s6 }
 0xc25   :  { %v4090_v3 = vpop.xlane.xlu1 %4089 }
 0xc26   :  { %v4094_v7 = vsub.f32 %v4036_v43, %v4090_v3 }
 0xc27   :  { %v4093_v35 = vpop.xlane.xlu0 %4092 }
 0xc28   :  { %v4096_v6 = vmul.f32 1.442695, %v4094_v7  ;;  %v4095_v38 = vsub.f32 %v4082_v53, %v4093_v35 }
 0xc29   :  { %v4259_v22 = vpop.permute.xlu1 %4258 }
 0xc2a   :  { %7829 = vpow2.f32 %v4096_v6  ;;  %v4098_v9 = vmul.f32 1.442695, %v4095_v38 }
 0xc2c   :  { %7831 = vpow2.f32 %v4098_v9 }
 0xc34   :  { %v7830_v14 = vpop.eup %7829 }
 0xc35   :  { %v4100_v44 = vsel %vm3177_vm3, %v7830_v14, 0.0 }
 0xc36   :  { %v7832_v18 = vpop.eup %7831  ;;  %4101 = vadd.xlane.f32.xlu0 %v4100_v44 }
 0xc37   :  { %v4103_v20 = vsel %vm3177_vm3, %v7832_v18, 0.0 }
 0xc38   :  { %4104 = vadd.xlane.f32.xlu1 %v4103_v20 }
 0xc49   :  { %4206 = vrot.lane.b32.xlu1 %v6675_v30, %s8096_s6 }
 0xc4c   :  { %4208 = vrot.lane.b32.xlu0 %v8579_v59, %s8096_s6 }
 0xc4d   :  { %4256 = vrot.lane.b32.xlu1 %v6676_v34, %s8096_s6  ;;  %v4264_v34 = vsel %vm3084_vm1, %v4259_v22, 0 }
 0xcc3   :  { %v4102_v0 = vpop.xlane.xlu0 %4101 }
 0xcc4   :  { %7833 = vrcp.f32 %v4102_v0 }
 0xcc5   :  { %v4105_v52 = vpop.xlane.xlu1 %4104 }
 0xcc6   :  { %7835 = vrcp.f32 %v4105_v52 }
 0xcc7   :  { %v4209_v46 = vpop.permute.xlu0 %4208 }
 0xcc8   :  { %v4214_v51 = vsel %vm3084_vm1, %v4209_v46, 0 }
 0xcc9   :  { %v4207_v40 = vpop.permute.xlu1 %4206 }
 0xccd   :  { %v4257_v26 = vpop.permute.xlu1 %4256 }
 0xcce   :  { %v7834_v24 = vpop.eup %7833 }
 0xccf   :  { %v8637_v13 = vmul.f32 %v7834_v24, %v7830_v14 }
 0xcd0   :  { %v7836_v36 = vpop.eup %7835 }
 0xcd1   :  { %v8639_v21 = vmul.f32 %v7836_v36, %v7832_v18  ;;  %v4110_v30 = vpack.c.bf16 %v8637_v13, %v8637_v13 }
 0xcd3   :  { %6862 = vmatmul.mubr.msk.bf16.vlgmr.msra.gmra.mrb[48].mxu0 %vm3177_vm3, %v4110_v30  ;;  %v4111_v59 = vpack.c.bf16 %v8639_v21, %v8639_v21 }
 0xcd4   :  { %6872 = vmatpush3.bf16.xpose.msra.mxu0 %v4214_v51  ;;  %6873 = vmatprep.mubr.msk.bf16.mxu0 %vm8095_vm0, %v8094_v1 }
 0xcd5   :  { %6868 = vmatmul.mubr.msk.bf16.vlgmr.msra.gmra.mrb[48].mxu1 %vm3177_vm3, %v4111_v59  ;;  %6883 = vmatprep.subr.bf16.mxu0 %v8094_v1 }
 0xcd6   :  { %6878 = vmatpush3.bf16.xpose.msra.mxu1 %v4264_v34  ;;  %6879 = vmatprep.mubr.msk.bf16.mxu1 %vm8095_vm0, %v8094_v1 }
 0xcd7   :  { %6889 = vmatprep.subr.bf16.mxu1 %v8094_v1 }
 0xcdb   :  { %6874 = vmatmul.mubr.msk.bf16.vlgmr.msra.gmra.mrb[52].mxu0 %vm3084_vm1, %v4207_v40  ;;  %v1283_v40 = vrot.slane %v8353_v4, %v8328_v2 }
 0xcdc   :  { %6885 = vmatprep.mubr.msk.bf16.mxu0 %vm8095_vm0, %v8094_v1 }
 0xcdd   :  { %6880 = vmatmul.mubr.msk.bf16.vlgmr.msra.gmra.mrb[52].mxu1 %vm3084_vm1, %v4257_v26 }
 0xcde   :  { %6891 = vmatprep.mubr.msk.bf16.mxu1 %vm8095_vm0, %v8094_v1 }
 0xda6   :  { %v4152_v27 = vpop.f32.mrb[48].mxu0 }
 0xda7   :  { %v6863_v42 = vpop.f32.mrb[49].mxu0 }
 0xda8   :  { %v4155_v43 = vpop.f32.mrb[50].mxu0  ;;  %v4198_v45 = vpop.f32.mrb[48].mxu1  ;;  %v6956_v42 = vadd.f32 %v8377_v23, %v1283_v40 }
 0xda9   :  { %v4204_v47 = vpack.c.bf16 %v4198_v45, %v4152_v27  ;;  %v6864_v53 = vpop.f32.mrb[51].mxu0  ;;  %v6869_v55 = vpop.f32.mrb[49].mxu1  ;;  %v6958_v45 = vadd.f32 %v8384_v60, %v1283_v40 }
 0xdaa   :  { %v4201_v56 = vpop.f32.mrb[50].mxu1 }
 0xdab   :  { %4205 = vst.msk [vmem:[#allocation2 + $0x10] sm:$0xff] %vm3084_vm1, %v4204_v47  ;;  %v6870_v10 = vpop.f32.mrb[51].mxu1  ;;  %v6684_v4 = vpack.c.bf16 %v6958_v45, %v6958_v45 }
 0xdad   :  { %v4500_v10 = vsel %vm3084_vm1, %v6684_v4, 0 }
 0xdae   :  { %v4250_v58 = vpop.f32.mrb[52].mxu0 }
 0xdaf   :  { %v6875_v8 = vpop.f32.mrb[53].mxu0  ;;  %v4306_v61 = vsel %vm3177_vm3, %v4250_v58, -inf }
 0xdb0   :  { %v4300_v3 = vpop.f32.mrb[52].mxu1  ;;  %4307 = vmax.xlane.f32.xlu0 %v4306_v61  ;;  %v4253_v7 = vpop.f32.mrb[54].mxu0  ;;  %v6681_v8 = vpack.c.bf16 %v8338_v17, %v8338_v17  ;;  %v8707_v61 = vpack.c.bf16 %v8423_v54, %v8423_v54 }
 0xdb1   :  { %v6876_v35 = vpop.f32.mrb[55].mxu0  ;;  %v6881_v6 = vpop.f32.mrb[53].mxu1  ;;  %v4309_v38 = vsel %vm3177_vm3, %v4300_v3, -inf }
 0xdb2   :  { %4310 = vmax.xlane.f32.xlu1 %v4309_v38  ;;  %v4303_v9 = vpop.f32.mrb[54].mxu1 }
 0xdb3   :  { %v6882_v14 = vpop.f32.mrb[55].mxu1 }
 0xdc3   :  { %4378 = vrot.lane.b32.xlu1 %v8606_v31, %s8096_s6 }
 0xe3d   :  { %v4308_v44 = vpop.xlane.xlu0 %4307 }
 0xe3e   :  { %v4312_v18 = vsub.f32 %v4250_v58, %v4308_v44  ;;  %v8700_v58 = vpack.c.bf16 %v8419_v48, %v8419_v48  ;;  %v4616_v48 = vsel %vm3205_vm2, %v8707_v61, 0 }
 0xe3f   :  { %v4311_v20 = vpop.xlane.xlu1 %4310 }
 0xe40   :  { %v4314_v22 = vmul.f32 1.442695, %v4312_v18  ;;  %v4313_v0 = vsub.f32 %v4300_v3, %v4311_v20  ;;  %v6682_v3 = vpack.c.bf16 %v8342_v25, %v8342_v25  ;;  %v4570_v7 = vsel %vm3205_vm2, %v8700_v58, 0 }
 0xe42   :  { %7837 = vpow2.f32 %v4314_v22  ;;  %v4316_v52 = vmul.f32 1.442695, %v4313_v0 }
 0xe43   :  { %v4379_v24 = vpop.permute.xlu1 %4378 }
 0xe44   :  { %7839 = vpow2.f32 %v4316_v52  ;;  %v4384_v36 = vsel %vm3205_vm2, %v4379_v24, 0 }
 0xe45   :  { %6890 = vmatpush3.bf16.msra.mxu1 %v4384_v36 }
 0xe46   :  { %6901 = vmatprep.subr.bf16.mxu1 %v8094_v1 }
 0xe4c   :  { %v7838_v46 = vpop.eup %7837 }
 0xe4d   :  { %v4318_v30 = vsel %vm3177_vm3, %v7838_v46, 0.0 }
 0xe4e   :  { %v7840_v51 = vpop.eup %7839  ;;  %4319 = vadd.xlane.f32.xlu0 %v4318_v30 }
 0xe4f   :  { %v4321_v31 = vsel %vm3177_vm3, %v7840_v51, 0.0 }
 0xe52   :  { %4322 = vadd.xlane.f32.xlu0 %v4321_v31 }
 0xe68   :  { %4330 = vrot.lane.b32.xlu0 %v8599_v29, %s8096_s6  ;;  %v8680_v29 = vpack.c.bf16 %v6956_v42, %v6956_v42 }
 0xe6a   :  { %v4454_v23 = vsel %vm3084_vm1, %v8680_v29, 0 }
 0xedb   :  { %v4320_v59 = vpop.xlane.xlu0 %4319 }
 0xedc   :  { %7841 = vrcp.f32 %v4320_v59 }
 0xedf   :  { %v4323_v34 = vpop.xlane.xlu0 %4322 }
 0xee0   :  { %7843 = vrcp.f32 %v4323_v34 }
 0xee3   :  { %v4331_v26 = vpop.permute.xlu0 %4330 }
 0xee4   :  { %v4336_v27 = vsel %vm3205_vm2, %v4331_v26, 0 }
 0xee5   :  { %6884 = vmatpush3.bf16.msra.mxu0 %v4336_v27 }
 0xee6   :  { %v7842_v43 = vpop.eup %7841  ;;  %6895 = vmatprep.subr.bf16.mxu0 %v8094_v1 }
 0xee7   :  { %v8678_v47 = vmul.f32 %v7842_v43, %v7838_v46 }
 0xee9   :  { %v4328_v53 = vpack.c.bf16 %v8678_v47, %v8678_v47 }
 0xeea   :  { %v7844_v55 = vpop.eup %7843 }
 0xeeb   :  { %v8684_v56 = vmul.f32 %v7844_v55, %v7840_v51  ;;  %6886 = vmatmul.mubr.msk.bf16.vlgmr.msra.gmra.mrb[56].mxu0 %vm3177_vm3, %v4328_v53 }
 0xeec   :  { %6897 = vmatprep.mubr.msk.bf16.mxu0 %vm8095_vm0, %v8094_v1 }
 0xeed   :  { %v4329_v60 = vpack.c.bf16 %v8684_v56, %v8684_v56 }
 0xeee   :  { %6896 = vmatpush3.bf16.xpose.msra.mxu0 %v4454_v23 }
 0xeef   :  { %6892 = vmatmul.mubr.msk.bf16.vlgmr.msra.gmra.mrb[56].mxu1 %vm3177_vm3, %v4329_v60  ;;  %6907 = vmatprep.subr.bf16.mxu0 %v8094_v1 }
 0xef0   :  { %6902 = vmatpush3.bf16.xpose.msra.mxu1 %v4500_v10  ;;  %6903 = vmatprep.mubr.msk.bf16.mxu1 %vm8095_vm0, %v8094_v1 }
 0xef1   :  { %6913 = vmatprep.subr.bf16.mxu1 %v8094_v1 }
 0xef5   :  { %6898 = vmatmul.mubr.msk.bf16.vlgmr.msra.gmra.mrb[60].mxu0 %vm3084_vm1, %v6681_v8 }
 0xef6   :  { %6908 = vmatpush3.bf16.msra.mxu0 %v4570_v7  ;;  %6909 = vmatprep.mubr.msk.bf16.mxu0 %vm8095_vm0, %v8094_v1 }
 0xef7   :  { %6904 = vmatmul.mubr.msk.bf16.vlgmr.msra.gmra.mrb[60].mxu1 %vm3084_vm1, %v6682_v3  ;;  %6919 = vmatprep.subr.bf16.mxu0 %v8094_v1 }
 0xef8   :  { %6914 = vmatpush3.bf16.msra.mxu1 %v4616_v48  ;;  %6915 = vmatprep.mubr.msk.bf16.mxu1 %vm8095_vm0, %v8094_v1 }
 0xef9   :  { %6925 = vmatprep.subr.bf16.mxu1 %v8094_v1 }
 0xfbe   :  { %v8723_v17 = vpop.f32.mrb[56].mxu0 }
 0xfbf   :  { %v6887_v25 = vpop.f32.mrb[57].mxu0 }
 0xfc0   :  { %v4375_v54 = vpop.f32.mrb[58].mxu0 }
 0xfc1   :  { %v6888_v35 = vpop.f32.mrb[59].mxu0 }
 0xfc2   :  { %v8725_v6 = vpop.f32.mrb[56].mxu1 }
 0xfc3   :  { %v4426_v38 = vpack.c.bf16 %v8725_v6, %v8723_v17  ;;  %v6893_v9 = vpop.f32.mrb[57].mxu1 }
 0xfc4   :  { %v4423_v14 = vpop.f32.mrb[58].mxu1 }
 0xfc5   :  { %v6894_v44 = vpop.f32.mrb[59].mxu1 }
 0xfc8   :  { %v4490_v18 = vpop.f32.mrb[60].mxu0 }
 0xfc9   :  { %v6899_v20 = vpop.f32.mrb[61].mxu0  ;;  %v4542_v22 = vsel %vm3177_vm3, %v4490_v18, -inf }
 0xfca   :  { %v4536_v0 = vpop.f32.mrb[60].mxu1  ;;  %4543 = vmax.xlane.f32.xlu1 %v4542_v22  ;;  %v4493_v52 = vpop.f32.mrb[62].mxu0 }
 0xfcb   :  { %v6900_v24 = vpop.f32.mrb[63].mxu0  ;;  %v6905_v36 = vpop.f32.mrb[61].mxu1  ;;  %v4545_v46 = vsel %vm3177_vm3, %v4536_v0, -inf }
 0xfcc   :  { %4546 = vmax.xlane.f32.xlu0 %v4545_v46  ;;  %v4539_v30 = vpop.f32.mrb[62].mxu1 }
 0xfcd   :  { %v6906_v51 = vpop.f32.mrb[63].mxu1 }
 0xfdb   :  { %4712 = vrot.lane.b32.xlu1 %v6684_v4, %s8096_s6 }
0x1057   :  { %v4544_v31 = vpop.xlane.xlu1 %4543 }
0x1058   :  { %v4548_v59 = vsub.f32 %v4490_v18, %v4544_v31 }
0x1059   :  { %v4547_v34 = vpop.xlane.xlu0 %4546 }
0x105a   :  { %v4550_v40 = vmul.f32 1.442695, %v4548_v59  ;;  %v4549_v26 = vsub.f32 %v4536_v0, %v4547_v34 }
0x105b   :  { %v4713_v55 = vpop.permute.xlu1 %4712 }
0x105c   :  { %7845 = vpow2.f32 %v4550_v40  ;;  %v4552_v27 = vmul.f32 1.442695, %v4549_v26 }
0x105e   :  { %7847 = vpow2.f32 %v4552_v27 }
0x1066   :  { %v7846_v42 = vpop.eup %7845 }
0x1067   :  { %v4554_v43 = vsel %vm3177_vm3, %v7846_v42, 0.0 }
0x1068   :  { %v7848_v45 = vpop.eup %7847  ;;  %4555 = vadd.xlane.f32.xlu0 %v4554_v43 }
0x1069   :  { %v4557_v53 = vsel %vm3177_vm3, %v7848_v45, 0.0 }
0x106a   :  { %4558 = vadd.xlane.f32.xlu1 %v4557_v53 }
0x107b   :  { %4660 = vrot.lane.b32.xlu1 %v6681_v8, %s8096_s6 }
0x107e   :  { %4662 = vrot.lane.b32.xlu0 %v8680_v29, %s8096_s6 }
0x107f   :  { %4710 = vrot.lane.b32.xlu1 %v6682_v3, %s8096_s6  ;;  %v4718_v3 = vsel %vm3084_vm1, %v4713_v55, 0 }
0x10f5   :  { %v4556_v4 = vpop.xlane.xlu0 %4555 }
0x10f6   :  { %7849 = vrcp.f32 %v4556_v4 }
0x10f7   :  { %v4559_v23 = vpop.xlane.xlu1 %4558 }
0x10f8   :  { %7851 = vrcp.f32 %v4559_v23 }
0x10f9   :  { %v4663_v48 = vpop.permute.xlu0 %4662 }
0x10fa   :  { %v4668_v54 = vsel %vm3084_vm1, %v4663_v48, 0 }
0x10fb   :  { %v4661_v35 = vpop.permute.xlu1 %4660 }
0x10ff   :  { %v4711_v9 = vpop.permute.xlu1 %4710 }
0x1100   :  { %v7850_v60 = vpop.eup %7849 }
0x1101   :  { %v8738_v10 = vmul.f32 %v7850_v60, %v7846_v42 }
0x1102   :  { %v7852_v7 = vpop.eup %7851 }
0x1103   :  { %v8740_v25 = vmul.f32 %v7852_v7, %v7848_v45  ;;  %v4564_v8 = vpack.c.bf16 %v8738_v10, %v8738_v10  ;;  %v7607_v7 = vld [vmem:[#allocation14 + $0x4] ss:$16 sps:$4 sm:$0xff]  }
0x1105   :  { %6910 = vmatmul.mubr.msk.bf16.vlgmr.msra.gmra.mrb[64].mxu0 %vm3177_vm3, %v4564_v8  ;;  %v4565_v29 = vpack.c.bf16 %v8740_v25, %v8740_v25 }
0x1106   :  { %6920 = vmatpush3.bf16.xpose.msra.mxu0 %v4668_v54  ;;  %6921 = vmatprep.mubr.msk.bf16.mxu0 %vm8095_vm0, %v8094_v1 }
0x1107   :  { %6916 = vmatmul.mubr.msk.bf16.vlgmr.msra.gmra.mrb[64].mxu1 %vm3177_vm3, %v4565_v29  ;;  %6931 = vmatprep.subr.bf16.mxu0 %v8094_v1 }
0x1108   :  { %6926 = vmatpush3.bf16.xpose.msra.mxu1 %v4718_v3  ;;  %6927 = vmatprep.mubr.msk.bf16.mxu1 %vm8095_vm0, %v8094_v1  ;;  %v7605_v3 = vld [vmem:[#allocation14] ss:$16 sps:$4 sm:$0xff]  }
0x1109   :  { %6937 = vmatprep.subr.bf16.mxu1 %v8094_v1 }
0x110d   :  { %6922 = vmatmul.mubr.msk.bf16.vlgmr.msra.gmra.mrb[68].mxu0 %vm3084_vm1, %v4661_v35 }
0x110e   :  { %6933 = vmatprep.mubr.msk.bf16.mxu0 %vm8095_vm0, %v8094_v1 }
0x110f   :  { %6928 = vmatmul.mubr.msk.bf16.vlgmr.msra.gmra.mrb[68].mxu1 %vm3084_vm1, %v4711_v9 }
0x1110   :  { %6939 = vmatprep.mubr.msk.bf16.mxu1 %vm8095_vm0, %v8094_v1 }
0x11d8   :  { %v4606_v14 = vpop.f32.mrb[64].mxu0 }
0x11d9   :  { %v6911_v44 = vpop.f32.mrb[65].mxu0 }
0x11da   :  { %v4609_v18 = vpop.f32.mrb[66].mxu0  ;;  %v4652_v20 = vpop.f32.mrb[64].mxu1 }
0x11db   :  { %v4658_v22 = vpack.c.bf16 %v4652_v20, %v4606_v14  ;;  %v6912_v0 = vpop.f32.mrb[67].mxu0  ;;  %v6917_v52 = vpop.f32.mrb[65].mxu1  ;;  %v7608_v18 = vld [vmem:[#allocation14 + $0x20] ss:$16 sps:$4 sm:$0xff]   ;;  %v7611_v20 = vld [vmem:[#allocation14 + $0x8] ss:$16 sps:$4 sm:$0xff]  }
0x11dc   :  { %v4655_v24 = vpop.f32.mrb[66].mxu1  ;;  %v7616_v0 = vld [vmem:[#allocation14 + $0x44] ss:$16 sps:$4 sm:$0xff]   ;;  %v7619_v52 = vld [vmem:[#allocation14 + $0x2c] ss:$16 sps:$4 sm:$0xff]  }
0x11dd   :  { %4659 = vst.msk [vmem:[#allocation2 + $0x18] sm:$0xff] %vm3084_vm1, %v4658_v22  ;;  %v6918_v36 = vpop.f32.mrb[67].mxu1  ;;  %v7614_v24 = vld [vmem:[#allocation14 + $0x40] ss:$16 sps:$4 sm:$0xff]  }
0x11de   :  { %v7617_v36 = vld [vmem:[#allocation14 + $0x28] ss:$16 sps:$4 sm:$0xff]  }
0x11e0   :  { %v4704_v46 = vpop.f32.mrb[68].mxu0 }
0x11e1   :  { %v6923_v30 = vpop.f32.mrb[69].mxu0  ;;  %v4760_v51 = vsel %vm3177_vm3, %v4704_v46, -inf }
0x11e2   :  { %v4754_v31 = vpop.f32.mrb[68].mxu1  ;;  %4761 = vmax.xlane.f32.xlu0 %v4760_v51  ;;  %v4707_v59 = vpop.f32.mrb[70].mxu0  ;;  %v7625_v30 = vld [vmem:[#allocation14 + $0x4c] ss:$16 sps:$4 sm:$0xff]   ;;  %v7620_v51 = vld [vmem:[#allocation14 + $0x60] ss:$16 sps:$4 sm:$0xff]  }
0x11e3   :  { %v6924_v34 = vpop.f32.mrb[71].mxu0  ;;  %v6929_v1 = vpop.f32.mrb[69].mxu1  ;;  %v4763_v40 = vsel %vm3177_vm3, %v4754_v31, -inf  ;;  %v7628_v59 = vld [vmem:[#allocation14 + $0x84] ss:$16 sps:$4 sm:$0xff]  }
0x11e4   :  { %4764 = vmax.xlane.f32.xlu1 %v4763_v40  ;;  %v4757_v26 = vpop.f32.mrb[70].mxu1  ;;  %v7631_v34 = vld [vmem:[#allocation14 + $0x6c] ss:$16 sps:$4 sm:$0xff]   ;;  %v7626_v1 = vld [vmem:[#allocation14 + $0x80] ss:$16 sps:$4 sm:$0xff]  }
0x11e5   :  { %v6930_v27 = vpop.f32.mrb[71].mxu1  ;;  %v7629_v40 = vld [vmem:[#allocation14 + $0x68] ss:$16 sps:$4 sm:$0xff]   ;;  %v7634_v26 = vld [vmem:[#allocation14 + $0xa4] ss:$16 sps:$4 sm:$0xff]  }
0x11e6   :  { %v7637_v27 = vld [vmem:[#allocation14 + $0x8c] ss:$16 sps:$4 sm:$0xff]  }
0x11f5   :  { %4832 = vrot.lane.b32.xlu1 %v8707_v61, %s8096_s6 }
0x11f9   :  { %3974 = vrot.lane.b32.xlu1 %v3972_v39, %s8096_s6 }
0x11fd   :  { %3519 = vrot.lane.b32.xlu1 %v3517_v12, %s8096_s6 }
0x1201   :  { %4428 = vrot.lane.b32.xlu1 %v4426_v38, %s8096_s6  ;;  %v7613_v38 = vld [vmem:[#allocation14 + $0xc] ss:$16 sps:$4 sm:$0xff]  }
0x126f   :  { %v4762_v42 = vpop.xlane.xlu0 %4761 }
0x1270   :  { %v4766_v43 = vsub.f32 %v4704_v46, %v4762_v42  ;;  %v7622_v46 = vld [vmem:[#allocation14 + $0x64] ss:$16 sps:$4 sm:$0xff]   ;;  %v7632_v42 = vld [vmem:[#allocation14 + $0xa0] ss:$16 sps:$4 sm:$0xff]  }
0x1271   :  { %v4765_v45 = vpop.xlane.xlu1 %4764 }
0x1272   :  { %v4768_v53 = vmul.f32 1.442695, %v4766_v43  ;;  %v4767_v61 = vsub.f32 %v4754_v31, %v4765_v45  ;;  %v7623_v31 = vld [vmem:[#allocation14 + $0x48] ss:$16 sps:$4 sm:$0xff]   ;;  %v7640_v45 = vld [vmem:[#allocation14 + $0xc4] ss:$16 sps:$4 sm:$0xff]  }
0x1273   :  { %v7635_v43 = vld [vmem:[#allocation14 + $0x88] ss:$16 sps:$4 sm:$0xff]  }
0x1274   :  { %7853 = vpow2.f32 %v4768_v53  ;;  %v4770_v55 = vmul.f32 1.442695, %v4767_v61  ;;  %v7643_v53 = vld [vmem:[#allocation14 + $0xac] ss:$16 sps:$4 sm:$0xff]   ;;  %v7638_v61 = vld [vmem:[#allocation14 + $0xc0] ss:$16 sps:$4 sm:$0xff]  }
0x1275   :  { %v4833_v4 = vpop.permute.xlu1 %4832 }
0x1276   :  { %7855 = vpow2.f32 %v4770_v55  ;;  %v4838_v15 = vsel %vm3205_vm2, %v4833_v4, 0  ;;  %v7641_v55 = vld [vmem:[#allocation14 + $0xa8] ss:$16 sps:$4 sm:$0xff]   ;;  %v7646_v4 = vld [vmem:[#allocation14 + $0xe4] ss:$16 sps:$4 sm:$0xff]  }
0x1277   :  { %6938 = vmatpush3.bf16.msra.mxu1 %v4838_v15  ;;  %v7649_v15 = vld [vmem:[#allocation14 + $0xcc] ss:$16 sps:$4 sm:$0xff]  }
0x1278   :  { %5844 = vmatprep.subr.bf16.mxu1 %v7613_v38  ;;  %v7661_v38 = vld [vmem:[#allocation14 + $0x10c] ss:$16 sps:$4 sm:$0xff]  }
0x1279   :  { %v3975_v63 = vpop.permute.xlu1 %3974 }
0x127a   :  { %3977 = vst.msk [vmem:[#allocation2 + $0x8] sm:$0xff] %vm3522_vm4, %v3975_v63  ;;  %v7644_v63 = vld [vmem:[#allocation14 + $0xe0] ss:$16 sps:$4 sm:$0xff]  }
0x127d   :  { %v3520_v11 = vpop.permute.xlu1 %3519 }
0x127e   :  { %v7854_v12 = vpop.eup %7853  ;;  %3523 = vst.msk [vmem:[#allocation2] sm:$0xff] %vm3522_vm4, %v3520_v11  ;;  %v7647_v11 = vld [vmem:[#allocation14 + $0xc8] ss:$16 sps:$4 sm:$0xff]  }
0x127f   :  { %v4772_v37 = vsel %vm3177_vm3, %v7854_v12, 0.0 }
0x1280   :  { %v7856_v39 = vpop.eup %7855  ;;  %4773 = vadd.xlane.f32.xlu0 %v4772_v37  ;;  %v7655_v37 = vld [vmem:[#allocation14 + $0xec] ss:$16 sps:$4 sm:$0xff]  }
0x1281   :  { %v4429_v17 = vpop.permute.xlu1 %4428  ;;  %v4775_v6 = vsel %vm3177_vm3, %v7856_v39, 0.0  ;;  %v4965_v44 = vld [vmem:[#allocation2 + $0x8] sm:$0xff] }
0x1282   :  { %4431 = vst.msk [vmem:[#allocation2 + $0x10] sm:$0xff] %vm3522_vm4, %v4429_v17  ;;  %v7653_v17 = vld [vmem:[#allocation14 + $0xe8] ss:$16 sps:$4 sm:$0xff]  }
0x1284   :  { %4776 = vadd.xlane.f32.xlu0 %v4775_v6  ;;  %v7658_v6 = vld [vmem:[#allocation14 + $0x124] ss:$16 sps:$4 sm:$0xff]  }
0x129a   :  { %4784 = vrot.lane.b32.xlu0 %v8700_v58, %s8096_s6  ;;  %v7610_v58 = vld [vmem:[#allocation14 + $0x24] ss:$16 sps:$4 sm:$0xff]  }
0x130d   :  { %v4774_v23 = vpop.xlane.xlu0 %4773 }
0x130e   :  { %7857 = vrcp.f32 %v4774_v23  ;;  %v7656_v23 = vld [vmem:[#allocation14 + $0x120] ss:$16 sps:$4 sm:$0xff]  }
0x1311   :  { %v4777_v60 = vpop.xlane.xlu0 %4776 }
0x1312   :  { %7859 = vrcp.f32 %v4777_v60  ;;  %v7659_v60 = vld [vmem:[#allocation14 + $0x108] ss:$16 sps:$4 sm:$0xff]  }
0x1315   :  { %v4785_v48 = vpop.permute.xlu0 %4784 }
0x1316   :  { %v4790_v8 = vsel %vm3205_vm2, %v4785_v48, 0  ;;  %v7667_v48 = vld [vmem:[#allocation14 + $0x12c] ss:$16 sps:$4 sm:$0xff]  }
0x1317   :  { %6932 = vmatpush3.bf16.msra.mxu0 %v4790_v8  ;;  %v7662_v8 = vld [vmem:[#allocation14 + $0x140] ss:$16 sps:$4 sm:$0xff]  }
0x1318   :  { %v7858_v54 = vpop.eup %7857  ;;  %5758 = vmatprep.subr.bf16.mxu0 %v7607_v7  ;;  %v7664_v7 = vld [vmem:[#allocation14 + $0x144] ss:$16 sps:$4 sm:$0xff]  }
0x1319   :  { %v8788_v29 = vmul.f32 %v7858_v54, %v7854_v12  ;;  %v7652_v12 = vld [vmem:[#allocation14 + $0x104] ss:$16 sps:$4 sm:$0xff]   ;;  %v7665_v54 = vld [vmem:[#allocation14 + $0x128] ss:$16 sps:$4 sm:$0xff]  }
0x131b   :  { %v4782_v35 = vpack.c.bf16 %v8788_v29, %v8788_v29 }
0x131c   :  { %v7860_v9 = vpop.eup %7859 }
0x131d   :  { %v8792_v14 = vmul.f32 %v7860_v9, %v7856_v39  ;;  %6934 = vmatmul.mubr.msk.bf16.vlgmr.msra.gmra.mrb[72].mxu0 %vm3177_vm3, %v4782_v35  ;;  %v7650_v39 = vld [vmem:[#allocation14 + $0x100] ss:$16 sps:$4 sm:$0xff]   ;;  %v7673_v35 = vld [vmem:[#allocation14 + $0x14c] ss:$16 sps:$4 sm:$0xff]   ;;  %v7671_v9 = vld [vmem:[#allocation14 + $0x148] ss:$16 sps:$4 sm:$0xff]  }
0x131e   :  { %5759 = vmatpush1.bf16.msra.mxu0 %v7605_v3  ;;  %5790 = vmatprep.mubr.bf16.mxu0 %v4965_v44  ;;  %v7670_v3 = vld [vmem:[#allocation14 + $0x164] ss:$16 sps:$4 sm:$0xff]  }
0x131f   :  { %5760 = vmatprep.subr.bf16.mxu0 %v7610_v58  ;;  %v4783_v22 = vpack.c.bf16 %v8792_v14, %v8792_v14  ;;  %v7668_v58 = vld [vmem:[#allocation14 + $0x160] ss:$16 sps:$4 sm:$0xff]  }
0x1321   :  { %6940 = vmatmul.mubr.msk.bf16.vlgmr.msra.gmra.mrb[72].mxu1 %vm3177_vm3, %v4783_v22  ;;  %v7677_v22 = vld [vmem:[#allocation14 + $0x168] ss:$16 sps:$4 sm:$0xff]  }
0x1322   :  { %5761 = vmatpush1.bf16.msra.mxu0 %v7608_v18  ;;  %5845 = vmatpush1.bf16.msra.mxu1 %v7611_v20  ;;  %v7679_v18 = vld [vmem:[#allocation14 + $0x16c] ss:$16 sps:$4 sm:$0xff]   ;;  %v7674_v20 = vld [vmem:[#allocation14 + $0x180] ss:$16 sps:$4 sm:$0xff]  }
0x1323   :  { %5876 = vmatprep.mubr.bf16.mxu1 %v4965_v44  ;;  %5762 = vmatprep.subr.bf16.mxu0 %v7616_v0  ;;  %v7676_v44 = vld [vmem:[#allocation14 + $0x184] ss:$16 sps:$4 sm:$0xff]  }
0x1324   :  { %5846 = vmatprep.subr.bf16.mxu1 %v7619_v52  ;;  %v7682_v0 = vld [vmem:[#allocation14 + $0x1a4] ss:$16 sps:$4 sm:$0xff]   ;;  %v7685_v52 = vld [vmem:[#allocation14 + $0x18c] ss:$16 sps:$4 sm:$0xff]  }
0x1326   :  { %5763 = vmatpush1.bf16.msra.mxu0 %v7614_v24  ;;  %5847 = vmatpush1.bf16.msra.mxu1 %v7617_v36  ;;  %v7680_v24 = vld [vmem:[#allocation14 + $0x1a0] ss:$16 sps:$4 sm:$0xff]   ;;  %v7683_v36 = vld [vmem:[#allocation14 + $0x188] ss:$16 sps:$4 sm:$0xff]  }
0x1327   :  { %5764 = vmatprep.subr.bf16.mxu0 %v7622_v46  ;;  %5848 = vmatprep.subr.bf16.mxu1 %v7625_v30  ;;  %v7688_v46 = vld [vmem:[#allocation14 + $0x1c4] ss:$16 sps:$4 sm:$0xff]   ;;  %v7691_v30 = vld [vmem:[#allocation14 + $0x1ac] ss:$16 sps:$4 sm:$0xff]  }
0x132a   :  { %5765 = vmatpush1.bf16.msra.mxu0 %v7620_v51  ;;  %5849 = vmatpush1.bf16.msra.mxu1 %v7623_v31  ;;  %v7686_v51 = vld [vmem:[#allocation14 + $0x1c0] ss:$16 sps:$4 sm:$0xff]   ;;  %v7689_v31 = vld [vmem:[#allocation14 + $0x1a8] ss:$16 sps:$4 sm:$0xff]  }
0x132b   :  { %5766 = vmatprep.subr.bf16.mxu0 %v7628_v59  ;;  %5850 = vmatprep.subr.bf16.mxu1 %v7631_v34  ;;  %v7694_v59 = vld [vmem:[#allocation14 + $0x1e4] ss:$16 sps:$4 sm:$0xff]   ;;  %v7697_v34 = vld [vmem:[#allocation14 + $0x1cc] ss:$16 sps:$4 sm:$0xff]  }
0x132e   :  { %5767 = vmatpush1.bf16.msra.mxu0 %v7626_v1  ;;  %5851 = vmatpush1.bf16.msra.mxu1 %v7629_v40  ;;  %v7692_v1 = vld [vmem:[#allocation14 + $0x1e0] ss:$16 sps:$4 sm:$0xff]   ;;  %v7695_v40 = vld [vmem:[#allocation14 + $0x1c8] ss:$16 sps:$4 sm:$0xff]  }
0x132f   :  { %5768 = vmatprep.subr.bf16.mxu0 %v7634_v26  ;;  %5852 = vmatprep.subr.bf16.mxu1 %v7637_v27  ;;  %v7700_v26 = vld [vmem:[#allocation14 + $0x1ec] ss:$16 sps:$4 sm:$0xff]   ;;  %v7698_v27 = vld [vmem:[#allocation14 + $0x1e8] ss:$16 sps:$4 sm:$0xff]  }
0x1332   :  { %5769 = vmatpush1.bf16.msra.mxu0 %v7632_v42  ;;  %5853 = vmatpush1.bf16.msra.mxu1 %v7635_v43  ;;  %v4964_v42 = vld [vmem:[#allocation2] sm:$0xff] }
0x1333   :  { %5770 = vmatprep.subr.bf16.mxu0 %v7640_v45  ;;  %5854 = vmatprep.subr.bf16.mxu1 %v7643_v53  ;;  %v7701_v43 = vld [vmem:[#allocation14 + $0x200] ss:$16 sps:$4 sm:$0xff]   ;;  %v7703_v45 = vld [vmem:[#allocation14 + $0x204] ss:$16 sps:$4 sm:$0xff]   ;;  %v7704_v53 = vld [vmem:[#allocation14 + $0x208] ss:$16 sps:$4 sm:$0xff]  }
0x1336   :  { %5771 = vmatpush1.bf16.msra.mxu0 %v7638_v61  ;;  %5855 = vmatpush1.bf16.msra.mxu1 %v7641_v55  ;;  %v7706_v61 = vld [vmem:[#allocation14 + $0x20c] ss:$16 sps:$4 sm:$0xff]   ;;  %v7709_v55 = vld [vmem:[#allocation14 + $0x224] ss:$16 sps:$4 sm:$0xff]  }
0x1337   :  { %5772 = vmatprep.subr.bf16.mxu0 %v7646_v4  ;;  %5856 = vmatprep.subr.bf16.mxu1 %v7649_v15  ;;  %v7712_v4 = vld [vmem:[#allocation14 + $0x22c] ss:$16 sps:$4 sm:$0xff]   ;;  %v7707_v15 = vld [vmem:[#allocation14 + $0x220] ss:$16 sps:$4 sm:$0xff]  }
0x133a   :  { %5773 = vmatpush1.bf16.msra.mxu0 %v7644_v63  ;;  %5857 = vmatpush1.bf16.msra.mxu1 %v7647_v11  ;;  %v7710_v63 = vld [vmem:[#allocation14 + $0x228] ss:$16 sps:$4 sm:$0xff]   ;;  %v7715_v11 = vld [vmem:[#allocation14 + $0x244] ss:$16 sps:$4 sm:$0xff]  }
0x133b   :  { %5774 = vmatprep.subr.bf16.mxu0 %v7652_v12  ;;  %5858 = vmatprep.subr.bf16.mxu1 %v7655_v37  ;;  %v7718_v12 = vld [vmem:[#allocation14 + $0x24c] ss:$16 sps:$4 sm:$0xff]   ;;  %v7713_v37 = vld [vmem:[#allocation14 + $0x240] ss:$16 sps:$4 sm:$0xff]  }
0x133e   :  { %5775 = vmatpush1.bf16.msra.mxu0 %v7650_v39  ;;  %5859 = vmatpush1.bf16.msra.mxu1 %v7653_v17  ;;  %v7716_v39 = vld [vmem:[#allocation14 + $0x248] ss:$16 sps:$4 sm:$0xff]   ;;  %v7721_v17 = vld [vmem:[#allocation14 + $0x264] ss:$16 sps:$4 sm:$0xff]  }
0x133f   :  { %5776 = vmatprep.subr.bf16.mxu0 %v7658_v6  ;;  %5860 = vmatprep.subr.bf16.mxu1 %v7661_v38  ;;  %v7724_v6 = vld [vmem:[#allocation14 + $0x26c] ss:$16 sps:$4 sm:$0xff]   ;;  %v7719_v38 = vld [vmem:[#allocation14 + $0x260] ss:$16 sps:$4 sm:$0xff]  }
0x1342   :  { %5777 = vmatpush1.bf16.msra.mxu0 %v7656_v23  ;;  %5861 = vmatpush1.bf16.msra.mxu1 %v7659_v60  ;;  %v7722_v23 = vld [vmem:[#allocation14 + $0x268] ss:$16 sps:$4 sm:$0xff]   ;;  %v7727_v60 = vld [vmem:[#allocation14 + $0x284] ss:$16 sps:$4 sm:$0xff]  }
0x1343   :  { %5778 = vmatprep.subr.bf16.mxu0 %v7664_v7  ;;  %5862 = vmatprep.subr.bf16.mxu1 %v7667_v48  ;;  %v7730_v7 = vld [vmem:[#allocation14 + $0x28c] ss:$16 sps:$4 sm:$0xff]   ;;  %v7725_v48 = vld [vmem:[#allocation14 + $0x280] ss:$16 sps:$4 sm:$0xff]  }
0x1346   :  { %5779 = vmatpush1.bf16.msra.mxu0 %v7662_v8  ;;  %5863 = vmatpush1.bf16.msra.mxu1 %v7665_v54  ;;  %v7728_v8 = vld [vmem:[#allocation14 + $0x288] ss:$16 sps:$4 sm:$0xff]   ;;  %v7733_v54 = vld [vmem:[#allocation14 + $0x2a4] ss:$16 sps:$4 sm:$0xff]  }
0x1347   :  { %5780 = vmatprep.subr.bf16.mxu0 %v7670_v3  ;;  %5864 = vmatprep.subr.bf16.mxu1 %v7673_v35  ;;  %v7736_v3 = vld [vmem:[#allocation14 + $0x2ac] ss:$16 sps:$4 sm:$0xff]   ;;  %v7731_v35 = vld [vmem:[#allocation14 + $0x2a0] ss:$16 sps:$4 sm:$0xff]  }
0x134a   :  { %5781 = vmatpush1.bf16.msra.mxu0 %v7668_v58  ;;  %5865 = vmatpush1.bf16.msra.mxu1 %v7671_v9  ;;  %v7734_v58 = vld [vmem:[#allocation14 + $0x2a8] ss:$16 sps:$4 sm:$0xff]   ;;  %v7739_v9 = vld [vmem:[#allocation14 + $0x2c4] ss:$16 sps:$4 sm:$0xff]  }
0x134b   :  { %5782 = vmatprep.subr.bf16.mxu0 %v7676_v44  ;;  %5866 = vmatprep.subr.bf16.mxu1 %v7679_v18  ;;  %v7742_v44 = vld [vmem:[#allocation14 + $0x2cc] ss:$16 sps:$4 sm:$0xff]   ;;  %v7737_v18 = vld [vmem:[#allocation14 + $0x2c0] ss:$16 sps:$4 sm:$0xff]  }
0x134e   :  { %5783 = vmatpush1.bf16.msra.mxu0 %v7674_v20  ;;  %5867 = vmatpush1.bf16.msra.mxu1 %v7677_v22  ;;  %v7740_v20 = vld [vmem:[#allocation14 + $0x2c8] ss:$16 sps:$4 sm:$0xff]   ;;  %v7745_v22 = vld [vmem:[#allocation14 + $0x2e4] ss:$16 sps:$4 sm:$0xff]  }
0x134f   :  { %5784 = vmatprep.subr.bf16.mxu0 %v7682_v0  ;;  %5868 = vmatprep.subr.bf16.mxu1 %v7685_v52  ;;  %v7748_v0 = vld [vmem:[#allocation14 + $0x2ec] ss:$16 sps:$4 sm:$0xff]   ;;  %v7743_v52 = vld [vmem:[#allocation14 + $0x2e0] ss:$16 sps:$4 sm:$0xff]  }
0x1352   :  { %5785 = vmatpush1.bf16.msra.mxu0 %v7680_v24  ;;  %5869 = vmatpush1.bf16.msra.mxu1 %v7683_v36  ;;  %v7746_v24 = vld [vmem:[#allocation14 + $0x2e8] ss:$16 sps:$4 sm:$0xff]   ;;  %v7751_v36 = vld [vmem:[#allocation14 + $0x304] ss:$16 sps:$4 sm:$0xff]  }
0x1353   :  { %5786 = vmatprep.subr.bf16.mxu0 %v7688_v46  ;;  %5870 = vmatprep.subr.bf16.mxu1 %v7691_v30  ;;  %v7754_v46 = vld [vmem:[#allocation14 + $0x30c] ss:$16 sps:$4 sm:$0xff]   ;;  %v7749_v30 = vld [vmem:[#allocation14 + $0x300] ss:$16 sps:$4 sm:$0xff]  }
0x1356   :  { %5787 = vmatpush1.bf16.msra.mxu0 %v7686_v51  ;;  %5871 = vmatpush1.bf16.msra.mxu1 %v7689_v31  ;;  %v7752_v51 = vld [vmem:[#allocation14 + $0x308] ss:$16 sps:$4 sm:$0xff]   ;;  %v7757_v31 = vld [vmem:[#allocation14 + $0x324] ss:$16 sps:$4 sm:$0xff]  }
0x1357   :  { %5788 = vmatprep.subr.bf16.mxu0 %v7694_v59  ;;  %5872 = vmatprep.subr.bf16.mxu1 %v7697_v34  ;;  %v7760_v59 = vld [vmem:[#allocation14 + $0x32c] ss:$16 sps:$4 sm:$0xff]   ;;  %v7755_v34 = vld [vmem:[#allocation14 + $0x320] ss:$16 sps:$4 sm:$0xff]  }
0x135a   :  { %5789 = vmatpush1.bf16.msra.mxu0 %v7692_v1  ;;  %5873 = vmatpush1.bf16.msra.mxu1 %v7695_v40  ;;  %v7758_v1 = vld [vmem:[#allocation14 + $0x328] ss:$16 sps:$4 sm:$0xff]   ;;  %v7763_v40 = vld [vmem:[#allocation14 + $0x344] ss:$16 sps:$4 sm:$0xff]  }
0x135b   :  { %5874 = vmatprep.subr.bf16.mxu1 %v7700_v26  ;;  %5801 = vmatprep.subr.bf16.mxu0 %v7703_v45  ;;  %v7766_v26 = vld [vmem:[#allocation14 + $0x34c] ss:$16 sps:$4 sm:$0xff]  }
0x135c   :  { %v7772_v45 = vld [vmem:[#allocation14 + $0x36c] ss:$16 sps:$4 sm:$0xff]  }
0x135d   :  { %5791 = vmatmul.mubr.bf16.vlgmr.msra.gmra.mrb[76].mxu0 %v4964_v42 }
0x135e   :  { %5875 = vmatpush1.bf16.msra.mxu1 %v7698_v27  ;;  %5802 = vmatpush1.bf16.msra.mxu0 %v7701_v43  ;;  %v7761_v27 = vld [vmem:[#allocation14 + $0x340] ss:$16 sps:$4 sm:$0xff]   ;;  %v7769_v43 = vld [vmem:[#allocation14 + $0x364] ss:$16 sps:$4 sm:$0xff]  }
0x135f   :  { %5887 = vmatprep.subr.bf16.mxu1 %v7706_v61  ;;  %5803 = vmatprep.subr.bf16.mxu0 %v7709_v55  ;;  %v7770_v61 = vld [vmem:[#allocation14 + $0x368] ss:$16 sps:$4 sm:$0xff]   ;;  %v7775_v55 = vld [vmem:[#allocation14 + $0x384] ss:$16 sps:$4 sm:$0xff]  }
0x1361   :  { %5877 = vmatmul.mubr.bf16.vlgmr.msra.gmra.mrb[76].mxu1 %v4964_v42  ;;  %v7764_v42 = vld [vmem:[#allocation14 + $0x348] ss:$16 sps:$4 sm:$0xff]  }
0x1362   :  { %5888 = vmatpush1.bf16.msra.mxu1 %v7704_v53  ;;  %5804 = vmatpush1.bf16.msra.mxu0 %v7707_v15  ;;  %v7767_v53 = vld [vmem:[#allocation14 + $0x360] ss:$16 sps:$4 sm:$0xff]  }
0x1363   :  { %5889 = vmatprep.subr.bf16.mxu1 %v7712_v4  ;;  %5805 = vmatprep.subr.bf16.mxu0 %v7715_v11  ;;  %v7778_v4 = vld [vmem:[#allocation14 + $0x38c] ss:$16 sps:$4 sm:$0xff]   ;;  %v7773_v15 = vld [vmem:[#allocation14 + $0x380] ss:$16 sps:$4 sm:$0xff]   ;;  %v7781_v11 = vld [vmem:[#allocation14 + $0x3a4] ss:$16 sps:$4 sm:$0xff]  }
0x1366   :  { %5890 = vmatpush1.bf16.msra.mxu1 %v7710_v63  ;;  %5806 = vmatpush1.bf16.msra.mxu0 %v7713_v37  ;;  %v7776_v63 = vld [vmem:[#allocation14 + $0x388] ss:$16 sps:$4 sm:$0xff]   ;;  %v7779_v37 = vld [vmem:[#allocation14 + $0x3a0] ss:$16 sps:$4 sm:$0xff]  }
0x1367   :  { %5891 = vmatprep.subr.bf16.mxu1 %v7718_v12  ;;  %5807 = vmatprep.subr.bf16.mxu0 %v7721_v17  ;;  %v7784_v12 = vld [vmem:[#allocation14 + $0x3ac] ss:$16 sps:$4 sm:$0xff]   ;;  %v7785_v17 = vld [vmem:[#allocation14 + $0x3c0] ss:$16 sps:$4 sm:$0xff]  }
0x136a   :  { %5892 = vmatpush1.bf16.msra.mxu1 %v7716_v39  ;;  %5808 = vmatpush1.bf16.msra.mxu0 %v7719_v38  ;;  %v7782_v39 = vld [vmem:[#allocation14 + $0x3a8] ss:$16 sps:$4 sm:$0xff]  }
0x136b   :  { %5893 = vmatprep.subr.bf16.mxu1 %v7724_v6  ;;  %5809 = vmatprep.subr.bf16.mxu0 %v7727_v60  ;;  %v7787_v6 = vld [vmem:[#allocation14 + $0x3c4] ss:$16 sps:$4 sm:$0xff]   ;;  %v7788_v38 = vld [vmem:[#allocation14 + $0x3c8] ss:$16 sps:$4 sm:$0xff]  }
0x136c   :  { %v7793_v60 = vld [vmem:[#allocation14 + $0x3e4] ss:$16 sps:$4 sm:$0xff]  }
0x136e   :  { %5894 = vmatpush1.bf16.msra.mxu1 %v7722_v23  ;;  %5810 = vmatpush1.bf16.msra.mxu0 %v7725_v48  ;;  %v7790_v23 = vld [vmem:[#allocation14 + $0x3cc] ss:$16 sps:$4 sm:$0xff]   ;;  %v7791_v48 = vld [vmem:[#allocation14 + $0x3e0] ss:$16 sps:$4 sm:$0xff]  }
0x136f   :  { %5895 = vmatprep.subr.bf16.mxu1 %v7730_v7  ;;  %5811 = vmatprep.subr.bf16.mxu0 %v7733_v54  ;;  %v7796_v7 = vld [vmem:[#allocation14 + $0x3ec] ss:$16 sps:$4 sm:$0xff]  }
0x1372   :  { %5896 = vmatpush1.bf16.msra.mxu1 %v7728_v8  ;;  %5812 = vmatpush1.bf16.msra.mxu0 %v7731_v35  ;;  %v7794_v8 = vld [vmem:[#allocation14 + $0x3e8] ss:$16 sps:$4 sm:$0xff]  }
0x1373   :  { %5897 = vmatprep.subr.bf16.mxu1 %v7736_v3  ;;  %5813 = vmatprep.subr.bf16.mxu0 %v7739_v9 }
0x1376   :  { %5898 = vmatpush1.bf16.msra.mxu1 %v7734_v58  ;;  %5814 = vmatpush1.bf16.msra.mxu0 %v7737_v18 }
0x1377   :  { %5899 = vmatprep.subr.bf16.mxu1 %v7742_v44  ;;  %5815 = vmatprep.subr.bf16.mxu0 %v7745_v22 }
0x137a   :  { %5900 = vmatpush1.bf16.msra.mxu1 %v7740_v20  ;;  %5816 = vmatpush1.bf16.msra.mxu0 %v7743_v52 }
0x137b   :  { %5901 = vmatprep.subr.bf16.mxu1 %v7748_v0  ;;  %5817 = vmatprep.subr.bf16.mxu0 %v7751_v36  ;;  %v5096_v36 = vld [vmem:[%s8941_s10] sm:$0xf]  ;;  %s8097_s10 = smov 8  }
0x137e   :  { %5902 = vmatpush1.bf16.msra.mxu1 %v7746_v24  ;;  %5818 = vmatpush1.bf16.msra.mxu0 %v7749_v30  ;;  %v4966_v24 = vld [vmem:[#allocation2 + $0x10] sm:$0xff]  ;;  %v5109_v30 = vrot.slane %v5096_v36, %v8321_v62 }
0x137f   :  { %5903 = vmatprep.subr.bf16.mxu1 %v7754_v46  ;;  %5819 = vmatprep.subr.bf16.mxu0 %v7757_v31  ;;  %v5101_v46 = vrot.slane %v5096_v36, %v8356_v5 }
0x1382   :  { %5904 = vmatpush1.bf16.msra.mxu1 %v7752_v51  ;;  %5820 = vmatpush1.bf16.msra.mxu0 %v7755_v34  ;;  %v5105_v51 = vrot.slane %v5096_v36, %v8309_v49  ;;  %v5113_v34 = vrot.slane %v5096_v36, %v8328_v2 }
0x1383   :  { %5905 = vmatprep.subr.bf16.mxu1 %v7760_v59  ;;  %5821 = vmatprep.subr.bf16.mxu0 %v7763_v40 }
0x1386   :  { %5906 = vmatpush1.bf16.msra.mxu1 %v7758_v1  ;;  %5822 = vmatpush1.bf16.msra.mxu0 %v7761_v27 }
0x1387   :  { %5907 = vmatprep.subr.bf16.mxu1 %v7766_v26  ;;  %5823 = vmatprep.subr.bf16.mxu0 %v7769_v43 }
0x138a   :  { %5908 = vmatpush1.bf16.msra.mxu1 %v7764_v42  ;;  %5824 = vmatpush1.bf16.msra.mxu0 %v7767_v53  ;;  %v7865_v53 = vld [vmem:[#allocation3] sm:$0xff] }
0x138b   :  { %5909 = vmatprep.subr.bf16.mxu1 %v7772_v45  ;;  %5825 = vmatprep.subr.bf16.mxu0 %v7775_v55 }
0x138e   :  { %5910 = vmatpush1.bf16.msra.mxu1 %v7770_v61  ;;  %5826 = vmatpush1.bf16.msra.mxu0 %v7773_v15 }
0x138f   :  { %5911 = vmatprep.subr.bf16.mxu1 %v7778_v4  ;;  %5827 = vmatprep.subr.bf16.mxu0 %v7781_v11 }
0x1392   :  { %5912 = vmatpush1.bf16.msra.mxu1 %v7776_v63  ;;  %5828 = vmatpush1.bf16.msra.mxu0 %v7779_v37  ;;  %v7866_v63 = vld [vmem:[#allocation3 + $0x8] sm:$0xff] }
0x1393   :  { %5913 = vmatprep.subr.bf16.mxu1 %v7784_v12  ;;  %5829 = vmatprep.subr.bf16.mxu0 %v7787_v6 }
0x1396   :  { %5914 = vmatpush1.bf16.msra.mxu1 %v7782_v39  ;;  %5830 = vmatpush1.bf16.msra.mxu0 %v7785_v17  ;;  %v7867_v17 = vld [vmem:[#allocation3 + $0x20] sm:$0xff] }
0x1397   :  { %5915 = vmatprep.subr.bf16.mxu1 %v7790_v23  ;;  %5831 = vmatprep.subr.bf16.mxu0 %v7793_v60 }
0x139a   :  { %5916 = vmatpush1.bf16.msra.mxu1 %v7788_v38  ;;  %5832 = vmatpush1.bf16.msra.mxu0 %v7791_v48  ;;  %v7868_v38 = vld [vmem:[#allocation3 + $0x10] sm:$0xff] }
0x139b   :  { %5917 = vmatprep.subr.bf16.mxu1 %v7796_v7  ;;  %v7869_v7 = vld [vmem:[#allocation3 + $0x28] sm:$0xff] }
0x139e   :  { %5918 = vmatpush1.bf16.msra.mxu1 %v7794_v8 }
0x13f0   :  { %v4826_v54 = vpop.f32.mrb[72].mxu0 }
0x13f1   :  { %v6935_v3 = vpop.f32.mrb[73].mxu0 }
0x13f2   :  { %v4829_v35 = vpop.f32.mrb[74].mxu0 }
0x13f3   :  { %v6936_v58 = vpop.f32.mrb[75].mxu0  ;;  %v7871_v35 = vld [vmem:[#allocation3 + $0x30] sm:$0xff] }
0x13f4   :  { %v4874_v9 = vpop.f32.mrb[72].mxu1 }
0x13f5   :  { %v4880_v44 = vpack.c.bf16 %v4874_v9, %v4826_v54  ;;  %v6941_v18 = vpop.f32.mrb[73].mxu1  ;;  %v7870_v54 = vld [vmem:[#allocation3 + $0x18] sm:$0xff] }
0x13f6   :  { %v4877_v20 = vpop.f32.mrb[74].mxu1  ;;  %v7872_v18 = vld [vmem:[#allocation3 + $0x38] sm:$0xff] }
0x13f7   :  { %v6942_v22 = vpop.f32.mrb[75].mxu1  ;;  %4882 = vrot.lane.b32.xlu0 %v4880_v44, %s8096_s6 }
0x1469   :  { %v4883_v0 = vpop.permute.xlu0 %4882 }
0x146a   :  { %4885 = vst.msk [vmem:[#allocation2 + $0x18] sm:$0xff] %vm3522_vm4, %v4883_v0 }
0x1471   :  { %v4967_v52 = vld [vmem:[#allocation2 + $0x18] sm:$0xff] }
0x1472   :  { %5833 = vmatprep.mubr.bf16.mxu0 %v4967_v52  ;;  %5919 = vmatprep.mubr.bf16.mxu1 %v4967_v52 }
0x1473   :  { %5834 = vmatmul.mubr.bf16.vlgmr.msra.gmra.mrb[76].mxu0 %v4966_v24  ;;  %5920 = vmatmul.mubr.bf16.vlgmr.msra.gmra.mrb[76].mxu1 %v4966_v24 }
0x1546   :  { %v5835_v31 = vpop.f32.mrb[76].mxu0  ;;  %v5921_v59 = vpop.f32.mrb[76].mxu1 }
0x1547   :  { %v6967_v1 = vadd.f32 %v5835_v31, %v5101_v46  ;;  %v5837_v40 = vpop.f32.mrb[77].mxu0  ;;  %v5923_v26 = vpop.f32.mrb[77].mxu1  ;;  %v6971_v27 = vadd.f32 %v5921_v59, %v5109_v30 }
0x1548   :  { %v6968_v42 = vadd.f32 %v5837_v40, %v5105_v51  ;;  %v5839_v43 = vpop.f32.mrb[78].mxu0  ;;  %v5925_v45 = vpop.f32.mrb[78].mxu1  ;;  %v6972_v12 = vadd.f32 %v5923_v26, %v5113_v34 }
0x1549   :  { %v5930_v61 = vadd.f32 %v7865_v53, %v6967_v1  ;;  %v6969_v55 = vadd.f32 %v5839_v43, %v5101_v46  ;;  %v5841_v4 = vpop.f32.mrb[79].mxu0  ;;  %v5927_v15 = vpop.f32.mrb[79].mxu1  ;;  %v6973_v37 = vadd.f32 %v5925_v45, %v5109_v30  ;;  %v5932_v23 = vadd.f32 %v7868_v38, %v6971_v27 }
0x154a   :  { %v5931_v11 = vadd.f32 %v7866_v63, %v6968_v42  ;;  %v6970_v39 = vadd.f32 %v5841_v4, %v5105_v51  ;;  %v6974_v8 = vadd.f32 %v5927_v15, %v5113_v34  ;;  %v5933_v3 = vadd.f32 %v7870_v54, %v6972_v12 }
0x154b   :  { %v5934_v6 = vadd.f32 %v7867_v17, %v6969_v55  ;;  %v5936_v58 = vadd.f32 %v7871_v35, %v6973_v37 }
0x154c   :  { %v5940_v60 = vadd.f32 %v5931_v11, %v5930_v61  ;;  %v5935_v48 = vadd.f32 %v7869_v7, %v6970_v39  ;;  %v5937_v20 = vadd.f32 %v7872_v18, %v6974_v8 }
0x154e   :  { %v5945_v9 = vadd.f32 %v5935_v48, %v5934_v6  ;;  %v5941_v44 = vadd.f32 %v5940_v60, %v5932_v23 }
0x1550   :  { %v5942_v22 = vadd.f32 %v5941_v44, %v5933_v3  ;;  %v5946_v0 = vadd.f32 %v5945_v9, %v5936_v58 }
0x1552   :  { %5943 = vadd.xlane.f32.xlu0 %v5942_v22  ;;  %v5947_v52 = vadd.f32 %v5946_v0, %v5937_v20 }
0x1554   :  { %5948 = vadd.xlane.f32.xlu1 %v5947_v52  ;;  %v5938_v52 = vld [vmem:[%s8942_s11] sm:$0xf] }
0x1565   :  { %4890 = vrot.lane.b32.xlu1 %v8482_v57, %s8097_s10 }
0x1568   :  { %4888 = vrot.lane.b32.xlu0 %v8476_v50, %s8097_s10 }
0x1569   :  { %4896 = vrot.lane.b32.xlu1 %v8536_v16, %s8088_s30 }
0x156c   :  { %4904 = vrot.lane.b32.xlu0 %v8577_v19, %s8098_s2 }
0x156d   :  { %4898 = vrot.lane.b32.xlu1 %v8538_v33, %s8088_s30  ;;  %s8102_s30 = smov [#allocation16]  }
0x156e   :  { %s6076_s19 = sshll.u32 %s8102_s30, 4  ;;  %s6077_s19 = int_to_ptr.vmem [resolvable:$true] %s6076_s19 }
0x156f   :  { %s8027_s11 = scalar_lea.vmem %s6077_s19, 256  ;;  %p8032_p1 = scmp.lt.s32.totalorder %s6077_s19, %s6077_s19 }
0x1570   :  { %4912 = vrot.lane.b32.xlu0 %v8637_v13, %s8086_s26  ;;  %p8028_p0 = scmp.ne.s32.totalorder %s6077_s19, %s8027_s11  ;;  %p8033_p2 = scmp.lt.s32.totalorder %s8027_s11, %s8027_s11 }
0x1571   :  { %4906 = vrot.lane.b32.xlu1 %v8583_v28, %s8098_s2 }
0x1572   :  { %p8034_p3 = por %p8033_p2, %p8032_p1 }
0x1574   :  { %4920 = vrot.lane.b32.xlu0 %v8678_v47, %s8099_s3  ;;  %p8035_p4 = pnand %p8034_p3, %p8028_p0 }
0x1575   :  { %4914 = vrot.lane.b32.xlu1 %v8639_v21, %s8086_s26 }
0x1579   :  { %4922 = vrot.lane.b32.xlu1 %v8684_v56, %s8099_s3 }
0x157d   :  { %4930 = vrot.lane.b32.xlu1 %v8740_v25, %s8100_s17 }
0x1581   :  { %4938 = vrot.lane.b32.xlu1 %v8792_v14, %s8101_s18 }
0x15df   :  { %v5944_v50 = vpop.xlane.xlu0 %5943 }
0x15e0   :  { %v5951_v57 = vmul.f32 0.001953125, %v5944_v50 }
0x15e1   :  { %v5949_v16 = vpop.xlane.xlu1 %5948 }
0x15e2   :  { %v8827_v33 = vsub.f32 %v5930_v61, %v5951_v57  ;;  %v8829_v19 = vsub.f32 %v5931_v11, %v5951_v57  ;;  %v5952_v28 = vmul.f32 0.001953125, %v5949_v16  ;;  %v8831_v21 = vsub.f32 %v5932_v23, %v5951_v57 }
0x15e3   :  { %v4889_v13 = vpop.permute.xlu0 %4888  ;;  %v8839_v14 = vsub.f32 %v5933_v3, %v5951_v57  ;;  %v5939_v57 = vld [vmem:[%s8943_s12] sm:$0xf]  ;;  %v5997_v16 = vrot.slane %v5938_v52, %v8356_v5 }
0x15e4   :  { %v8833_v47 = vsub.f32 %v5934_v6, %v5952_v28  ;;  %v8835_v56 = vsub.f32 %v5935_v48, %v5952_v28  ;;  %v5961_v25 = vmul.f32 %v8827_v33, %v8827_v33  ;;  %v5962_v36 = vmul.f32 %v8829_v19, %v8829_v19 }
0x15e5   :  { %v4891_v24 = vpop.permute.xlu1 %4890  ;;  %v8843_v46 = vsub.f32 %v5936_v58, %v5952_v28  ;;  %v5963_v59 = vmul.f32 %v8831_v21, %v8831_v21  ;;  %v4942_v1 = vsel %vm3177_vm3, %v8435_v32, %v4889_v13  ;;  %v5964_v27 = vmul.f32 %v8839_v14, %v8839_v14 }
0x15e6   :  { %v5965_v30 = vmul.f32 %v8833_v47, %v8833_v47  ;;  %v5966_v51 = vmul.f32 %v8835_v56, %v8835_v56  ;;  %v5969_v34 = vadd.f32 %v5962_v36, %v5961_v25  ;;  %v8855_v43 = vsub.f32 %v5937_v20, %v5952_v28 }
0x15e7   :  { %v4905_v31 = vpop.permute.xlu0 %4904  ;;  %v5967_v45 = vmul.f32 %v8843_v46, %v8843_v46  ;;  %v4943_v23 = vsel %vm3177_vm3, %v8440_v41, %v4891_v24  ;;  %v6001_v28 = vrot.slane %v5938_v52, %v8309_v49  ;;  %v6005_v13 = vrot.slane %v5938_v52, %v8321_v62 }
0x15e8   :  { %v5974_v40 = vadd.f32 %v5966_v51, %v5965_v30  ;;  %v5970_v42 = vadd.f32 %v5969_v34, %v5963_v59  ;;  %v5968_v11 = vmul.f32 %v8855_v43, %v8855_v43  ;;  %v6009_v25 = vrot.slane %v5938_v52, %v8328_v2 }
0x15e9   :  { %v4897_v26 = vpop.permute.xlu1 %4896 }
0x15ea   :  { %v4945_v53 = vsel %vm4944_vm5, %v4942_v1, %v4897_v26  ;;  %v5971_v4 = vadd.f32 %v5970_v42, %v5964_v27  ;;  %v5975_v32 = vadd.f32 %v5974_v40, %v5967_v45 }
0x15eb   :  { %v4948_v61 = vsel %vm4947_vm6, %v4945_v53, %v4905_v31  ;;  %v4913_v55 = vpop.permute.xlu0 %4912 }
0x15ec   :  { %v4951_v15 = vsel %vm4950_vm7, %v4948_v61, %v4913_v55  ;;  %5972 = vadd.xlane.f32.xlu0 %v5971_v4  ;;  %v5976_v37 = vadd.f32 %v5975_v32, %v5968_v11 }
0x15ed   :  { %v4899_v63 = vpop.permute.xlu1 %4898 }
0x15ee   :  { %v4946_v60 = vsel %vm4944_vm5, %v4943_v23, %v4899_v63 }
0x15ef   :  { %v4921_v12 = vpop.permute.xlu0 %4920 }
0x15f0   :  { %v4954_v39 = vsel %vm4953_vm8, %v4951_v15, %v4921_v12  ;;  %5977 = vadd.xlane.f32.xlu0 %v5976_v37 }
0x15f1   :  { %v4907_v17 = vpop.permute.xlu1 %4906 }
0x15f2   :  { %v4949_v48 = vsel %vm4947_vm6, %v4946_v60, %v4907_v17 }
0x15f5   :  { %v4915_v6 = vpop.permute.xlu1 %4914 }
0x15f6   :  { %v4952_v8 = vsel %vm4950_vm7, %v4949_v48, %v4915_v6 }
0x15f9   :  { %v4923_v38 = vpop.permute.xlu1 %4922 }
0x15fa   :  { %v4955_v54 = vsel %vm4953_vm8, %v4952_v8, %v4923_v38 }
0x15fd   :  { %v4931_v7 = vpop.permute.xlu1 %4930 }
0x15fe   :  { %v4958_v3 = vsel %vm4956_vm9, %v4955_v54, %v4931_v7 }
0x1601   :  { %v4939_v35 = vpop.permute.xlu1 %4938 }
0x1602   :  { %v4961_v58 = vsel %vm4959_vm10, %v4958_v3, %v4939_v35 }
0x1603   :  { %4963 = vst.msk [vmem:[#allocation16 + $0x8] sm:$0xff] %vm3084_vm1, %v4961_v58 }
0x1606   :  { %4928 = vrot.lane.b32.xlu0 %v8738_v10, %s8100_s17 }
0x160a   :  { %4936 = vrot.lane.b32.xlu0 %v8788_v29, %s8101_s18 }
0x1679   :  { %v5973_v41 = vpop.xlane.xlu0 %5972 }
0x167a   :  { %v5979_v9 = vmul.f32 0.001953125, %v5973_v41 }
0x167c   :  { %v5981_v44 = vadd.f32 1e-05, %v5979_v9 }
0x167d   :  { %v5978_v18 = vpop.xlane.xlu0 %5977 }
0x167e   :  { %7861 = vrsqrt.f32 %v5981_v44  ;;  %v5980_v20 = vmul.f32 0.001953125, %v5978_v18 }
0x1680   :  { %v5982_v22 = vadd.f32 1e-05, %v5980_v20 }
0x1681   :  { %v4929_v0 = vpop.permute.xlu0 %4928 }
0x1682   :  { %7863 = vrsqrt.f32 %v5982_v22  ;;  %v4957_v10 = vsel %vm4956_vm9, %v4954_v39, %v4929_v0 }
0x1685   :  { %v4937_v50 = vpop.permute.xlu0 %4936 }
0x1686   :  { %v4960_v29 = vsel %vm4959_vm10, %v4957_v10, %v4937_v50 }
0x1687   :  { %4962 = vst.msk [vmem:[#allocation16] sm:$0xff] %vm3084_vm1, %v4960_v29 }
0x1688   :  { %v7862_v24 = vpop.eup %7861 }
0x1689   :  { %8038 = shalt.err (!%p8035_p4)
}
0x168a   :  { %s8039_s12 = scalar_lea.hbm %s8945_s14, 256 }
0x168b   :  { %p8040_p5 = scmp.ne.s32.totalorder %s8945_s14, %s8039_s12  ;;  %p8043_p6 = scmp.lt.u32.totalorder %s8039_s12, %s8945_s14 }
0x168d   :  { %p8045_p7 = pnand %p8043_p6, %p8040_p5 }
0x168f   :  { %8048 = shalt.err (!%p8045_p7)
}
0x1690   :  { %s8103_s1 = smov 128   ;;  %v5985_v36 = vmul.f32 %v7862_v24, %v8827_v33  ;;  %v5986_v30 = vmul.f32 %v7862_v24, %v8829_v19  ;;  %v5987_v51 = vmul.f32 %v7862_v24, %v8831_v21  ;;  %v5988_v31 = vmul.f32 %v7862_v24, %v8839_v14  ;;  %v7864_v53 = vpop.eup %7863 }
0x1691   :  { %6082 = dma.vmem_to_hbm [thread:$0]  %s6077_s19, 256, %s8945_s14, [#allocation17], %s8103_s1, %s8103_s1, %s8097_s10   ;;  %v6026_v59 = vrot.slane %v5939_v57, %v8356_v5  ;;  %v6030_v34 = vrot.slane %v5939_v57, %v8309_v49  ;;  %v6034_v1 = vrot.slane %v5939_v57, %v8321_v62  ;;  %v6038_v40 = vrot.slane %v5939_v57, %v8328_v2 }
0x1692   :  { %v6014_v26 = vmul.f32 %v5997_v16, %v5985_v36  ;;  %v6015_v27 = vmul.f32 %v6001_v28, %v5986_v30  ;;  %v6016_v42 = vmul.f32 %v6005_v13, %v5987_v51  ;;  %v6017_v45 = vmul.f32 %v6009_v25, %v5988_v31  ;;  %s8104_s14 = smov [#allocation15]  }
0x1693   :  { %v5989_v33 = vmul.f32 %v7864_v53, %v8833_v47  ;;  %v5990_v19 = vmul.f32 %v7864_v53, %v8835_v56  ;;  %v5991_v21 = vmul.f32 %v7864_v53, %v8843_v46  ;;  %v5992_v14 = vmul.f32 %v7864_v53, %v8855_v43  ;;  %s6064_s6 = sshll.u32 %s8104_s14, 4  ;;  %s6065_s6 = int_to_ptr.vmem [resolvable:$true] %s6064_s6 }
0x1694   :  { %v6043_v5 = vadd.f32 %v6026_v59, %v6014_v26  ;;  %v6044_v61 = vadd.f32 %v6030_v34, %v6015_v27  ;;  %v6045_v49 = vadd.f32 %v6034_v1, %v6016_v42  ;;  %v6046_v55 = vadd.f32 %v6038_v40, %v6017_v45  ;;  %s8049_s27 = scalar_lea.vmem %s6065_s6, 1024  ;;  %p8054_p9 = scmp.lt.s32.totalorder %s6065_s6, %s6065_s6 }
0x1695   :  { %v6018_v62 = vmul.f32 %v5997_v16, %v5989_v33  ;;  %v6019_v2 = vmul.f32 %v6001_v28, %v5990_v19  ;;  %v6020_v4 = vmul.f32 %v6005_v13, %v5991_v21  ;;  %v6021_v32 = vmul.f32 %v6009_v25, %v5992_v14  ;;  %p8050_p8 = scmp.ne.s32.totalorder %s6065_s6, %s8049_s27  ;;  %p8055_p10 = scmp.lt.s32.totalorder %s8049_s27, %s8049_s27 }
0x1696   :  { %6051 = vst [vmem:[#allocation15] sm:$0xff] %v6043_v5  ;;  %6052 = vst [vmem:[#allocation15 + $0x8] sm:$0xff] %v6044_v61 }
0x1697   :  { %6053 = vst [vmem:[#allocation15 + $0x10] sm:$0xff] %v6045_v49  ;;  %6054 = vst [vmem:[#allocation15 + $0x18] sm:$0xff] %v6046_v55  ;;  %v6047_v47 = vadd.f32 %v6026_v59, %v6018_v62  ;;  %v6048_v56 = vadd.f32 %v6030_v34, %v6019_v2  ;;  %v6049_v15 = vadd.f32 %v6034_v1, %v6020_v4  ;;  %p8056_p11 = por %p8055_p10, %p8054_p9 }
0x1698   :  { %v6050_v46 = vadd.f32 %v6038_v40, %v6021_v32 }
0x1699   :  { %6055 = vst [vmem:[#allocation15 + $0x20] sm:$0xff] %v6047_v47  ;;  %6056 = vst [vmem:[#allocation15 + $0x28] sm:$0xff] %v6048_v56  ;;  %p8057_p12 = pnand %p8056_p11, %p8050_p8 }
0x169a   :  { %6057 = vst [vmem:[#allocation15 + $0x30] sm:$0xff] %v6049_v15  ;;  %6058 = vst [vmem:[#allocation15 + $0x38] sm:$0xff] %v6050_v46 }
0x169b   :  { %8060 = shalt.err (!%p8057_p12)
}
0x169c   :  { %s8061_s29 = scalar_lea.hbm %s8944_s13, 1024 }
0x169d   :  { %p8062_p13 = scmp.ne.s32.totalorder %s8944_s13, %s8061_s29  ;;  %p8065_p0 = scmp.lt.u32.totalorder %s8061_s29, %s8944_s13 }
0x169f   :  { %p8067_p1 = pnand %p8065_p0, %p8062_p13 }
0x16a1   :  { %8070 = shalt.err (!%p8067_p1)
}
0x16a2   :  { %6070 = dma.vmem_to_hbm [thread:$0]  %s6065_s6, 1024, %s8944_s13, [#allocation5], %s8948_s7, %s8948_s7, %s8086_s26  }
0x16a3   :  { %8079 = dma.done.wait [#allocation5], 1024  }
0x16a4   :  { %8080 = vsyncadd [#allocation5], 4294966272 }
0x16a5   :  { %8081 = dma.done.wait [#allocation17], 256  }
0x16a6   :  { %8082 = vsyncadd [#allocation17], 4294967040 }
0x16a7   :  { %6089 = vsyncpa [#allocation4], 1 }
0x16a8   :  { %6090 = vsyncpa [#allocation7], 1 }
0x16a9   :  { %6091 = vsyncpa [#allocation10], 1 }
0x16aa   :  { %6092 = vsyncpa [#allocation13], 1 }
0x16ab   :  { %6093 = vsyncpa [#allocation5], 1 }
0x16ac   :  { %6094 = vsyncpa [#allocation17], 1 }

</bundles_post_ra>
